<compile_context>
chip_gen: v7x
topology: tpu7x:2x2x1
jax: 0.10.0
libtpu: 0.0.40
codegen_flags: <defaults>
</compile_context>

<pallas_src>
import jax
import jax.numpy as jnp
from jax import lax
from jax.experimental import pallas as pl
from jax.experimental.pallas import tpu as pltpu

H = 128        # hidden size per direction
IN = 12        # input feature size
NUM_LAYERS = 3
FC1 = 64
OUT = 14


# ----------------------------- Pallas kernel --------------------------------

def _make_kernel(T, BP):
    """Builds the fused kernel for a (T, BP)-shaped (time, padded-batch) run."""
    H2 = 2 * H

    def kernel(x_ref,                                    # (T*BP, IN)
               wi0_ref, wh0_ref, bb0_ref,                # layer 0 fused weights
               wi1_ref, wh1_ref, bb1_ref,                # layer 1
               wi2_ref, wh2_ref, bb2_ref,                # layer 2
               fc1_w_ref, fc1_b_ref, fc2_w_ref, fc2_b_ref,
               o_ref,                                    # (T*BP, OUT)
               buf_a, buf_b):                            # VMEM (T*BP, 2H) x2

        def project(src, dst, w_ref, b_ref):
            # One fused (T*BP, Din) @ (Din, 2H) projection covering every
            # timestep and BOTH directions (fwd half in lanes [0,H), rev half
            # in lanes [H,2H)) of a layer: a single MXU pass per layer.
            dst[...] = (jnp.dot(src, w_ref[...],
                                preferred_element_type=jnp.float32)
                        + b_ref[...])

        def recurrence(buf, whh_ref):
            # Bidirectional scan with fwd+rev fused via block-diagonal W_hh:
            # one (BP,2H)@(2H,2H) MXU push per step.  Step s consumes time s
            # for the forward direction (lanes [0,H)) and time T-1-s for the
            # reverse direction (lanes [H,2H)); each (time, half) slot of
            # `buf` is read exactly once, at the step that overwrites it with
            # the corresponding hidden state (in-place).
            whh = whh_ref[...]

            def slot(t, lo, hi):
                return buf[pl.ds(t * BP, BP), lo:hi]

            # step 0: h_{-1} == 0 -> skip the recurrent matmul entirely.
            u = jnp.concatenate([slot(0, 0, H), slot(T - 1, H, H2)], axis=-1)
            h = jnp.tanh(u)
            buf[pl.ds(0, BP), 0:H] = h[:, 0:H]
            buf[pl.ds((T - 1) * BP, BP), H:H2] = h[:, H:H2]
            for s in range(1, T):                        # fully unrolled, T static
                u = jnp.concatenate([slot(s, 0, H), slot(T - 1 - s, H, H2)],
                                    axis=-1)
                h = jnp.tanh(u + jnp.dot(h, whh,
                                         preferred_element_type=jnp.float32))
                buf[pl.ds(s * BP, BP), 0:H] = h[:, 0:H]
                buf[pl.ds((T - 1 - s) * BP, BP), H:H2] = h[:, H:H2]
            # after the scan: buf[t*BP:(t+1)*BP] == concat(h_fwd[t], h_rev[t])

        # layer 0 (input -> A), layer 1 (A -> B), layer 2 (B -> A): ping-pong
        # so the big projection matmuls never read and write the same buffer.
        project(x_ref[...], buf_a, wi0_ref, bb0_ref)
        recurrence(buf_a, wh0_ref)
        project(buf_a[...], buf_b, wi1_ref, bb1_ref)
        recurrence(buf_b, wh1_ref)
        project(buf_b[...], buf_a, wi2_ref, bb2_ref)
        recurrence(buf_a, wh2_ref)

        # fused FC head, batched over all timesteps: relu(A @ W1 + b1) @ W2 + b2.
        z = jnp.maximum(
            jnp.dot(buf_a[...], fc1_w_ref[...],
                    preferred_element_type=jnp.float32) + fc1_b_ref[...], 0.0)
        o_ref[...] = (jnp.dot(z, fc2_w_ref[...],
                              preferred_element_type=jnp.float32)
                      + fc2_b_ref[...])

    return kernel


# ----------------------------- Python wrappers -------------------------------

def fuse_params(params):
    """Pre-fuse per-direction weights into the layout the kernel expects."""
    fused = {"layers": []}
    for l in range(NUM_LAYERS):
        pf = params["rnn"][(l, 0)]            # forward direction
        pr = params["rnn"][(l, 1)]            # reverse direction
        w_in = jnp.concatenate([pf["w_ih_t"], pr["w_ih_t"]], axis=1)   # (Din, 2H)
        z = jnp.zeros((H, H), jnp.float32)
        whh = jnp.concatenate(
            [jnp.concatenate([pf["w_hh_t"], z], axis=1),
             jnp.concatenate([z, pr["w_hh_t"]], axis=1)], axis=0)      # (2H, 2H)
        bias = jnp.concatenate(
            [pf["b_ih"] + pf["b_hh"], pr["b_ih"] + pr["b_hh"]]).reshape(1, 2 * H)
        fused["layers"].append((w_in, whh, bias))
    fused["fc1_w"] = params["fc1_w_t"]
    fused["fc1_b"] = params["fc1_b"].reshape(1, FC1)
    fused["fc2_w"] = params["fc2_w_t"]
    fused["fc2_b"] = params["fc2_b"].reshape(1, OUT)
    return fused


def complex_rnn_forward(x, fused):
    # x: (B, T, IN) float32  ->  (B, T, OUT)
    B, T, _ = x.shape
    BP = ((B + 7) // 8) * 8                      # pad batch to sublane multiple
    x_t = jnp.transpose(x.astype(jnp.float32), (1, 0, 2))   # (T, B, IN)
    if BP != B:
        x_t = jnp.pad(x_t, ((0, 0), (0, BP - B), (0, 0)))
    x2 = x_t.reshape(T * BP, IN)                 # time-major, row = (t, b)

    (wi0, wh0, bb0), (wi1, wh1, bb1), (wi2, wh2, bb2) = fused["layers"]
    out = pl.pallas_call(
        _make_kernel(T, BP),
        out_shape=jax.ShapeDtypeStruct((T * BP, OUT), jnp.float32),
        scratch_shapes=[pltpu.VMEM((T * BP, 2 * H), jnp.float32),
                        pltpu.VMEM((T * BP, 2 * H), jnp.float32)],
    )(x2,
      wi0, wh0, bb0,
      wi1, wh1, bb1,
      wi2, wh2, bb2,
      fused["fc1_w"], fused["fc1_b"], fused["fc2_w"], fused["fc2_b"])

    out = out.reshape(T, BP, OUT)[:, :B]                     # drop batch padding
    return jnp.transpose(out, (1, 0, 2))                     # (B, T, OUT)


# ----------------------------- Parameter init --------------------------------

def init_params(key):
    def uni(k, shape, fan):
        bound = 1.0 / jnp.sqrt(float(fan))
        return jax.random.uniform(k, shape, jnp.float32, -bound, bound)

    params = {"rnn": {}}
    k = key
    for l in range(NUM_LAYERS):
        din = IN if l == 0 else 2 * H
        for d in range(2):  # 0 = forward, 1 = reverse
            k, k1, k2, k3, k4 = jax.random.split(k, 5)
            params["rnn"][(l, d)] = {
                "w_ih_t": uni(k1, (din, H), H),   # W_ih^T, (Din, H)
                "w_hh_t": uni(k2, (H, H), H),     # W_hh^T, (H, H)
                "b_ih": uni(k3, (H,), H),
                "b_hh": uni(k4, (H,), H),
            }
    k, k1, k2, k3, k4 = jax.random.split(k, 5)
    params["fc1_w_t"] = uni(k1, (2 * H, FC1), 2 * H)
    params["fc1_b"] = uni(k2, (FC1,), 2 * H)
    params["fc2_w_t"] = uni(k3, (FC1, OUT), FC1)
    params["fc2_b"] = uni(k4, (OUT,), FC1)
    return params


# ----------------------------- Pure-JAX reference ----------------------------

def reference_forward(x, params):
    hp = lax.Precision.HIGHEST
    B, T, _ = x.shape
    h = x.astype(jnp.float32)
    for l in range(NUM_LAYERS):
        outs = []
        for d, rev in ((0, False), (1, True)):
            p = params["rnn"][(l, d)]
            xp = (jnp.einsum("btd,dh->bth", h, p["w_ih_t"], precision=hp)
                  + p["b_ih"] + p["b_hh"])
            if rev:
                xp = xp[:, ::-1]

            def step(carry, xt, whh=p["w_hh_t"]):
                hn = jnp.tanh(xt + jnp.dot(carry, whh, precision=hp))
                return hn, hn

            _, hs = lax.scan(step, jnp.zeros((B, H), jnp.float32),
                             jnp.swapaxes(xp, 0, 1))
            hs = jnp.swapaxes(hs, 0, 1)
            if rev:
                hs = hs[:, ::-1]
            outs.append(hs)
        h = jnp.concatenate(outs, axis=-1)
    y = jnp.maximum(
        jnp.einsum("btd,df->btf", h, params["fc1_w_t"], precision=hp)
        + params["fc1_b"], 0.0)
    y = (jnp.einsum("btf,fo->bto", y, params["fc2_w_t"], precision=hp)
         + params["fc2_b"])
    return y


# ----------------------------------- Main ------------------------------------

if __name__ == "__main__":
    key = jax.random.PRNGKey(0)
    kx, kp = jax.random.split(key)
    B, T = 2, 8
    x = jax.random.normal(kx, (B, T, IN), jnp.float32)
    params = init_params(kp)
    fused = fuse_params(params)

    fwd = jax.jit(lambda xx: complex_rnn_forward(xx, fused))
    out = jax.block_until_ready(fwd(x))

    assert out.shape == (B, T, OUT), out.shape
    assert bool(jnp.all(jnp.isfinite(out)))

    ref = reference_forward(x, params)
    max_err = float(jnp.max(jnp.abs(out - ref)))
    assert max_err < 1e-2, f"mismatch vs reference: {max_err}"

    print("KERNEL_OK")
</pallas_src>

<mosaic_0001>
module attributes {stable_mosaic.version = 11 : i64} {
  func.func @kernel(%arg0: memref<64x12xf32, #tpu.memory_space<vmem>>, %arg1: memref<12x256xf32, #tpu.memory_space<vmem>>, %arg2: memref<256x256xf32, #tpu.memory_space<vmem>>, %arg3: memref<1x256xf32, #tpu.memory_space<vmem>>, %arg4: memref<256x256xf32, #tpu.memory_space<vmem>>, %arg5: memref<256x256xf32, #tpu.memory_space<vmem>>, %arg6: memref<1x256xf32, #tpu.memory_space<vmem>>, %arg7: memref<256x256xf32, #tpu.memory_space<vmem>>, %arg8: memref<256x256xf32, #tpu.memory_space<vmem>>, %arg9: memref<1x256xf32, #tpu.memory_space<vmem>>, %arg10: memref<256x64xf32, #tpu.memory_space<vmem>>, %arg11: memref<1x64xf32, #tpu.memory_space<vmem>>, %arg12: memref<64x14xf32, #tpu.memory_space<vmem>>, %arg13: memref<1x14xf32, #tpu.memory_space<vmem>>, %arg14: memref<64x14xf32, #tpu.memory_space<vmem>>, %arg15: memref<64x256xf32, #tpu.memory_space<vmem>>, %arg16: memref<64x256xf32, #tpu.memory_space<vmem>>) attributes {dimension_semantics = [], scalar_prefetch = 0 : i64, scratch_operands = 2 : i64, tpu.core_type = #tpu.core_type<tc>} {
    %c0 = arith.constant 0 : index
    %c0_0 = arith.constant 0 : index
    %0 = vector.load %arg0[%c0, %c0_0] : memref<64x12xf32, #tpu.memory_space<vmem>>, vector<64x12xf32>
    %c0_1 = arith.constant 0 : index
    %c0_2 = arith.constant 0 : index
    %1 = vector.load %arg1[%c0_1, %c0_2] : memref<12x256xf32, #tpu.memory_space<vmem>>, vector<12x256xf32>
    %cst = arith.constant dense<0.000000e+00> : vector<64x256xf32>
    %2 = tpu.matmul %0, %1, %cst {dimension_numbers = #tpu.dot_dimension_numbers<[1], [0], [0], [1], [0, 0, 1, 1], [], []>} : vector<64x12xf32>, vector<12x256xf32>, vector<64x256xf32> -> vector<64x256xf32>
    %c0_3 = arith.constant 0 : index
    %c0_4 = arith.constant 0 : index
    %3 = vector.load %arg3[%c0_3, %c0_4] : memref<1x256xf32, #tpu.memory_space<vmem>>, vector<1x256xf32>
    %4 = vector.broadcast %3 : vector<1x256xf32> to vector<64x256xf32>
    %5 = arith.addf %2, %4 : vector<64x256xf32>
    %c0_5 = arith.constant 0 : index
    %c0_6 = arith.constant 0 : index
    %6 = vector.load %arg15[%c0_5, %c0_6] : memref<64x256xf32, #tpu.memory_space<vmem>>, vector<64x256xf32>
    tpu.vector_store %arg15[%c0_5, %c0_6], %5 {strides = array<i32>} : memref<64x256xf32, #tpu.memory_space<vmem>>, vector<64x256xf32>,
    %c0_7 = arith.constant 0 : index
    %c0_8 = arith.constant 0 : index
    %7 = vector.load %arg2[%c0_7, %c0_8] : memref<256x256xf32, #tpu.memory_space<vmem>>, vector<256x256xf32>
    %c0_9 = arith.constant 0 : index
    %c0_10 = arith.constant 0 : index
    %8 = vector.load %arg15[%c0_9, %c0_10] : memref<64x256xf32, #tpu.memory_space<vmem>>, vector<8x128xf32>
    %c56 = arith.constant 56 : index
    %c128 = arith.constant 128 : index
    %9 = vector.load %arg15[%c56, %c128] : memref<64x256xf32, #tpu.memory_space<vmem>>, vector<8x128xf32>
    %10 = tpu.concatenate %8, %9 in 1 : vector<8x128xf32>, vector<8x128xf32> -> vector<8x256xf32>
    %11 = math.tanh %10 : vector<8x256xf32>
    %12 = vector.extract_strided_slice %11 {offsets = [0, 0], sizes = [8, 128], strides = [1, 1]} : vector<8x256xf32> to vector<8x128xf32>
    %c0_11 = arith.constant 0 : index
    %c0_12 = arith.constant 0 : index
    %13 = vector.load %arg15[%c0_11, %c0_12] : memref<64x256xf32, #tpu.memory_space<vmem>>, vector<8x128xf32>
    tpu.vector_store %arg15[%c0_11, %c0_12], %12 {strides = array<i32>} : memref<64x256xf32, #tpu.memory_space<vmem>>, vector<8x128xf32>,
    %14 = vector.extract_strided_slice %11 {offsets = [0, 128], sizes = [8, 128], strides = [1, 1]} : vector<8x256xf32> to vector<8x128xf32>
    %c56_13 = arith.constant 56 : index
    %c128_14 = arith.constant 128 : index
    %15 = vector.load %arg15[%c56_13, %c128_14] : memref<64x256xf32, #tpu.memory_space<vmem>>, vector<8x128xf32>
    tpu.vector_store %arg15[%c56_13, %c128_14], %14 {strides = array<i32>} : memref<64x256xf32, #tpu.memory_space<vmem>>, vector<8x128xf32>,
    %c8 = arith.constant 8 : index
    %c0_15 = arith.constant 0 : index
    %16 = vector.load %arg15[%c8, %c0_15] : memref<64x256xf32, #tpu.memory_space<vmem>>, vector<8x128xf32>
    %c48 = arith.constant 48 : index
    %c128_16 = arith.constant 128 : index
    %17 = vector.load %arg15[%c48, %c128_16] : memref<64x256xf32, #tpu.memory_space<vmem>>, vector<8x128xf32>
    %18 = tpu.concatenate %16, %17 in 1 : vector<8x128xf32>, vector<8x128xf32> -> vector<8x256xf32>
    %cst_17 = arith.constant dense<0.000000e+00> : vector<8x256xf32>
    %19 = tpu.matmul %11, %7, %cst_17 {dimension_numbers = #tpu.dot_dimension_numbers<[1], [0], [0], [1], [0, 0, 1, 1], [], []>} : vector<8x256xf32>, vector<256x256xf32>, vector<8x256xf32> -> vector<8x256xf32>
    %20 = arith.addf %18, %19 : vector<8x256xf32>
    %21 = math.tanh %20 : vector<8x256xf32>
    %22 = vector.extract_strided_slice %21 {offsets = [0, 0], sizes = [8, 128], strides = [1, 1]} : vector<8x256xf32> to vector<8x128xf32>
    %c8_18 = arith.constant 8 : index
    %c0_19 = arith.constant 0 : index
    %23 = vector.load %arg15[%c8_18, %c0_19] : memref<64x256xf32, #tpu.memory_space<vmem>>, vector<8x128xf32>
    tpu.vector_store %arg15[%c8_18, %c0_19], %22 {strides = array<i32>} : memref<64x256xf32, #tpu.memory_space<vmem>>, vector<8x128xf32>,
    %24 = vector.extract_strided_slice %21 {offsets = [0, 128], sizes = [8, 128], strides = [1, 1]} : vector<8x256xf32> to vector<8x128xf32>
    %c48_20 = arith.constant 48 : index
    %c128_21 = arith.constant 128 : index
    %25 = vector.load %arg15[%c48_20, %c128_21] : memref<64x256xf32, #tpu.memory_space<vmem>>, vector<8x128xf32>
    tpu.vector_store %arg15[%c48_20, %c128_21], %24 {strides = array<i32>} : memref<64x256xf32, #tpu.memory_space<vmem>>, vector<8x128xf32>,
    %c16 = arith.constant 16 : index
    %c0_22 = arith.constant 0 : index
    %26 = vector.load %arg15[%c16, %c0_22] : memref<64x256xf32, #tpu.memory_space<vmem>>, vector<8x128xf32>
    %c40 = arith.constant 40 : index
    %c128_23 = arith.constant 128 : index
    %27 = vector.load %arg15[%c40, %c128_23] : memref<64x256xf32, #tpu.memory_space<vmem>>, vector<8x128xf32>
    %28 = tpu.concatenate %26, %27 in 1 : vector<8x128xf32>, vector<8x128xf32> -> vector<8x256xf32>
    %cst_24 = arith.constant dense<0.000000e+00> : vector<8x256xf32>
    %29 = tpu.matmul %21, %7, %cst_24 {dimension_numbers = #tpu.dot_dimension_numbers<[1], [0], [0], [1], [0, 0, 1, 1], [], []>} : vector<8x256xf32>, vector<256x256xf32>, vector<8x256xf32> -> vector<8x256xf32>
    %30 = arith.addf %28, %29 : vector<8x256xf32>
    %31 = math.tanh %30 : vector<8x256xf32>
    %32 = vector.extract_strided_slice %31 {offsets = [0, 0], sizes = [8, 128], strides = [1, 1]} : vector<8x256xf32> to vector<8x128xf32>
    %c16_25 = arith.constant 16 : index
    %c0_26 = arith.constant 0 : index
    %33 = vector.load %arg15[%c16_25, %c0_26] : memref<64x256xf32, #tpu.memory_space<vmem>>, vector<8x128xf32>
    tpu.vector_store %arg15[%c16_25, %c0_26], %32 {strides = array<i32>} : memref<64x256xf32, #tpu.memory_space<vmem>>, vector<8x128xf32>,
    %34 = vector.extract_strided_slice %31 {offsets = [0, 128], sizes = [8, 128], strides = [1, 1]} : vector<8x256xf32> to vector<8x128xf32>
    %c40_27 = arith.constant 40 : index
    %c128_28 = arith.constant 128 : index
    %35 = vector.load %arg15[%c40_27, %c128_28] : memref<64x256xf32, #tpu.memory_space<vmem>>, vector<8x128xf32>
    tpu.vector_store %arg15[%c40_27, %c128_28], %34 {strides = array<i32>} : memref<64x256xf32, #tpu.memory_space<vmem>>, vector<8x128xf32>,
    %c24 = arith.constant 24 : index
    %c0_29 = arith.constant 0 : index
    %36 = vector.load %arg15[%c24, %c0_29] : memref<64x256xf32, #tpu.memory_space<vmem>>, vector<8x128xf32>
    %c32 = arith.constant 32 : index
    %c128_30 = arith.constant 128 : index
    %37 = vector.load %arg15[%c32, %c128_30] : memref<64x256xf32, #tpu.memory_space<vmem>>, vector<8x128xf32>
    %38 = tpu.concatenate %36, %37 in 1 : vector<8x128xf32>, vector<8x128xf32> -> vector<8x256xf32>
    %cst_31 = arith.constant dense<0.000000e+00> : vector<8x256xf32>
    %39 = tpu.matmul %31, %7, %cst_31 {dimension_numbers = #tpu.dot_dimension_numbers<[1], [0], [0], [1], [0, 0, 1, 1], [], []>} : vector<8x256xf32>, vector<256x256xf32>, vector<8x256xf32> -> vector<8x256xf32>
    %40 = arith.addf %38, %39 : vector<8x256xf32>
    %41 = math.tanh %40 : vector<8x256xf32>
    %42 = vector.extract_strided_slice %41 {offsets = [0, 0], sizes = [8, 128], strides = [1, 1]} : vector<8x256xf32> to vector<8x128xf32>
    %c24_32 = arith.constant 24 : index
    %c0_33 = arith.constant 0 : index
    %43 = vector.load %arg15[%c24_32, %c0_33] : memref<64x256xf32, #tpu.memory_space<vmem>>, vector<8x128xf32>
    tpu.vector_store %arg15[%c24_32, %c0_33], %42 {strides = array<i32>} : memref<64x256xf32, #tpu.memory_space<vmem>>, vector<8x128xf32>,
    %44 = vector.extract_strided_slice %41 {offsets = [0, 128], sizes = [8, 128], strides = [1, 1]} : vector<8x256xf32> to vector<8x128xf32>
    %c32_34 = arith.constant 32 : index
    %c128_35 = arith.constant 128 : index
    %45 = vector.load %arg15[%c32_34, %c128_35] : memref<64x256xf32, #tpu.memory_space<vmem>>, vector<8x128xf32>
    tpu.vector_store %arg15[%c32_34, %c128_35], %44 {strides = array<i32>} : memref<64x256xf32, #tpu.memory_space<vmem>>, vector<8x128xf32>,
    %c32_36 = arith.constant 32 : index
    %c0_37 = arith.constant 0 : index
    %46 = vector.load %arg15[%c32_36, %c0_37] : memref<64x256xf32, #tpu.memory_space<vmem>>, vector<8x128xf32>
    %c24_38 = arith.constant 24 : index
    %c128_39 = arith.constant 128 : index
    %47 = vector.load %arg15[%c24_38, %c128_39] : memref<64x256xf32, #tpu.memory_space<vmem>>, vector<8x128xf32>
    %48 = tpu.concatenate %46, %47 in 1 : vector<8x128xf32>, vector<8x128xf32> -> vector<8x256xf32>
    %cst_40 = arith.constant dense<0.000000e+00> : vector<8x256xf32>
    %49 = tpu.matmul %41, %7, %cst_40 {dimension_numbers = #tpu.dot_dimension_numbers<[1], [0], [0], [1], [0, 0, 1, 1], [], []>} : vector<8x256xf32>, vector<256x256xf32>, vector<8x256xf32> -> vector<8x256xf32>
    %50 = arith.addf %48, %49 : vector<8x256xf32>
    %51 = math.tanh %50 : vector<8x256xf32>
    %52 = vector.extract_strided_slice %51 {offsets = [0, 0], sizes = [8, 128], strides = [1, 1]} : vector<8x256xf32> to vector<8x128xf32>
    %c32_41 = arith.constant 32 : index
    %c0_42 = arith.constant 0 : index
    %53 = vector.load %arg15[%c32_41, %c0_42] : memref<64x256xf32, #tpu.memory_space<vmem>>, vector<8x128xf32>
    tpu.vector_store %arg15[%c32_41, %c0_42], %52 {strides = array<i32>} : memref<64x256xf32, #tpu.memory_space<vmem>>, vector<8x128xf32>,
    %54 = vector.extract_strided_slice %51 {offsets = [0, 128], sizes = [8, 128], strides = [1, 1]} : vector<8x256xf32> to vector<8x128xf32>
    %c24_43 = arith.constant 24 : index
    %c128_44 = arith.constant 128 : index
    %55 = vector.load %arg15[%c24_43, %c128_44] : memref<64x256xf32, #tpu.memory_space<vmem>>, vector<8x128xf32>
    tpu.vector_store %arg15[%c24_43, %c128_44], %54 {strides = array<i32>} : memref<64x256xf32, #tpu.memory_space<vmem>>, vector<8x128xf32>,
    %c40_45 = arith.constant 40 : index
    %c0_46 = arith.constant 0 : index
    %56 = vector.load %arg15[%c40_45, %c0_46] : memref<64x256xf32, #tpu.memory_space<vmem>>, vector<8x128xf32>
    %c16_47 = arith.constant 16 : index
    %c128_48 = arith.constant 128 : index
    %57 = vector.load %arg15[%c16_47, %c128_48] : memref<64x256xf32, #tpu.memory_space<vmem>>, vector<8x128xf32>
    %58 = tpu.concatenate %56, %57 in 1 : vector<8x128xf32>, vector<8x128xf32> -> vector<8x256xf32>
    %cst_49 = arith.constant dense<0.000000e+00> : vector<8x256xf32>
    %59 = tpu.matmul %51, %7, %cst_49 {dimension_numbers = #tpu.dot_dimension_numbers<[1], [0], [0], [1], [0, 0, 1, 1], [], []>} : vector<8x256xf32>, vector<256x256xf32>, vector<8x256xf32> -> vector<8x256xf32>
    %60 = arith.addf %58, %59 : vector<8x256xf32>
    %61 = math.tanh %60 : vector<8x256xf32>
    %62 = vector.extract_strided_slice %61 {offsets = [0, 0], sizes = [8, 128], strides = [1, 1]} : vector<8x256xf32> to vector<8x128xf32>
    %c40_50 = arith.constant 40 : index
    %c0_51 = arith.constant 0 : index
    %63 = vector.load %arg15[%c40_50, %c0_51] : memref<64x256xf32, #tpu.memory_space<vmem>>, vector<8x128xf32>
    tpu.vector_store %arg15[%c40_50, %c0_51], %62 {strides = array<i32>} : memref<64x256xf32, #tpu.memory_space<vmem>>, vector<8x128xf32>,
    %64 = vector.extract_strided_slice %61 {offsets = [0, 128], sizes = [8, 128], strides = [1, 1]} : vector<8x256xf32> to vector<8x128xf32>
    %c16_52 = arith.constant 16 : index
    %c128_53 = arith.constant 128 : index
    %65 = vector.load %arg15[%c16_52, %c128_53] : memref<64x256xf32, #tpu.memory_space<vmem>>, vector<8x128xf32>
    tpu.vector_store %arg15[%c16_52, %c128_53], %64 {strides = array<i32>} : memref<64x256xf32, #tpu.memory_space<vmem>>, vector<8x128xf32>,
    %c48_54 = arith.constant 48 : index
    %c0_55 = arith.constant 0 : index
    %66 = vector.load %arg15[%c48_54, %c0_55] : memref<64x256xf32, #tpu.memory_space<vmem>>, vector<8x128xf32>
    %c8_56 = arith.constant 8 : index
    %c128_57 = arith.constant 128 : index
    %67 = vector.load %arg15[%c8_56, %c128_57] : memref<64x256xf32, #tpu.memory_space<vmem>>, vector<8x128xf32>
    %68 = tpu.concatenate %66, %67 in 1 : vector<8x128xf32>, vector<8x128xf32> -> vector<8x256xf32>
    %cst_58 = arith.constant dense<0.000000e+00> : vector<8x256xf32>
    %69 = tpu.matmul %61, %7, %cst_58 {dimension_numbers = #tpu.dot_dimension_numbers<[1], [0], [0], [1], [0, 0, 1, 1], [], []>} : vector<8x256xf32>, vector<256x256xf32>, vector<8x256xf32> -> vector<8x256xf32>
    %70 = arith.addf %68, %69 : vector<8x256xf32>
    %71 = math.tanh %70 : vector<8x256xf32>
    %72 = vector.extract_strided_slice %71 {offsets = [0, 0], sizes = [8, 128], strides = [1, 1]} : vector<8x256xf32> to vector<8x128xf32>
    %c48_59 = arith.constant 48 : index
    %c0_60 = arith.constant 0 : index
    %73 = vector.load %arg15[%c48_59, %c0_60] : memref<64x256xf32, #tpu.memory_space<vmem>>, vector<8x128xf32>
    tpu.vector_store %arg15[%c48_59, %c0_60], %72 {strides = array<i32>} : memref<64x256xf32, #tpu.memory_space<vmem>>, vector<8x128xf32>,
    %74 = vector.extract_strided_slice %71 {offsets = [0, 128], sizes = [8, 128], strides = [1, 1]} : vector<8x256xf32> to vector<8x128xf32>
    %c8_61 = arith.constant 8 : index
    %c128_62 = arith.constant 128 : index
    %75 = vector.load %arg15[%c8_61, %c128_62] : memref<64x256xf32, #tpu.memory_space<vmem>>, vector<8x128xf32>
    tpu.vector_store %arg15[%c8_61, %c128_62], %74 {strides = array<i32>} : memref<64x256xf32, #tpu.memory_space<vmem>>, vector<8x128xf32>,
    %c56_63 = arith.constant 56 : index
    %c0_64 = arith.constant 0 : index
    %76 = vector.load %arg15[%c56_63, %c0_64] : memref<64x256xf32, #tpu.memory_space<vmem>>, vector<8x128xf32>
    %c0_65 = arith.constant 0 : index
    %c128_66 = arith.constant 128 : index
    %77 = vector.load %arg15[%c0_65, %c128_66] : memref<64x256xf32, #tpu.memory_space<vmem>>, vector<8x128xf32>
    %78 = tpu.concatenate %76, %77 in 1 : vector<8x128xf32>, vector<8x128xf32> -> vector<8x256xf32>
    %cst_67 = arith.constant dense<0.000000e+00> : vector<8x256xf32>
    %79 = tpu.matmul %71, %7, %cst_67 {dimension_numbers = #tpu.dot_dimension_numbers<[1], [0], [0], [1], [0, 0, 1, 1], [], []>} : vector<8x256xf32>, vector<256x256xf32>, vector<8x256xf32> -> vector<8x256xf32>
    %80 = arith.addf %78, %79 : vector<8x256xf32>
    %81 = math.tanh %80 : vector<8x256xf32>
    %82 = vector.extract_strided_slice %81 {offsets = [0, 0], sizes = [8, 128], strides = [1, 1]} : vector<8x256xf32> to vector<8x128xf32>
    %c56_68 = arith.constant 56 : index
    %c0_69 = arith.constant 0 : index
    %83 = vector.load %arg15[%c56_68, %c0_69] : memref<64x256xf32, #tpu.memory_space<vmem>>, vector<8x128xf32>
    tpu.vector_store %arg15[%c56_68, %c0_69], %82 {strides = array<i32>} : memref<64x256xf32, #tpu.memory_space<vmem>>, vector<8x128xf32>,
    %84 = vector.extract_strided_slice %81 {offsets = [0, 128], sizes = [8, 128], strides = [1, 1]} : vector<8x256xf32> to vector<8x128xf32>
    %c0_70 = arith.constant 0 : index
    %c128_71 = arith.constant 128 : index
    %85 = vector.load %arg15[%c0_70, %c128_71] : memref<64x256xf32, #tpu.memory_space<vmem>>, vector<8x128xf32>
    tpu.vector_store %arg15[%c0_70, %c128_71], %84 {strides = array<i32>} : memref<64x256xf32, #tpu.memory_space<vmem>>, vector<8x128xf32>,
    %c0_72 = arith.constant 0 : index
    %c0_73 = arith.constant 0 : index
    %86 = vector.load %arg15[%c0_72, %c0_73] : memref<64x256xf32, #tpu.memory_space<vmem>>, vector<64x256xf32>
    %c0_74 = arith.constant 0 : index
    %c0_75 = arith.constant 0 : index
    %87 = vector.load %arg4[%c0_74, %c0_75] : memref<256x256xf32, #tpu.memory_space<vmem>>, vector<256x256xf32>
    %cst_76 = arith.constant dense<0.000000e+00> : vector<64x256xf32>
    %88 = tpu.matmul %86, %87, %cst_76 {dimension_numbers = #tpu.dot_dimension_numbers<[1], [0], [0], [1], [0, 0, 1, 1], [], []>} : vector<64x256xf32>, vector<256x256xf32>, vector<64x256xf32> -> vector<64x256xf32>
    %c0_77 = arith.constant 0 : index
    %c0_78 = arith.constant 0 : index
    %89 = vector.load %arg6[%c0_77, %c0_78] : memref<1x256xf32, #tpu.memory_space<vmem>>, vector<1x256xf32>
    %90 = vector.broadcast %89 : vector<1x256xf32> to vector<64x256xf32>
    %91 = arith.addf %88, %90 : vector<64x256xf32>
    %c0_79 = arith.constant 0 : index
    %c0_80 = arith.constant 0 : index
    %92 = vector.load %arg16[%c0_79, %c0_80] : memref<64x256xf32, #tpu.memory_space<vmem>>, vector<64x256xf32>
    tpu.vector_store %arg16[%c0_79, %c0_80], %91 {strides = array<i32>} : memref<64x256xf32, #tpu.memory_space<vmem>>, vector<64x256xf32>,
    %c0_81 = arith.constant 0 : index
    %c0_82 = arith.constant 0 : index
    %93 = vector.load %arg5[%c0_81, %c0_82] : memref<256x256xf32, #tpu.memory_space<vmem>>, vector<256x256xf32>
    %c0_83 = arith.constant 0 : index
    %c0_84 = arith.constant 0 : index
    %94 = vector.load %arg16[%c0_83, %c0_84] : memref<64x256xf32, #tpu.memory_space<vmem>>, vector<8x128xf32>
    %c56_85 = arith.constant 56 : index
    %c128_86 = arith.constant 128 : index
    %95 = vector.load %arg16[%c56_85, %c128_86] : memref<64x256xf32, #tpu.memory_space<vmem>>, vector<8x128xf32>
    %96 = tpu.concatenate %94, %95 in 1 : vector<8x128xf32>, vector<8x128xf32> -> vector<8x256xf32>
    %97 = math.tanh %96 : vector<8x256xf32>
    %98 = vector.extract_strided_slice %97 {offsets = [0, 0], sizes = [8, 128], strides = [1, 1]} : vector<8x256xf32> to vector<8x128xf32>
    %c0_87 = arith.constant 0 : index
    %c0_88 = arith.constant 0 : index
    %99 = vector.load %arg16[%c0_87, %c0_88] : memref<64x256xf32, #tpu.memory_space<vmem>>, vector<8x128xf32>
    tpu.vector_store %arg16[%c0_87, %c0_88], %98 {strides = array<i32>} : memref<64x256xf32, #tpu.memory_space<vmem>>, vector<8x128xf32>,
    %100 = vector.extract_strided_slice %97 {offsets = [0, 128], sizes = [8, 128], strides = [1, 1]} : vector<8x256xf32> to vector<8x128xf32>
    %c56_89 = arith.constant 56 : index
    %c128_90 = arith.constant 128 : index
    %101 = vector.load %arg16[%c56_89, %c128_90] : memref<64x256xf32, #tpu.memory_space<vmem>>, vector<8x128xf32>
    tpu.vector_store %arg16[%c56_89, %c128_90], %100 {strides = array<i32>} : memref<64x256xf32, #tpu.memory_space<vmem>>, vector<8x128xf32>,
    %c8_91 = arith.constant 8 : index
    %c0_92 = arith.constant 0 : index
    %102 = vector.load %arg16[%c8_91, %c0_92] : memref<64x256xf32, #tpu.memory_space<vmem>>, vector<8x128xf32>
    %c48_93 = arith.constant 48 : index
    %c128_94 = arith.constant 128 : index
    %103 = vector.load %arg16[%c48_93, %c128_94] : memref<64x256xf32, #tpu.memory_space<vmem>>, vector<8x128xf32>
    %104 = tpu.concatenate %102, %103 in 1 : vector<8x128xf32>, vector<8x128xf32> -> vector<8x256xf32>
    %cst_95 = arith.constant dense<0.000000e+00> : vector<8x256xf32>
    %105 = tpu.matmul %97, %93, %cst_95 {dimension_numbers = #tpu.dot_dimension_numbers<[1], [0], [0], [1], [0, 0, 1, 1], [], []>} : vector<8x256xf32>, vector<256x256xf32>, vector<8x256xf32> -> vector<8x256xf32>
    %106 = arith.addf %104, %105 : vector<8x256xf32>
    %107 = math.tanh %106 : vector<8x256xf32>
    %108 = vector.extract_strided_slice %107 {offsets = [0, 0], sizes = [8, 128], strides = [1, 1]} : vector<8x256xf32> to vector<8x128xf32>
    %c8_96 = arith.constant 8 : index
    %c0_97 = arith.constant 0 : index
    %109 = vector.load %arg16[%c8_96, %c0_97] : memref<64x256xf32, #tpu.memory_space<vmem>>, vector<8x128xf32>
    tpu.vector_store %arg16[%c8_96, %c0_97], %108 {strides = array<i32>} : memref<64x256xf32, #tpu.memory_space<vmem>>, vector<8x128xf32>,
    %110 = vector.extract_strided_slice %107 {offsets = [0, 128], sizes = [8, 128], strides = [1, 1]} : vector<8x256xf32> to vector<8x128xf32>
    %c48_98 = arith.constant 48 : index
    %c128_99 = arith.constant 128 : index
    %111 = vector.load %arg16[%c48_98, %c128_99] : memref<64x256xf32, #tpu.memory_space<vmem>>, vector<8x128xf32>
    tpu.vector_store %arg16[%c48_98, %c128_99], %110 {strides = array<i32>} : memref<64x256xf32, #tpu.memory_space<vmem>>, vector<8x128xf32>,
    %c16_100 = arith.constant 16 : index
    %c0_101 = arith.constant 0 : index
    %112 = vector.load %arg16[%c16_100, %c0_101] : memref<64x256xf32, #tpu.memory_space<vmem>>, vector<8x128xf32>
    %c40_102 = arith.constant 40 : index
    %c128_103 = arith.constant 128 : index
    %113 = vector.load %arg16[%c40_102, %c128_103] : memref<64x256xf32, #tpu.memory_space<vmem>>, vector<8x128xf32>
    %114 = tpu.concatenate %112, %113 in 1 : vector<8x128xf32>, vector<8x128xf32> -> vector<8x256xf32>
    %cst_104 = arith.constant dense<0.000000e+00> : vector<8x256xf32>
    %115 = tpu.matmul %107, %93, %cst_104 {dimension_numbers = #tpu.dot_dimension_numbers<[1], [0], [0], [1], [0, 0, 1, 1], [], []>} : vector<8x256xf32>, vector<256x256xf32>, vector<8x256xf32> -> vector<8x256xf32>
    %116 = arith.addf %114, %115 : vector<8x256xf32>
    %117 = math.tanh %116 : vector<8x256xf32>
    %118 = vector.extract_strided_slice %117 {offsets = [0, 0], sizes = [8, 128], strides = [1, 1]} : vector<8x256xf32> to vector<8x128xf32>
    %c16_105 = arith.constant 16 : index
    %c0_106 = arith.constant 0 : index
    %119 = vector.load %arg16[%c16_105, %c0_106] : memref<64x256xf32, #tpu.memory_space<vmem>>, vector<8x128xf32>
    tpu.vector_store %arg16[%c16_105, %c0_106], %118 {strides = array<i32>} : memref<64x256xf32, #tpu.memory_space<vmem>>, vector<8x128xf32>,
    %120 = vector.extract_strided_slice %117 {offsets = [0, 128], sizes = [8, 128], strides = [1, 1]} : vector<8x256xf32> to vector<8x128xf32>
    %c40_107 = arith.constant 40 : index
    %c128_108 = arith.constant 128 : index
    %121 = vector.load %arg16[%c40_107, %c128_108] : memref<64x256xf32, #tpu.memory_space<vmem>>, vector<8x128xf32>
    tpu.vector_store %arg16[%c40_107, %c128_108], %120 {strides = array<i32>} : memref<64x256xf32, #tpu.memory_space<vmem>>, vector<8x128xf32>,
    %c24_109 = arith.constant 24 : index
    %c0_110 = arith.constant 0 : index
    %122 = vector.load %arg16[%c24_109, %c0_110] : memref<64x256xf32, #tpu.memory_space<vmem>>, vector<8x128xf32>
    %c32_111 = arith.constant 32 : index
    %c128_112 = arith.constant 128 : index
    %123 = vector.load %arg16[%c32_111, %c128_112] : memref<64x256xf32, #tpu.memory_space<vmem>>, vector<8x128xf32>
    %124 = tpu.concatenate %122, %123 in 1 : vector<8x128xf32>, vector<8x128xf32> -> vector<8x256xf32>
    %cst_113 = arith.constant dense<0.000000e+00> : vector<8x256xf32>
    %125 = tpu.matmul %117, %93, %cst_113 {dimension_numbers = #tpu.dot_dimension_numbers<[1], [0], [0], [1], [0, 0, 1, 1], [], []>} : vector<8x256xf32>, vector<256x256xf32>, vector<8x256xf32> -> vector<8x256xf32>
    %126 = arith.addf %124, %125 : vector<8x256xf32>
    %127 = math.tanh %126 : vector<8x256xf32>
    %128 = vector.extract_strided_slice %127 {offsets = [0, 0], sizes = [8, 128], strides = [1, 1]} : vector<8x256xf32> to vector<8x128xf32>
    %c24_114 = arith.constant 24 : index
    %c0_115 = arith.constant 0 : index
    %129 = vector.load %arg16[%c24_114, %c0_115] : memref<64x256xf32, #tpu.memory_space<vmem>>, vector<8x128xf32>
    tpu.vector_store %arg16[%c24_114, %c0_115], %128 {strides = array<i32>} : memref<64x256xf32, #tpu.memory_space<vmem>>, vector<8x128xf32>,
    %130 = vector.extract_strided_slice %127 {offsets = [0, 128], sizes = [8, 128], strides = [1, 1]} : vector<8x256xf32> to vector<8x128xf32>
    %c32_116 = arith.constant 32 : index
    %c128_117 = arith.constant 128 : index
    %131 = vector.load %arg16[%c32_116, %c128_117] : memref<64x256xf32, #tpu.memory_space<vmem>>, vector<8x128xf32>
    tpu.vector_store %arg16[%c32_116, %c128_117], %130 {strides = array<i32>} : memref<64x256xf32, #tpu.memory_space<vmem>>, vector<8x128xf32>,
    %c32_118 = arith.constant 32 : index
    %c0_119 = arith.constant 0 : index
    %132 = vector.load %arg16[%c32_118, %c0_119] : memref<64x256xf32, #tpu.memory_space<vmem>>, vector<8x128xf32>
    %c24_120 = arith.constant 24 : index
    %c128_121 = arith.constant 128 : index
    %133 = vector.load %arg16[%c24_120, %c128_121] : memref<64x256xf32, #tpu.memory_space<vmem>>, vector<8x128xf32>
    %134 = tpu.concatenate %132, %133 in 1 : vector<8x128xf32>, vector<8x128xf32> -> vector<8x256xf32>
    %cst_122 = arith.constant dense<0.000000e+00> : vector<8x256xf32>
    %135 = tpu.matmul %127, %93, %cst_122 {dimension_numbers = #tpu.dot_dimension_numbers<[1], [0], [0], [1], [0, 0, 1, 1], [], []>} : vector<8x256xf32>, vector<256x256xf32>, vector<8x256xf32> -> vector<8x256xf32>
    %136 = arith.addf %134, %135 : vector<8x256xf32>
    %137 = math.tanh %136 : vector<8x256xf32>
    %138 = vector.extract_strided_slice %137 {offsets = [0, 0], sizes = [8, 128], strides = [1, 1]} : vector<8x256xf32> to vector<8x128xf32>
    %c32_123 = arith.constant 32 : index
    %c0_124 = arith.constant 0 : index
    %139 = vector.load %arg16[%c32_123, %c0_124] : memref<64x256xf32, #tpu.memory_space<vmem>>, vector<8x128xf32>
    tpu.vector_store %arg16[%c32_123, %c0_124], %138 {strides = array<i32>} : memref<64x256xf32, #tpu.memory_space<vmem>>, vector<8x128xf32>,
    %140 = vector.extract_strided_slice %137 {offsets = [0, 128], sizes = [8, 128], strides = [1, 1]} : vector<8x256xf32> to vector<8x128xf32>
    %c24_125 = arith.constant 24 : index
    %c128_126 = arith.constant 128 : index
    %141 = vector.load %arg16[%c24_125, %c128_126] : memref<64x256xf32, #tpu.memory_space<vmem>>, vector<8x128xf32>
    tpu.vector_store %arg16[%c24_125, %c128_126], %140 {strides = array<i32>} : memref<64x256xf32, #tpu.memory_space<vmem>>, vector<8x128xf32>,
    %c40_127 = arith.constant 40 : index
    %c0_128 = arith.constant 0 : index
    %142 = vector.load %arg16[%c40_127, %c0_128] : memref<64x256xf32, #tpu.memory_space<vmem>>, vector<8x128xf32>
    %c16_129 = arith.constant 16 : index
    %c128_130 = arith.constant 128 : index
    %143 = vector.load %arg16[%c16_129, %c128_130] : memref<64x256xf32, #tpu.memory_space<vmem>>, vector<8x128xf32>
    %144 = tpu.concatenate %142, %143 in 1 : vector<8x128xf32>, vector<8x128xf32> -> vector<8x256xf32>
    %cst_131 = arith.constant dense<0.000000e+00> : vector<8x256xf32>
    %145 = tpu.matmul %137, %93, %cst_131 {dimension_numbers = #tpu.dot_dimension_numbers<[1], [0], [0], [1], [0, 0, 1, 1], [], []>} : vector<8x256xf32>, vector<256x256xf32>, vector<8x256xf32> -> vector<8x256xf32>
    %146 = arith.addf %144, %145 : vector<8x256xf32>
    %147 = math.tanh %146 : vector<8x256xf32>
    %148 = vector.extract_strided_slice %147 {offsets = [0, 0], sizes = [8, 128], strides = [1, 1]} : vector<8x256xf32> to vector<8x128xf32>
    %c40_132 = arith.constant 40 : index
    %c0_133 = arith.constant 0 : index
    %149 = vector.load %arg16[%c40_132, %c0_133] : memref<64x256xf32, #tpu.memory_space<vmem>>, vector<8x128xf32>
    tpu.vector_store %arg16[%c40_132, %c0_133], %148 {strides = array<i32>} : memref<64x256xf32, #tpu.memory_space<vmem>>, vector<8x128xf32>,
    %150 = vector.extract_strided_slice %147 {offsets = [0, 128], sizes = [8, 128], strides = [1, 1]} : vector<8x256xf32> to vector<8x128xf32>
    %c16_134 = arith.constant 16 : index
    %c128_135 = arith.constant 128 : index
    %151 = vector.load %arg16[%c16_134, %c128_135] : memref<64x256xf32, #tpu.memory_space<vmem>>, vector<8x128xf32>
    tpu.vector_store %arg16[%c16_134, %c128_135], %150 {strides = array<i32>} : memref<64x256xf32, #tpu.memory_space<vmem>>, vector<8x128xf32>,
    %c48_136 = arith.constant 48 : index
    %c0_137 = arith.constant 0 : index
    %152 = vector.load %arg16[%c48_136, %c0_137] : memref<64x256xf32, #tpu.memory_space<vmem>>, vector<8x128xf32>
    %c8_138 = arith.constant 8 : index
    %c128_139 = arith.constant 128 : index
    %153 = vector.load %arg16[%c8_138, %c128_139] : memref<64x256xf32, #tpu.memory_space<vmem>>, vector<8x128xf32>
    %154 = tpu.concatenate %152, %153 in 1 : vector<8x128xf32>, vector<8x128xf32> -> vector<8x256xf32>
    %cst_140 = arith.constant dense<0.000000e+00> : vector<8x256xf32>
    %155 = tpu.matmul %147, %93, %cst_140 {dimension_numbers = #tpu.dot_dimension_numbers<[1], [0], [0], [1], [0, 0, 1, 1], [], []>} : vector<8x256xf32>, vector<256x256xf32>, vector<8x256xf32> -> vector<8x256xf32>
    %156 = arith.addf %154, %155 : vector<8x256xf32>
    %157 = math.tanh %156 : vector<8x256xf32>
    %158 = vector.extract_strided_slice %157 {offsets = [0, 0], sizes = [8, 128], strides = [1, 1]} : vector<8x256xf32> to vector<8x128xf32>
    %c48_141 = arith.constant 48 : index
    %c0_142 = arith.constant 0 : index
    %159 = vector.load %arg16[%c48_141, %c0_142] : memref<64x256xf32, #tpu.memory_space<vmem>>, vector<8x128xf32>
    tpu.vector_store %arg16[%c48_141, %c0_142], %158 {strides = array<i32>} : memref<64x256xf32, #tpu.memory_space<vmem>>, vector<8x128xf32>,
    %160 = vector.extract_strided_slice %157 {offsets = [0, 128], sizes = [8, 128], strides = [1, 1]} : vector<8x256xf32> to vector<8x128xf32>
    %c8_143 = arith.constant 8 : index
    %c128_144 = arith.constant 128 : index
    %161 = vector.load %arg16[%c8_143, %c128_144] : memref<64x256xf32, #tpu.memory_space<vmem>>, vector<8x128xf32>
    tpu.vector_store %arg16[%c8_143, %c128_144], %160 {strides = array<i32>} : memref<64x256xf32, #tpu.memory_space<vmem>>, vector<8x128xf32>,
    %c56_145 = arith.constant 56 : index
    %c0_146 = arith.constant 0 : index
    %162 = vector.load %arg16[%c56_145, %c0_146] : memref<64x256xf32, #tpu.memory_space<vmem>>, vector<8x128xf32>
    %c0_147 = arith.constant 0 : index
    %c128_148 = arith.constant 128 : index
    %163 = vector.load %arg16[%c0_147, %c128_148] : memref<64x256xf32, #tpu.memory_space<vmem>>, vector<8x128xf32>
    %164 = tpu.concatenate %162, %163 in 1 : vector<8x128xf32>, vector<8x128xf32> -> vector<8x256xf32>
    %cst_149 = arith.constant dense<0.000000e+00> : vector<8x256xf32>
    %165 = tpu.matmul %157, %93, %cst_149 {dimension_numbers = #tpu.dot_dimension_numbers<[1], [0], [0], [1], [0, 0, 1, 1], [], []>} : vector<8x256xf32>, vector<256x256xf32>, vector<8x256xf32> -> vector<8x256xf32>
    %166 = arith.addf %164, %165 : vector<8x256xf32>
    %167 = math.tanh %166 : vector<8x256xf32>
    %168 = vector.extract_strided_slice %167 {offsets = [0, 0], sizes = [8, 128], strides = [1, 1]} : vector<8x256xf32> to vector<8x128xf32>
    %c56_150 = arith.constant 56 : index
    %c0_151 = arith.constant 0 : index
    %169 = vector.load %arg16[%c56_150, %c0_151] : memref<64x256xf32, #tpu.memory_space<vmem>>, vector<8x128xf32>
    tpu.vector_store %arg16[%c56_150, %c0_151], %168 {strides = array<i32>} : memref<64x256xf32, #tpu.memory_space<vmem>>, vector<8x128xf32>,
    %170 = vector.extract_strided_slice %167 {offsets = [0, 128], sizes = [8, 128], strides = [1, 1]} : vector<8x256xf32> to vector<8x128xf32>
    %c0_152 = arith.constant 0 : index
    %c128_153 = arith.constant 128 : index
    %171 = vector.load %arg16[%c0_152, %c128_153] : memref<64x256xf32, #tpu.memory_space<vmem>>, vector<8x128xf32>
    tpu.vector_store %arg16[%c0_152, %c128_153], %170 {strides = array<i32>} : memref<64x256xf32, #tpu.memory_space<vmem>>, vector<8x128xf32>,
    %c0_154 = arith.constant 0 : index
    %c0_155 = arith.constant 0 : index
    %172 = vector.load %arg16[%c0_154, %c0_155] : memref<64x256xf32, #tpu.memory_space<vmem>>, vector<64x256xf32>
    %c0_156 = arith.constant 0 : index
    %c0_157 = arith.constant 0 : index
    %173 = vector.load %arg7[%c0_156, %c0_157] : memref<256x256xf32, #tpu.memory_space<vmem>>, vector<256x256xf32>
    %cst_158 = arith.constant dense<0.000000e+00> : vector<64x256xf32>
    %174 = tpu.matmul %172, %173, %cst_158 {dimension_numbers = #tpu.dot_dimension_numbers<[1], [0], [0], [1], [0, 0, 1, 1], [], []>} : vector<64x256xf32>, vector<256x256xf32>, vector<64x256xf32> -> vector<64x256xf32>
    %c0_159 = arith.constant 0 : index
    %c0_160 = arith.constant 0 : index
    %175 = vector.load %arg9[%c0_159, %c0_160] : memref<1x256xf32, #tpu.memory_space<vmem>>, vector<1x256xf32>
    %176 = vector.broadcast %175 : vector<1x256xf32> to vector<64x256xf32>
    %177 = arith.addf %174, %176 : vector<64x256xf32>
    %c0_161 = arith.constant 0 : index
    %c0_162 = arith.constant 0 : index
    %178 = vector.load %arg15[%c0_161, %c0_162] : memref<64x256xf32, #tpu.memory_space<vmem>>, vector<64x256xf32>
    tpu.vector_store %arg15[%c0_161, %c0_162], %177 {strides = array<i32>} : memref<64x256xf32, #tpu.memory_space<vmem>>, vector<64x256xf32>,
    %c0_163 = arith.constant 0 : index
    %c0_164 = arith.constant 0 : index
    %179 = vector.load %arg8[%c0_163, %c0_164] : memref<256x256xf32, #tpu.memory_space<vmem>>, vector<256x256xf32>
    %c0_165 = arith.constant 0 : index
    %c0_166 = arith.constant 0 : index
    %180 = vector.load %arg15[%c0_165, %c0_166] : memref<64x256xf32, #tpu.memory_space<vmem>>, vector<8x128xf32>
    %c56_167 = arith.constant 56 : index
    %c128_168 = arith.constant 128 : index
    %181 = vector.load %arg15[%c56_167, %c128_168] : memref<64x256xf32, #tpu.memory_space<vmem>>, vector<8x128xf32>
    %182 = tpu.concatenate %180, %181 in 1 : vector<8x128xf32>, vector<8x128xf32> -> vector<8x256xf32>
    %183 = math.tanh %182 : vector<8x256xf32>
    %184 = vector.extract_strided_slice %183 {offsets = [0, 0], sizes = [8, 128], strides = [1, 1]} : vector<8x256xf32> to vector<8x128xf32>
    %c0_169 = arith.constant 0 : index
    %c0_170 = arith.constant 0 : index
    %185 = vector.load %arg15[%c0_169, %c0_170] : memref<64x256xf32, #tpu.memory_space<vmem>>, vector<8x128xf32>
    tpu.vector_store %arg15[%c0_169, %c0_170], %184 {strides = array<i32>} : memref<64x256xf32, #tpu.memory_space<vmem>>, vector<8x128xf32>,
    %186 = vector.extract_strided_slice %183 {offsets = [0, 128], sizes = [8, 128], strides = [1, 1]} : vector<8x256xf32> to vector<8x128xf32>
    %c56_171 = arith.constant 56 : index
    %c128_172 = arith.constant 128 : index
    %187 = vector.load %arg15[%c56_171, %c128_172] : memref<64x256xf32, #tpu.memory_space<vmem>>, vector<8x128xf32>
    tpu.vector_store %arg15[%c56_171, %c128_172], %186 {strides = array<i32>} : memref<64x256xf32, #tpu.memory_space<vmem>>, vector<8x128xf32>,
    %c8_173 = arith.constant 8 : index
    %c0_174 = arith.constant 0 : index
    %188 = vector.load %arg15[%c8_173, %c0_174] : memref<64x256xf32, #tpu.memory_space<vmem>>, vector<8x128xf32>
    %c48_175 = arith.constant 48 : index
    %c128_176 = arith.constant 128 : index
    %189 = vector.load %arg15[%c48_175, %c128_176] : memref<64x256xf32, #tpu.memory_space<vmem>>, vector<8x128xf32>
    %190 = tpu.concatenate %188, %189 in 1 : vector<8x128xf32>, vector<8x128xf32> -> vector<8x256xf32>
    %cst_177 = arith.constant dense<0.000000e+00> : vector<8x256xf32>
    %191 = tpu.matmul %183, %179, %cst_177 {dimension_numbers = #tpu.dot_dimension_numbers<[1], [0], [0], [1], [0, 0, 1, 1], [], []>} : vector<8x256xf32>, vector<256x256xf32>, vector<8x256xf32> -> vector<8x256xf32>
    %192 = arith.addf %190, %191 : vector<8x256xf32>
    %193 = math.tanh %192 : vector<8x256xf32>
    %194 = vector.extract_strided_slice %193 {offsets = [0, 0], sizes = [8, 128], strides = [1, 1]} : vector<8x256xf32> to vector<8x128xf32>
    %c8_178 = arith.constant 8 : index
    %c0_179 = arith.constant 0 : index
    %195 = vector.load %arg15[%c8_178, %c0_179] : memref<64x256xf32, #tpu.memory_space<vmem>>, vector<8x128xf32>
    tpu.vector_store %arg15[%c8_178, %c0_179], %194 {strides = array<i32>} : memref<64x256xf32, #tpu.memory_space<vmem>>, vector<8x128xf32>,
    %196 = vector.extract_strided_slice %193 {offsets = [0, 128], sizes = [8, 128], strides = [1, 1]} : vector<8x256xf32> to vector<8x128xf32>
    %c48_180 = arith.constant 48 : index
    %c128_181 = arith.constant 128 : index
    %197 = vector.load %arg15[%c48_180, %c128_181] : memref<64x256xf32, #tpu.memory_space<vmem>>, vector<8x128xf32>
    tpu.vector_store %arg15[%c48_180, %c128_181], %196 {strides = array<i32>} : memref<64x256xf32, #tpu.memory_space<vmem>>, vector<8x128xf32>,
    %c16_182 = arith.constant 16 : index
    %c0_183 = arith.constant 0 : index
    %198 = vector.load %arg15[%c16_182, %c0_183] : memref<64x256xf32, #tpu.memory_space<vmem>>, vector<8x128xf32>
    %c40_184 = arith.constant 40 : index
    %c128_185 = arith.constant 128 : index
    %199 = vector.load %arg15[%c40_184, %c128_185] : memref<64x256xf32, #tpu.memory_space<vmem>>, vector<8x128xf32>
    %200 = tpu.concatenate %198, %199 in 1 : vector<8x128xf32>, vector<8x128xf32> -> vector<8x256xf32>
    %cst_186 = arith.constant dense<0.000000e+00> : vector<8x256xf32>
    %201 = tpu.matmul %193, %179, %cst_186 {dimension_numbers = #tpu.dot_dimension_numbers<[1], [0], [0], [1], [0, 0, 1, 1], [], []>} : vector<8x256xf32>, vector<256x256xf32>, vector<8x256xf32> -> vector<8x256xf32>
    %202 = arith.addf %200, %201 : vector<8x256xf32>
    %203 = math.tanh %202 : vector<8x256xf32>
    %204 = vector.extract_strided_slice %203 {offsets = [0, 0], sizes = [8, 128], strides = [1, 1]} : vector<8x256xf32> to vector<8x128xf32>
    %c16_187 = arith.constant 16 : index
    %c0_188 = arith.constant 0 : index
    %205 = vector.load %arg15[%c16_187, %c0_188] : memref<64x256xf32, #tpu.memory_space<vmem>>, vector<8x128xf32>
    tpu.vector_store %arg15[%c16_187, %c0_188], %204 {strides = array<i32>} : memref<64x256xf32, #tpu.memory_space<vmem>>, vector<8x128xf32>,
    %206 = vector.extract_strided_slice %203 {offsets = [0, 128], sizes = [8, 128], strides = [1, 1]} : vector<8x256xf32> to vector<8x128xf32>
    %c40_189 = arith.constant 40 : index
    %c128_190 = arith.constant 128 : index
    %207 = vector.load %arg15[%c40_189, %c128_190] : memref<64x256xf32, #tpu.memory_space<vmem>>, vector<8x128xf32>
    tpu.vector_store %arg15[%c40_189, %c128_190], %206 {strides = array<i32>} : memref<64x256xf32, #tpu.memory_space<vmem>>, vector<8x128xf32>,
    %c24_191 = arith.constant 24 : index
    %c0_192 = arith.constant 0 : index
    %208 = vector.load %arg15[%c24_191, %c0_192] : memref<64x256xf32, #tpu.memory_space<vmem>>, vector<8x128xf32>
    %c32_193 = arith.constant 32 : index
    %c128_194 = arith.constant 128 : index
    %209 = vector.load %arg15[%c32_193, %c128_194] : memref<64x256xf32, #tpu.memory_space<vmem>>, vector<8x128xf32>
    %210 = tpu.concatenate %208, %209 in 1 : vector<8x128xf32>, vector<8x128xf32> -> vector<8x256xf32>
    %cst_195 = arith.constant dense<0.000000e+00> : vector<8x256xf32>
    %211 = tpu.matmul %203, %179, %cst_195 {dimension_numbers = #tpu.dot_dimension_numbers<[1], [0], [0], [1], [0, 0, 1, 1], [], []>} : vector<8x256xf32>, vector<256x256xf32>, vector<8x256xf32> -> vector<8x256xf32>
    %212 = arith.addf %210, %211 : vector<8x256xf32>
    %213 = math.tanh %212 : vector<8x256xf32>
    %214 = vector.extract_strided_slice %213 {offsets = [0, 0], sizes = [8, 128], strides = [1, 1]} : vector<8x256xf32> to vector<8x128xf32>
    %c24_196 = arith.constant 24 : index
    %c0_197 = arith.constant 0 : index
    %215 = vector.load %arg15[%c24_196, %c0_197] : memref<64x256xf32, #tpu.memory_space<vmem>>, vector<8x128xf32>
    tpu.vector_store %arg15[%c24_196, %c0_197], %214 {strides = array<i32>} : memref<64x256xf32, #tpu.memory_space<vmem>>, vector<8x128xf32>,
    %216 = vector.extract_strided_slice %213 {offsets = [0, 128], sizes = [8, 128], strides = [1, 1]} : vector<8x256xf32> to vector<8x128xf32>
    %c32_198 = arith.constant 32 : index
    %c128_199 = arith.constant 128 : index
    %217 = vector.load %arg15[%c32_198, %c128_199] : memref<64x256xf32, #tpu.memory_space<vmem>>, vector<8x128xf32>
    tpu.vector_store %arg15[%c32_198, %c128_199], %216 {strides = array<i32>} : memref<64x256xf32, #tpu.memory_space<vmem>>, vector<8x128xf32>,
    %c32_200 = arith.constant 32 : index
    %c0_201 = arith.constant 0 : index
    %218 = vector.load %arg15[%c32_200, %c0_201] : memref<64x256xf32, #tpu.memory_space<vmem>>, vector<8x128xf32>
    %c24_202 = arith.constant 24 : index
    %c128_203 = arith.constant 128 : index
    %219 = vector.load %arg15[%c24_202, %c128_203] : memref<64x256xf32, #tpu.memory_space<vmem>>, vector<8x128xf32>
    %220 = tpu.concatenate %218, %219 in 1 : vector<8x128xf32>, vector<8x128xf32> -> vector<8x256xf32>
    %cst_204 = arith.constant dense<0.000000e+00> : vector<8x256xf32>
    %221 = tpu.matmul %213, %179, %cst_204 {dimension_numbers = #tpu.dot_dimension_numbers<[1], [0], [0], [1], [0, 0, 1, 1], [], []>} : vector<8x256xf32>, vector<256x256xf32>, vector<8x256xf32> -> vector<8x256xf32>
    %222 = arith.addf %220, %221 : vector<8x256xf32>
    %223 = math.tanh %222 : vector<8x256xf32>
    %224 = vector.extract_strided_slice %223 {offsets = [0, 0], sizes = [8, 128], strides = [1, 1]} : vector<8x256xf32> to vector<8x128xf32>
    %c32_205 = arith.constant 32 : index
    %c0_206 = arith.constant 0 : index
    %225 = vector.load %arg15[%c32_205, %c0_206] : memref<64x256xf32, #tpu.memory_space<vmem>>, vector<8x128xf32>
    tpu.vector_store %arg15[%c32_205, %c0_206], %224 {strides = array<i32>} : memref<64x256xf32, #tpu.memory_space<vmem>>, vector<8x128xf32>,
    %226 = vector.extract_strided_slice %223 {offsets = [0, 128], sizes = [8, 128], strides = [1, 1]} : vector<8x256xf32> to vector<8x128xf32>
    %c24_207 = arith.constant 24 : index
    %c128_208 = arith.constant 128 : index
    %227 = vector.load %arg15[%c24_207, %c128_208] : memref<64x256xf32, #tpu.memory_space<vmem>>, vector<8x128xf32>
    tpu.vector_store %arg15[%c24_207, %c128_208], %226 {strides = array<i32>} : memref<64x256xf32, #tpu.memory_space<vmem>>, vector<8x128xf32>,
    %c40_209 = arith.constant 40 : index
    %c0_210 = arith.constant 0 : index
    %228 = vector.load %arg15[%c40_209, %c0_210] : memref<64x256xf32, #tpu.memory_space<vmem>>, vector<8x128xf32>
    %c16_211 = arith.constant 16 : index
    %c128_212 = arith.constant 128 : index
    %229 = vector.load %arg15[%c16_211, %c128_212] : memref<64x256xf32, #tpu.memory_space<vmem>>, vector<8x128xf32>
    %230 = tpu.concatenate %228, %229 in 1 : vector<8x128xf32>, vector<8x128xf32> -> vector<8x256xf32>
    %cst_213 = arith.constant dense<0.000000e+00> : vector<8x256xf32>
    %231 = tpu.matmul %223, %179, %cst_213 {dimension_numbers = #tpu.dot_dimension_numbers<[1], [0], [0], [1], [0, 0, 1, 1], [], []>} : vector<8x256xf32>, vector<256x256xf32>, vector<8x256xf32> -> vector<8x256xf32>
    %232 = arith.addf %230, %231 : vector<8x256xf32>
    %233 = math.tanh %232 : vector<8x256xf32>
    %234 = vector.extract_strided_slice %233 {offsets = [0, 0], sizes = [8, 128], strides = [1, 1]} : vector<8x256xf32> to vector<8x128xf32>
    %c40_214 = arith.constant 40 : index
    %c0_215 = arith.constant 0 : index
    %235 = vector.load %arg15[%c40_214, %c0_215] : memref<64x256xf32, #tpu.memory_space<vmem>>, vector<8x128xf32>
    tpu.vector_store %arg15[%c40_214, %c0_215], %234 {strides = array<i32>} : memref<64x256xf32, #tpu.memory_space<vmem>>, vector<8x128xf32>,
    %236 = vector.extract_strided_slice %233 {offsets = [0, 128], sizes = [8, 128], strides = [1, 1]} : vector<8x256xf32> to vector<8x128xf32>
    %c16_216 = arith.constant 16 : index
    %c128_217 = arith.constant 128 : index
    %237 = vector.load %arg15[%c16_216, %c128_217] : memref<64x256xf32, #tpu.memory_space<vmem>>, vector<8x128xf32>
    tpu.vector_store %arg15[%c16_216, %c128_217], %236 {strides = array<i32>} : memref<64x256xf32, #tpu.memory_space<vmem>>, vector<8x128xf32>,
    %c48_218 = arith.constant 48 : index
    %c0_219 = arith.constant 0 : index
    %238 = vector.load %arg15[%c48_218, %c0_219] : memref<64x256xf32, #tpu.memory_space<vmem>>, vector<8x128xf32>
    %c8_220 = arith.constant 8 : index
    %c128_221 = arith.constant 128 : index
    %239 = vector.load %arg15[%c8_220, %c128_221] : memref<64x256xf32, #tpu.memory_space<vmem>>, vector<8x128xf32>
    %240 = tpu.concatenate %238, %239 in 1 : vector<8x128xf32>, vector<8x128xf32> -> vector<8x256xf32>
    %cst_222 = arith.constant dense<0.000000e+00> : vector<8x256xf32>
    %241 = tpu.matmul %233, %179, %cst_222 {dimension_numbers = #tpu.dot_dimension_numbers<[1], [0], [0], [1], [0, 0, 1, 1], [], []>} : vector<8x256xf32>, vector<256x256xf32>, vector<8x256xf32> -> vector<8x256xf32>
    %242 = arith.addf %240, %241 : vector<8x256xf32>
    %243 = math.tanh %242 : vector<8x256xf32>
    %244 = vector.extract_strided_slice %243 {offsets = [0, 0], sizes = [8, 128], strides = [1, 1]} : vector<8x256xf32> to vector<8x128xf32>
    %c48_223 = arith.constant 48 : index
    %c0_224 = arith.constant 0 : index
    %245 = vector.load %arg15[%c48_223, %c0_224] : memref<64x256xf32, #tpu.memory_space<vmem>>, vector<8x128xf32>
    tpu.vector_store %arg15[%c48_223, %c0_224], %244 {strides = array<i32>} : memref<64x256xf32, #tpu.memory_space<vmem>>, vector<8x128xf32>,
    %246 = vector.extract_strided_slice %243 {offsets = [0, 128], sizes = [8, 128], strides = [1, 1]} : vector<8x256xf32> to vector<8x128xf32>
    %c8_225 = arith.constant 8 : index
    %c128_226 = arith.constant 128 : index
    %247 = vector.load %arg15[%c8_225, %c128_226] : memref<64x256xf32, #tpu.memory_space<vmem>>, vector<8x128xf32>
    tpu.vector_store %arg15[%c8_225, %c128_226], %246 {strides = array<i32>} : memref<64x256xf32, #tpu.memory_space<vmem>>, vector<8x128xf32>,
    %c56_227 = arith.constant 56 : index
    %c0_228 = arith.constant 0 : index
    %248 = vector.load %arg15[%c56_227, %c0_228] : memref<64x256xf32, #tpu.memory_space<vmem>>, vector<8x128xf32>
    %c0_229 = arith.constant 0 : index
    %c128_230 = arith.constant 128 : index
    %249 = vector.load %arg15[%c0_229, %c128_230] : memref<64x256xf32, #tpu.memory_space<vmem>>, vector<8x128xf32>
    %250 = tpu.concatenate %248, %249 in 1 : vector<8x128xf32>, vector<8x128xf32> -> vector<8x256xf32>
    %cst_231 = arith.constant dense<0.000000e+00> : vector<8x256xf32>
    %251 = tpu.matmul %243, %179, %cst_231 {dimension_numbers = #tpu.dot_dimension_numbers<[1], [0], [0], [1], [0, 0, 1, 1], [], []>} : vector<8x256xf32>, vector<256x256xf32>, vector<8x256xf32> -> vector<8x256xf32>
    %252 = arith.addf %250, %251 : vector<8x256xf32>
    %253 = math.tanh %252 : vector<8x256xf32>
    %254 = vector.extract_strided_slice %253 {offsets = [0, 0], sizes = [8, 128], strides = [1, 1]} : vector<8x256xf32> to vector<8x128xf32>
    %c56_232 = arith.constant 56 : index
    %c0_233 = arith.constant 0 : index
    %255 = vector.load %arg15[%c56_232, %c0_233] : memref<64x256xf32, #tpu.memory_space<vmem>>, vector<8x128xf32>
    tpu.vector_store %arg15[%c56_232, %c0_233], %254 {strides = array<i32>} : memref<64x256xf32, #tpu.memory_space<vmem>>, vector<8x128xf32>,
    %256 = vector.extract_strided_slice %253 {offsets = [0, 128], sizes = [8, 128], strides = [1, 1]} : vector<8x256xf32> to vector<8x128xf32>
    %c0_234 = arith.constant 0 : index
    %c128_235 = arith.constant 128 : index
    %257 = vector.load %arg15[%c0_234, %c128_235] : memref<64x256xf32, #tpu.memory_space<vmem>>, vector<8x128xf32>
    tpu.vector_store %arg15[%c0_234, %c128_235], %256 {strides = array<i32>} : memref<64x256xf32, #tpu.memory_space<vmem>>, vector<8x128xf32>,
    %c0_236 = arith.constant 0 : index
    %c0_237 = arith.constant 0 : index
    %258 = vector.load %arg15[%c0_236, %c0_237] : memref<64x256xf32, #tpu.memory_space<vmem>>, vector<64x256xf32>
    %c0_238 = arith.constant 0 : index
    %c0_239 = arith.constant 0 : index
    %259 = vector.load %arg10[%c0_238, %c0_239] : memref<256x64xf32, #tpu.memory_space<vmem>>, vector<256x64xf32>
    %cst_240 = arith.constant dense<0.000000e+00> : vector<64x64xf32>
    %260 = tpu.matmul %258, %259, %cst_240 {dimension_numbers = #tpu.dot_dimension_numbers<[1], [0], [0], [1], [0, 0, 1, 1], [], []>} : vector<64x256xf32>, vector<256x64xf32>, vector<64x64xf32> -> vector<64x64xf32>
    %c0_241 = arith.constant 0 : index
    %c0_242 = arith.constant 0 : index
    %261 = vector.load %arg11[%c0_241, %c0_242] : memref<1x64xf32, #tpu.memory_space<vmem>>, vector<1x64xf32>
    %262 = vector.broadcast %261 : vector<1x64xf32> to vector<64x64xf32>
    %263 = arith.addf %260, %262 : vector<64x64xf32>
    %cst_243 = arith.constant 0.000000e+00 : f32
    %264 = vector.broadcast %cst_243 : f32 to vector<64x64xf32>
    %265 = arith.maximumf %263, %264 : vector<64x64xf32>
    %c0_244 = arith.constant 0 : index
    %c0_245 = arith.constant 0 : index
    %266 = vector.load %arg12[%c0_244, %c0_245] : memref<64x14xf32, #tpu.memory_space<vmem>>, vector<64x14xf32>
    %cst_246 = arith.constant dense<0.000000e+00> : vector<64x14xf32>
    %267 = tpu.matmul %265, %266, %cst_246 {dimension_numbers = #tpu.dot_dimension_numbers<[1], [0], [0], [1], [0, 0, 1, 1], [], []>} : vector<64x64xf32>, vector<64x14xf32>, vector<64x14xf32> -> vector<64x14xf32>
    %c0_247 = arith.constant 0 : index
    %c0_248 = arith.constant 0 : index
    %268 = vector.load %arg13[%c0_247, %c0_248] : memref<1x14xf32, #tpu.memory_space<vmem>>, vector<1x14xf32>
    %269 = vector.broadcast %268 : vector<1x14xf32> to vector<64x14xf32>
    %270 = arith.addf %267, %269 : vector<64x14xf32>
    %c0_249 = arith.constant 0 : index
    %c0_250 = arith.constant 0 : index
    %271 = vector.load %arg14[%c0_249, %c0_250] : memref<64x14xf32, #tpu.memory_space<vmem>>, vector<64x14xf32>
    tpu.vector_store %arg14[%c0_249, %c0_250], %270 {strides = array<i32>} : memref<64x14xf32, #tpu.memory_space<vmem>>, vector<64x14xf32>,
    return
  }
}

</mosaic_0001>

<bundles_post_ra>
// kernel: _lambda_.1
= control target key start
LH: loop header
LB: loop body
LE: loop exit
PB: predicated region body
PF: predicated region fallthrough
CT: control target
= control target key end

     0   :  { %19 = vsyncpa [#allocation5], 0  ;;  %s6330_s0 = inlined_call_operand.vmem [shape: f32[64,12], index: 0, kind: input, shape index: {}]   ;;  %s6331_s1 = inlined_call_operand.vmem [shape: f32[12,256], index: 1, kind: input, shape index: {}]   ;;  %s6332_s2 = inlined_call_operand.hbm [shape: f32[256,256], index: 2, kind: input, shape index: {}]   ;;  %s6333_s3 = inlined_call_operand.vmem [shape: f32[1,256], index: 3, kind: input, shape index: {}]   ;;  %s6334_s4 = inlined_call_operand.hbm [shape: f32[256,256], index: 4, kind: input, shape index: {}]   ;;  %s6335_s5 = inlined_call_operand.hbm [shape: f32[256,256], index: 5, kind: input, shape index: {}]   ;;  %s6336_s6 = inlined_call_operand.vmem [shape: f32[1,256], index: 6, kind: input, shape index: {}]   ;;  %s6337_s7 = inlined_call_operand.hbm [shape: f32[256,256], index: 7, kind: input, shape index: {}]   ;;  %s6338_s8 = inlined_call_operand.hbm [shape: f32[256,256], index: 8, kind: input, shape index: {}]   ;;  %s6339_s9 = inlined_call_operand.vmem [shape: f32[1,256], index: 9, kind: input, shape index: {}]   ;;  %s6340_s10 = inlined_call_operand.hbm [shape: f32[256,64], index: 10, kind: input, shape index: {}]   ;;  %s6341_s11 = inlined_call_operand.vmem [shape: f32[1,64], index: 11, kind: input, shape index: {}]   ;;  %s6342_s12 = inlined_call_operand.vmem [shape: f32[64,14], index: 12, kind: input, shape index: {}]   ;;  %s6343_s13 = inlined_call_operand.vmem [shape: f32[1,14], index: 13, kind: input, shape index: {}]   ;;  %s6344_s14 = inlined_call_operand.vmem [shape: f32[64,14], index: 14, kind: output, shape index: {}]  }
   0x1   :  { %20 = vsyncpa [#allocation7], 0 }
   0x2   :  { %21 = vsyncpa [#allocation10], 0 }
   0x3   :  { %22 = vsyncpa [#allocation13], 0  ;;  %s4849_s29 = smov [#allocation6]   ;;  %s4850_s15 = smov [#allocation9]  }
   0x4   :  { %s46_s30 = sshll.u32 %s4849_s29, 4  ;;  %s72_s16 = sshll.u32 %s4850_s15, 4  ;;  %s47_s30 = int_to_ptr.vmem [resolvable:$true] %s46_s30  ;;  %s4936_s16 = int_to_ptr.vmem [resolvable:$true] %s72_s16 }
   0x5   :  { %s4709_s19 = scalar_lea.hbm %s6334_s4, 8192 }
   0x6   :  { %p4710_p0 = scmp.ne.s32.totalorder %s6334_s4, %s4709_s19  ;;  %p4713_p1 = scmp.lt.u32.totalorder %s4709_s19, %s6334_s4 }
   0x8   :  { %p4715_p2 = pnand %p4713_p1, %p4710_p0 }
   0xa   :  { %4718 = shalt.err (!%p4715_p2)
}
   0xb   :  { %s4719_s24 = scalar_lea.vmem %s47_s30, 8192  ;;  %p4724_p4 = scmp.lt.s32.totalorder %s47_s30, %s47_s30 }
   0xc   :  { %p4720_p3 = scmp.ne.s32.totalorder %s47_s30, %s4719_s24  ;;  %p4725_p5 = scmp.lt.s32.totalorder %s4719_s24, %s4719_s24 }
   0xe   :  { %p4726_p6 = por %p4725_p5, %p4724_p4 }
  0x10   :  { %p4727_p7 = pnand %p4726_p6, %p4720_p3 }
  0x12   :  { %4730 = shalt.err (!%p4727_p7)
}
  0x13   :  { %s4851_s25 = smov 256   ;;  %s4852_s26 = smov 16  }
  0x14   :  { %52 = dma.hbm_to_vmem [thread:$0]  %s6334_s4, 8192, %s47_s30, [#allocation7], %s4851_s25, %s4851_s25, %s4852_s26  }
  0x15   :  { %s4731_s17 = scalar_lea.hbm %s6337_s7, 8192 }
  0x16   :  { %p4732_p8 = scmp.ne.s32.totalorder %s6337_s7, %s4731_s17  ;;  %p4735_p9 = scmp.lt.u32.totalorder %s4731_s17, %s6337_s7 }
  0x18   :  { %p4737_p10 = pnand %p4735_p9, %p4732_p8 }
  0x1a   :  { %4740 = shalt.err (!%p4737_p10)
}
  0x1b   :  { %s4741_s22 = scalar_lea.vmem %s4936_s16, 8192  ;;  %p4746_p12 = scmp.lt.s32.totalorder %s4936_s16, %s4936_s16 }
  0x1c   :  { %p4742_p11 = scmp.ne.s32.totalorder %s4936_s16, %s4741_s22  ;;  %p4747_p13 = scmp.lt.s32.totalorder %s4741_s22, %s4741_s22 }
  0x1e   :  { %p4748_p0 = por %p4747_p13, %p4746_p12 }
  0x20   :  { %p4749_p1 = pnand %p4748_p0, %p4742_p11 }
  0x22   :  { %4752 = shalt.err (!%p4749_p1)
}
  0x23   :  { %78 = dma.hbm_to_vmem [thread:$0]  %s6337_s7, 8192, %s4936_s16, [#allocation10], %s4851_s25, %s4851_s25, %s4852_s26  }
  0x24   :  { %s4853_s23 = smov [#allocation4]   ;;  %s4854_s27 = smov [#allocation8]  }
  0x25   :  { %s32_s24 = sshll.u32 %s4853_s23, 4  ;;  %s58_s28 = sshll.u32 %s4854_s27, 4  ;;  %s33_s24 = int_to_ptr.vmem [resolvable:$true] %s32_s24  ;;  %s4973_s28 = int_to_ptr.vmem [resolvable:$true] %s58_s28 }
  0x26   :  { %s4753_s17 = scalar_lea.hbm %s6332_s2, 8192 }
  0x27   :  { %p4754_p2 = scmp.ne.s32.totalorder %s6332_s2, %s4753_s17  ;;  %p4757_p3 = scmp.lt.u32.totalorder %s4753_s17, %s6332_s2 }
  0x29   :  { %p4759_p4 = pnand %p4757_p3, %p4754_p2 }
  0x2b   :  { %4762 = shalt.err (!%p4759_p4)
}
  0x2c   :  { %s4763_s7 = scalar_lea.vmem %s33_s24, 8192  ;;  %p4768_p6 = scmp.lt.s32.totalorder %s33_s24, %s33_s24 }
  0x2d   :  { %p4764_p5 = scmp.ne.s32.totalorder %s33_s24, %s4763_s7  ;;  %p4769_p7 = scmp.lt.s32.totalorder %s4763_s7, %s4763_s7 }
  0x2f   :  { %p4770_p8 = por %p4769_p7, %p4768_p6 }
  0x31   :  { %p4771_p9 = pnand %p4770_p8, %p4764_p5 }
  0x33   :  { %4774 = shalt.err (!%p4771_p9)
}
  0x34   :  { %38 = dma.hbm_to_vmem [thread:$0]  %s6332_s2, 8192, %s33_s24, [#allocation5], %s4851_s25, %s4851_s25, %s4852_s26  }
  0x35   :  { %s4775_s23 = scalar_lea.hbm %s6335_s5, 8192 }
  0x36   :  { %p4776_p10 = scmp.ne.s32.totalorder %s6335_s5, %s4775_s23  ;;  %p4779_p11 = scmp.lt.u32.totalorder %s4775_s23, %s6335_s5 }
  0x38   :  { %p4781_p12 = pnand %p4779_p11, %p4776_p10 }
  0x3a   :  { %4784 = shalt.err (!%p4781_p12)
}
  0x3b   :  { %s4785_s18 = scalar_lea.vmem %s4973_s28, 8192  ;;  %p4790_p0 = scmp.lt.s32.totalorder %s4973_s28, %s4973_s28 }
  0x3c   :  { %p4786_p13 = scmp.ne.s32.totalorder %s4973_s28, %s4785_s18  ;;  %p4791_p1 = scmp.lt.s32.totalorder %s4785_s18, %s4785_s18 }
  0x3e   :  { %p4792_p2 = por %p4791_p1, %p4790_p0 }
  0x40   :  { %p4793_p3 = pnand %p4792_p2, %p4786_p13 }
  0x42   :  { %4796 = shalt.err (!%p4793_p3)
}
  0x43   :  { %64 = dma.hbm_to_vmem [thread:$0]  %s6335_s5, 8192, %s4973_s28, [#allocation7], %s4851_s25, %s4851_s25, %s4852_s26  }
  0x44   :  { %s4855_s19 = smov [#allocation11]   ;;  %s4856_s21 = smov [#allocation12]  }
  0x45   :  { %s84_s20 = sshll.u32 %s4855_s19, 4  ;;  %s98_s7 = sshll.u32 %s4856_s21, 4  ;;  %s85_s20 = int_to_ptr.vmem [resolvable:$true] %s84_s20  ;;  %s5010_s7 = int_to_ptr.vmem [resolvable:$true] %s98_s7 }
  0x46   :  { %s4797_s4 = scalar_lea.hbm %s6338_s8, 8192 }
  0x47   :  { %p4798_p4 = scmp.ne.s32.totalorder %s6338_s8, %s4797_s4  ;;  %p4801_p5 = scmp.lt.u32.totalorder %s4797_s4, %s6338_s8 }
  0x49   :  { %p4803_p6 = pnand %p4801_p5, %p4798_p4 }
  0x4b   :  { %4806 = shalt.err (!%p4803_p6)
}
  0x4c   :  { %s4807_s5 = scalar_lea.vmem %s85_s20, 8192  ;;  %p4812_p8 = scmp.lt.s32.totalorder %s85_s20, %s85_s20 }
  0x4d   :  { %p4808_p7 = scmp.ne.s32.totalorder %s85_s20, %s4807_s5  ;;  %p4813_p9 = scmp.lt.s32.totalorder %s4807_s5, %s4807_s5 }
  0x4f   :  { %p4814_p10 = por %p4813_p9, %p4812_p8 }
  0x51   :  { %p4815_p11 = pnand %p4814_p10, %p4808_p7 }
  0x53   :  { %4818 = shalt.err (!%p4815_p11)
}
  0x54   :  { %90 = dma.hbm_to_vmem [thread:$0]  %s6338_s8, 8192, %s85_s20, [#allocation10], %s4851_s25, %s4851_s25, %s4852_s26  }
  0x55   :  { %s4819_s2 = scalar_lea.hbm %s6340_s10, 4096 }
  0x56   :  { %p4820_p12 = scmp.ne.s32.totalorder %s6340_s10, %s4819_s2  ;;  %p4823_p13 = scmp.lt.u32.totalorder %s4819_s2, %s6340_s10 }
  0x58   :  { %p4825_p0 = pnand %p4823_p13, %p4820_p12 }
  0x5a   :  { %4828 = shalt.err (!%p4825_p0)
}
  0x5b   :  { %s4829_s22 = scalar_lea.vmem %s5010_s7, 4096  ;;  %p4834_p2 = scmp.lt.s32.totalorder %s5010_s7, %s5010_s7 }
  0x5c   :  { %p4830_p1 = scmp.ne.s32.totalorder %s5010_s7, %s4829_s22  ;;  %p4835_p3 = scmp.lt.s32.totalorder %s4829_s22, %s4829_s22 }
  0x5e   :  { %p4836_p4 = por %p4835_p3, %p4834_p2 }
  0x60   :  { %p4837_p5 = pnand %p4836_p4, %p4830_p1 }
  0x62   :  { %4840 = shalt.err (!%p4837_p5)
}
  0x63   :  { %s4857_s8 = smov 128   ;;  %s4858_s25 = smov 8  }
  0x64   :  { %104 = dma.hbm_to_vmem [thread:$0]  %s6340_s10, 4096, %s5010_s7, [#allocation13], %s4857_s8, %s4857_s8, %s4858_s25  }
  0x65   :  { %4841 = dma.done.wait [#allocation5], 8192  }
  0x66   :  { %4842 = vsyncadd [#allocation5], 4294959104 }
  0x67   :  { %4843 = dma.done.wait [#allocation7], 16384  }
  0x68   :  { %4844 = vsyncadd [#allocation7], 4294950912 }
  0x69   :  { %4845 = dma.done.wait [#allocation10], 16384  }
  0x6a   :  { %4846 = vsyncadd [#allocation10], 4294950912 }
  0x6b   :  { %4847 = dma.done.wait [#allocation13], 4096  }
  0x6c   :  { %4848 = vsyncadd [#allocation13], 4294963200  ;;  %v4859_v0 = vmov 0.0   ;;  %vm178_vm0 = vcmask 1043456   ;;  %vm4860_vm1 = vmmov 1   ;;  %v138_v1 = vld [vmem:[%s6331_s1 + $0x8] sm:$0xff] }
  0x6d   :  { %249 = vmatprep.mubr.f32.mxu1 %v4859_v0  ;;  %vm3076_vm2 = vmpackc.low %vm178_vm0, %vm4860_vm1  ;;  %v140_v2 = vld [vmem:[%s6331_s1 + $0x18] sm:$0xf]  ;;  %v137_v3 = vld [vmem:[%s6331_s1] sm:$0xff]  ;;  %vm153_vm3 = vcmask 97280   ;;  %vm2808_vm4 = vcmask 523264   ;;  %vm2938_vm5 = vcmask 113664  }
  0x6e   :  { %v3075_v4 = vpack.c.bf16 %v140_v2, %v138_v1  ;;  %v139_v5 = vld [vmem:[%s6331_s1 + $0x10] sm:$0xf]  ;;  %v129_v7 = vld [vmem:[%s6330_s0] sm:$0xff]  ;;  %v315_v8 = vld [vmem:[#allocation4 + $0x8] sm:$0xff] }
  0x6f   :  { %v3078_v6 = vpack.c.bf16 %v139_v5, %v137_v3  ;;  %v317_v9 = vld [vmem:[#allocation4 + $0x18] sm:$0xff]  ;;  %v314_v10 = vld [vmem:[#allocation4] sm:$0xff]  ;;  %v316_v12 = vld [vmem:[#allocation4 + $0x10] sm:$0xff] }
  0x70   :  { %3077 = vmatprep.subr.msk.bf16.mxu1 %vm3076_vm2, %v3075_v4  ;;  %v5060_v11 = vpack.c.bf16 %v317_v9, %v315_v8  ;;  %v319_v13 = vld [vmem:[#allocation4 + $0x28] sm:$0xff]  ;;  %v321_v14 = vld [vmem:[#allocation4 + $0x38] sm:$0xff]  ;;  %v5062_v15 = vpack.c.bf16 %v316_v12, %v314_v10  ;;  %v318_v17 = vld [vmem:[#allocation4 + $0x20] sm:$0xff] }
  0x71   :  { %3080 = vmatpush1.bf16.msk.msra.mxu1 %vm3076_vm2, %v3078_v6  ;;  %v5064_v16 = vpack.c.bf16 %v321_v14, %v319_v13  ;;  %v320_v18 = vld [vmem:[#allocation4 + $0x30] sm:$0xff]  ;;  %v323_v19 = vld [vmem:[#allocation4 + $0x48] sm:$0xff]  ;;  %v325_v20 = vld [vmem:[#allocation4 + $0x58] sm:$0xff] }
  0x72   :  { %3082 = vmatprep.subr.bf16.mxu1 %v5060_v11  ;;  %v130_v21 = vld [vmem:[%s6330_s0 + $0x8] sm:$0xff]  ;;  %v5073_v22 = vpack.c.bf16 %v320_v18, %v318_v17  ;;  %v5076_v23 = vpack.c.bf16 %v325_v20, %v323_v19  ;;  %v322_v24 = vld [vmem:[#allocation4 + $0x40] sm:$0xff]  ;;  %v324_v25 = vld [vmem:[#allocation4 + $0x50] sm:$0xff]  ;;  %3146 = vmatprep.subr.bf16.mxu0 %v5060_v11 }
  0x73   :  { %v327_v26 = vld [vmem:[#allocation4 + $0x68] sm:$0xff]  ;;  %v329_v27 = vld [vmem:[#allocation4 + $0x78] sm:$0xff]  ;;  %3148 = vmatpush1.bf16.msra.mxu0 %v5062_v15  ;;  %v131_v28 = vld [vmem:[%s6330_s0 + $0x10] sm:$0xff]  ;;  %v5087_v29 = vpack.c.bf16 %v324_v25, %v322_v24 }
  0x74   :  { %2957 = vmatmul.mubr.msk.f32.vlgmr.msra.gmra.mrb[0].mxu1 %vm153_vm3, %v129_v7  ;;  %3150 = vmatprep.subr.bf16.mxu0 %v5064_v16  ;;  %v5090_v30 = vpack.c.bf16 %v329_v27, %v327_v26  ;;  %v326_v31 = vld [vmem:[#allocation4 + $0x60] sm:$0xff]  ;;  %v328_v32 = vld [vmem:[#allocation4 + $0x70] sm:$0xff]  ;;  %v331_v33 = vld [vmem:[#allocation4 + $0x88] sm:$0xff] }
  0x75   :  { %255 = vmatprep.mubr.f32.mxu1 %v4859_v0  ;;  %3084 = vmatpush1.bf16.msra.mxu1 %v5062_v15  ;;  %v333_v34 = vld [vmem:[#allocation4 + $0x98] sm:$0xff]  ;;  %v5100_v36 = vpack.c.bf16 %v328_v32, %v326_v31  ;;  %v330_v38 = vld [vmem:[#allocation4 + $0x80] sm:$0xff]  ;;  %v332_v39 = vld [vmem:[#allocation4 + $0x90] sm:$0xff] }
  0x76   :  { %3086 = vmatprep.subr.bf16.mxu1 %v5064_v16  ;;  %v132_v35 = vld [vmem:[%s6330_s0 + $0x18] sm:$0xff]  ;;  %v5103_v37 = vpack.c.bf16 %v333_v34, %v331_v33  ;;  %v133_v40 = vld [vmem:[%s6330_s0 + $0x20] sm:$0xff]  ;;  %v5113_v41 = vpack.c.bf16 %v332_v39, %v330_v38  ;;  %v134_v42 = vld [vmem:[%s6330_s0 + $0x28] sm:$0xff] }
  0x77   :  { %3152 = vmatpush1.bf16.msra.mxu0 %v5073_v22  ;;  %v135_v43 = vld [vmem:[%s6330_s0 + $0x30] sm:$0xff]  ;;  %v136_v44 = vld [vmem:[%s6330_s0 + $0x38] sm:$0xff]  ;;  %v335_v45 = vld [vmem:[#allocation4 + $0xa8] sm:$0xff] }
  0x78   :  { %2958 = vmatmul.mubr.msk.f32.gmra.mrb[2].mxu1 %vm153_vm3, %v130_v21  ;;  %3154 = vmatprep.subr.bf16.mxu0 %v5076_v23  ;;  %v337_v46 = vld [vmem:[#allocation4 + $0xb8] sm:$0xff]  ;;  %v334_v48 = vld [vmem:[#allocation4 + $0xa0] sm:$0xff]  ;;  %v336_v49 = vld [vmem:[#allocation4 + $0xb0] sm:$0xff] }
  0x79   :  { %261 = vmatprep.mubr.f32.mxu1 %v4859_v0  ;;  %3088 = vmatpush1.bf16.msra.mxu1 %v5073_v22  ;;  %v5136_v47 = vpack.c.bf16 %v337_v46, %v335_v45  ;;  %v5138_v50 = vpack.c.bf16 %v336_v49, %v334_v48  ;;  %v339_v51 = vld [vmem:[#allocation4 + $0xc8] sm:$0xff]  ;;  %v341_v52 = vld [vmem:[#allocation4 + $0xd8] sm:$0xff]  ;;  %v338_v54 = vld [vmem:[#allocation4 + $0xc0] sm:$0xff] }
  0x7a   :  { %3090 = vmatprep.subr.bf16.mxu1 %v5076_v23  ;;  %v5144_v53 = vpack.c.bf16 %v341_v52, %v339_v51  ;;  %v340_v55 = vld [vmem:[#allocation4 + $0xd0] sm:$0xff]  ;;  %v343_v57 = vld [vmem:[#allocation4 + $0xe8] sm:$0xff]  ;;  %v345_v58 = vld [vmem:[#allocation4 + $0xf8] sm:$0xff] }
  0x7b   :  { %3156 = vmatpush1.bf16.msra.mxu0 %v5087_v29  ;;  %v5146_v56 = vpack.c.bf16 %v340_v55, %v338_v54  ;;  %v5152_v59 = vpack.c.bf16 %v345_v58, %v343_v57  ;;  %v342_v60 = vld [vmem:[#allocation4 + $0xe0] sm:$0xff]  ;;  %v344_v61 = vld [vmem:[#allocation4 + $0xf0] sm:$0xff]  ;;  %v347_v63 = vld [vmem:[#allocation4 + $0x108] sm:$0xff] }
  0x7c   :  { %2959 = vmatmul.mubr.msk.f32.gmra.mrb[4].mxu1 %vm153_vm3, %v131_v28  ;;  %3158 = vmatprep.subr.bf16.mxu0 %v5090_v30  ;;  %v5154_v62 = vpack.c.bf16 %v344_v61, %v342_v60  ;;  %v346_v2 = vld [vmem:[#allocation4 + $0x100] sm:$0xff]  ;;  %v348_v3 = vld [vmem:[#allocation4 + $0x110] sm:$0xff]  ;;  %v351_v5 = vld [vmem:[#allocation4 + $0x128] sm:$0xff] }
  0x7d   :  { %267 = vmatprep.mubr.f32.mxu1 %v4859_v0  ;;  %3092 = vmatpush1.bf16.msra.mxu1 %v5087_v29  ;;  %v5162_v4 = vpack.c.bf16 %v348_v3, %v346_v2  ;;  %v353_v6 = vld [vmem:[#allocation4 + $0x138] sm:$0xff]  ;;  %v350_v8 = vld [vmem:[#allocation4 + $0x120] sm:$0xff]  ;;  %v352_v9 = vld [vmem:[#allocation4 + $0x130] sm:$0xff] }
  0x7e   :  { %3094 = vmatprep.subr.bf16.mxu1 %v5090_v30  ;;  %v5168_v7 = vpack.c.bf16 %v353_v6, %v351_v5  ;;  %v5170_v10 = vpack.c.bf16 %v352_v9, %v350_v8  ;;  %v355_v12 = vld [vmem:[#allocation4 + $0x148] sm:$0xff]  ;;  %v357_v13 = vld [vmem:[#allocation4 + $0x158] sm:$0xff]  ;;  %v354_v17 = vld [vmem:[#allocation4 + $0x140] sm:$0xff] }
  0x7f   :  { %3160 = vmatpush1.bf16.msra.mxu0 %v5100_v36  ;;  %v5176_v14 = vpack.c.bf16 %v357_v13, %v355_v12  ;;  %v356_v18 = vld [vmem:[#allocation4 + $0x150] sm:$0xff]  ;;  %v359_v20 = vld [vmem:[#allocation4 + $0x168] sm:$0xff]  ;;  %v361_v21 = vld [vmem:[#allocation4 + $0x178] sm:$0xff] }
  0x80   :  { %2960 = vmatmul.mubr.msk.f32.gmra.mrb[6].mxu1 %vm153_vm3, %v132_v35  ;;  %3162 = vmatprep.subr.bf16.mxu0 %v5103_v37  ;;  %v5178_v19 = vpack.c.bf16 %v356_v18, %v354_v17  ;;  %v5184_v24 = vpack.c.bf16 %v361_v21, %v359_v20  ;;  %v358_v25 = vld [vmem:[#allocation4 + $0x160] sm:$0xff]  ;;  %v360_v26 = vld [vmem:[#allocation4 + $0x170] sm:$0xff]  ;;  %v363_v28 = vld [vmem:[#allocation4 + $0x188] sm:$0xff] }
  0x81   :  { %273 = vmatprep.mubr.f32.mxu1 %v4859_v0  ;;  %3096 = vmatpush1.bf16.msra.mxu1 %v5100_v36  ;;  %v5186_v27 = vpack.c.bf16 %v360_v26, %v358_v25  ;;  %v365_v31 = vld [vmem:[#allocation4 + $0x198] sm:$0xff]  ;;  %v362_v33 = vld [vmem:[#allocation4 + $0x180] sm:$0xff]  ;;  %v364_v34 = vld [vmem:[#allocation4 + $0x190] sm:$0xff] }
  0x82   :  { %3098 = vmatprep.subr.bf16.mxu1 %v5103_v37  ;;  %v5192_v32 = vpack.c.bf16 %v365_v31, %v363_v28  ;;  %v5194_v35 = vpack.c.bf16 %v364_v34, %v362_v33  ;;  %v367_v38 = vld [vmem:[#allocation4 + $0x1a8] sm:$0xff]  ;;  %v369_v39 = vld [vmem:[#allocation4 + $0x1b8] sm:$0xff]  ;;  %v370_v48 = vld [vmem:[#allocation4 + $0x1c0] sm:$0xff] }
  0x83   :  { %3164 = vmatpush1.bf16.msra.mxu0 %v5113_v41  ;;  %v371_v45 = vld [vmem:[#allocation4 + $0x1c8] sm:$0xff]  ;;  %v373_v46 = vld [vmem:[#allocation4 + $0x1d8] sm:$0xff]  ;;  %v372_v51 = vld [vmem:[#allocation4 + $0x1d0] sm:$0xff] }
  0x84   :  { %2961 = vmatmul.mubr.msk.f32.gmra.mrb[8].mxu1 %vm153_vm3, %v133_v40  ;;  %3166 = vmatprep.subr.bf16.mxu0 %v5136_v47  ;;  %v5200_v40 = vpack.c.bf16 %v369_v39, %v367_v38  ;;  %v5207_v49 = vpack.c.bf16 %v373_v46, %v371_v45  ;;  %v375_v52 = vld [vmem:[#allocation4 + $0x1e8] sm:$0xff]  ;;  %v377_v54 = vld [vmem:[#allocation4 + $0x1f8] sm:$0xff]  ;;  %v5210_v55 = vpack.c.bf16 %v372_v51, %v370_v48  ;;  %v374_v58 = vld [vmem:[#allocation4 + $0x1e0] sm:$0xff] }
  0x85   :  { %279 = vmatprep.mubr.f32.mxu1 %v4859_v0  ;;  %3100 = vmatpush1.bf16.msra.mxu1 %v5113_v41  ;;  %v5212_v57 = vpack.c.bf16 %v377_v54, %v375_v52  ;;  %v376_v60 = vld [vmem:[#allocation4 + $0x1f0] sm:$0xff]  ;;  %v141_v3 = vld [vmem:[%s6333_s3] sm:$0x3] }
  0x86   :  { %3102 = vmatprep.subr.bf16.mxu1 %v5136_v47  ;;  %v5217_v61 = vpack.c.bf16 %v376_v60, %v374_v58 }
  0x87   :  { %3168 = vmatpush1.bf16.msra.mxu0 %v5138_v50 }
  0x88   :  { %2962 = vmatmul.mubr.msk.f32.gmra.mrb[10].mxu1 %vm153_vm3, %v134_v42  ;;  %3170 = vmatprep.subr.bf16.mxu0 %v5144_v53  ;;  %v366_v42 = vld [vmem:[#allocation4 + $0x1a0] sm:$0xff] }
  0x89   :  { %285 = vmatprep.mubr.f32.mxu1 %v4859_v0  ;;  %3104 = vmatpush1.bf16.msra.mxu1 %v5138_v50 }
  0x8a   :  { %3106 = vmatprep.subr.bf16.mxu1 %v5144_v53 }
  0x8b   :  { %3172 = vmatpush1.bf16.msra.mxu0 %v5146_v56 }
  0x8c   :  { %2963 = vmatmul.mubr.msk.f32.gmra.mrb[12].mxu1 %vm153_vm3, %v135_v43  ;;  %3174 = vmatprep.subr.bf16.mxu0 %v5152_v59  ;;  %v368_v43 = vld [vmem:[#allocation4 + $0x1b0] sm:$0xff] }
  0x8d   :  { %291 = vmatprep.mubr.f32.mxu1 %v4859_v0  ;;  %3108 = vmatpush1.bf16.msra.mxu1 %v5146_v56  ;;  %v349_v0 = vld [vmem:[#allocation4 + $0x118] sm:$0xff] }
  0x8e   :  { %3110 = vmatprep.subr.bf16.mxu1 %v5152_v59  ;;  %v5160_v1 = vpack.c.bf16 %v349_v0, %v347_v63  ;;  %v143_v63 = vlaneseq }
  0x8f   :  { %3176 = vmatpush1.bf16.msra.mxu0 %v5154_v62 }
  0x90   :  { %2964 = vmatmul.mubr.msk.f32.gmra.mrb[14].mxu1 %vm153_vm3, %v136_v44  ;;  %3178 = vmatprep.subr.bf16.mxu0 %v5160_v1  ;;  %v5202_v44 = vpack.c.bf16 %v368_v43, %v366_v42  ;;  %v144_v0 = vshrl.u32 %v143_v63, 7 }
  0x91   :  { %3112 = vmatpush1.bf16.msra.mxu1 %v5154_v62 }
  0x92   :  { %3114 = vmatprep.subr.bf16.mxu1 %v5160_v1  ;;  %v5226_v2 = vsub.s32 1, %v144_v0  ;;  %v5232_v6 = vsub.s32 0, %v144_v0 }
  0x93   :  { %3180 = vmatpush1.bf16.msra.mxu0 %v5162_v4 }
  0x94   :  { %3182 = vmatprep.subr.bf16.mxu0 %v5168_v7  ;;  %v150_v5 = vrot.slane %v141_v3, %v5226_v2  ;;  %v146_v13 = vrot.slane %v141_v3, %v5232_v6 }
  0x95   :  { %3116 = vmatpush1.bf16.msra.mxu1 %v5162_v4 }
  0x96   :  { %3118 = vmatprep.subr.bf16.mxu1 %v5168_v7 }
  0x97   :  { %3184 = vmatpush1.bf16.msra.mxu0 %v5170_v10 }
  0x98   :  { %3186 = vmatprep.subr.bf16.mxu0 %v5176_v14 }
  0x99   :  { %3120 = vmatpush1.bf16.msra.mxu1 %v5170_v10 }
  0x9a   :  { %3122 = vmatprep.subr.bf16.mxu1 %v5176_v14 }
  0x9b   :  { %3188 = vmatpush1.bf16.msra.mxu0 %v5178_v19 }
  0x9c   :  { %3190 = vmatprep.subr.bf16.mxu0 %v5184_v24 }
  0x9d   :  { %3124 = vmatpush1.bf16.msra.mxu1 %v5178_v19 }
  0x9e   :  { %3126 = vmatprep.subr.bf16.mxu1 %v5184_v24 }
  0x9f   :  { %3192 = vmatpush1.bf16.msra.mxu0 %v5186_v27 }
  0xa0   :  { %3194 = vmatprep.subr.bf16.mxu0 %v5192_v32 }
  0xa1   :  { %3128 = vmatpush1.bf16.msra.mxu1 %v5186_v27 }
  0xa2   :  { %3130 = vmatprep.subr.bf16.mxu1 %v5192_v32 }
  0xa3   :  { %3196 = vmatpush1.bf16.msra.mxu0 %v5194_v35 }
  0xa4   :  { %3198 = vmatprep.subr.bf16.mxu0 %v5200_v40 }
  0xa5   :  { %3132 = vmatpush1.bf16.msra.mxu1 %v5194_v35 }
  0xa6   :  { %3134 = vmatprep.subr.bf16.mxu1 %v5200_v40 }
  0xa7   :  { %3200 = vmatpush1.bf16.msra.mxu0 %v5202_v44 }
  0xa8   :  { %3202 = vmatprep.subr.bf16.mxu0 %v5207_v49 }
  0xa9   :  { %3136 = vmatpush1.bf16.msra.mxu1 %v5202_v44 }
  0xaa   :  { %3138 = vmatprep.subr.bf16.mxu1 %v5207_v49 }
  0xab   :  { %3204 = vmatpush1.bf16.msra.mxu0 %v5210_v55 }
  0xac   :  { %3206 = vmatprep.subr.bf16.mxu0 %v5212_v57 }
  0xad   :  { %3140 = vmatpush1.bf16.msra.mxu1 %v5210_v55 }
  0xae   :  { %3142 = vmatprep.subr.bf16.mxu1 %v5212_v57 }
  0xaf   :  { %3208 = vmatpush1.bf16.msra.mxu0 %v5217_v61 }
  0xb0   :  { %3274 = vmatprep.subr.bf16.mxu0 %v5060_v11 }
  0xb1   :  { %3144 = vmatpush1.bf16.msra.mxu1 %v5217_v61 }
  0xb2   :  { %3210 = vmatprep.subr.bf16.mxu1 %v5060_v11 }
 0x147   :  { %v251_v8 = vpop.f32.mrb[0].mxu1 }
 0x148   :  { %v253_v9 = vpop.f32.mrb[1].mxu1 }
 0x149   :  { %v5234_v12 = vadd.f32 %v253_v9, %v150_v5  ;;  %v252_v9 = vadd.f32 %v251_v8, %v146_v13 }
 0x14b   :  { %v257_v17 = vpop.f32.mrb[2].mxu1 }
 0x14c   :  { %v5237_v18 = vadd.f32 %v257_v17, %v146_v13  ;;  %v259_v20 = vpop.f32.mrb[3].mxu1 }
 0x14d   :  { %v5239_v21 = vadd.f32 %v259_v20, %v150_v5 }
 0x14f   :  { %v263_v25 = vpop.f32.mrb[4].mxu1 }
 0x150   :  { %v5241_v26 = vadd.f32 %v263_v25, %v146_v13  ;;  %v265_v28 = vpop.f32.mrb[5].mxu1 }
 0x151   :  { %v5243_v31 = vadd.f32 %v265_v28, %v150_v5 }
 0x153   :  { %v269_v33 = vpop.f32.mrb[6].mxu1 }
 0x154   :  { %v5245_v34 = vadd.f32 %v269_v33, %v146_v13  ;;  %v271_v38 = vpop.f32.mrb[7].mxu1 }
 0x155   :  { %v5247_v39 = vadd.f32 %v271_v38, %v150_v5 }
 0x157   :  { %v275_v42 = vpop.f32.mrb[8].mxu1 }
 0x158   :  { %v5249_v43 = vadd.f32 %v275_v42, %v146_v13  ;;  %v277_v45 = vpop.f32.mrb[9].mxu1 }
 0x159   :  { %v5251_v46 = vadd.f32 %v277_v45, %v150_v5 }
 0x15b   :  { %v281_v48 = vpop.f32.mrb[10].mxu1 }
 0x15c   :  { %v5253_v51 = vadd.f32 %v281_v48, %v146_v13  ;;  %v283_v52 = vpop.f32.mrb[11].mxu1 }
 0x15d   :  { %v5255_v54 = vadd.f32 %v283_v52, %v150_v5 }
 0x15f   :  { %v287_v58 = vpop.f32.mrb[12].mxu1 }
 0x160   :  { %v5257_v60 = vadd.f32 %v287_v58, %v146_v13  ;;  %v289_v63 = vpop.f32.mrb[13].mxu1 }
 0x161   :  { %v290_v0 = vadd.f32 %v289_v63, %v150_v5 }
 0x163   :  { %v293_v3 = vpop.f32.mrb[14].mxu1 }
 0x164   :  { %v5259_v17 = vadd.f32 %v293_v3, %v146_v13  ;;  %v295_v20 = vpop.f32.mrb[15].mxu1 }
 0x165   :  { %v296_v25 = vadd.f32 %v295_v20, %v150_v5 }
 0x167   :  { %4613 = vtanh.f32 %v296_v25 }
 0x168   :  { %4615 = vtanh.f32 %v252_v9 }
 0x171   :  { %v5261_v28 = vpop.eup %4613 }
 0x172   :  { %v5263_v33 = vpop.eup %4615  ;;  %450 = vmatprep.mubr.f32.mxu1 %v5261_v28 }
 0x173   :  { %451 = vmatmul.mubr.f32.vlgmr.msra.gmra.mrb[16].mxu1 %v5263_v33 }
 0x174   :  { %3212 = vmatpush1.bf16.msra.mxu1 %v5062_v15 }
 0x175   :  { %3214 = vmatprep.subr.bf16.mxu1 %v5064_v16 }
 0x178   :  { %3216 = vmatpush1.bf16.msra.mxu1 %v5073_v22 }
 0x179   :  { %3218 = vmatprep.subr.bf16.mxu1 %v5076_v23 }
 0x17c   :  { %3220 = vmatpush1.bf16.msra.mxu1 %v5087_v29 }
 0x17d   :  { %3222 = vmatprep.subr.bf16.mxu1 %v5090_v30 }
 0x180   :  { %3224 = vmatpush1.bf16.msra.mxu1 %v5100_v36 }
 0x181   :  { %3226 = vmatprep.subr.bf16.mxu1 %v5103_v37 }
 0x184   :  { %3228 = vmatpush1.bf16.msra.mxu1 %v5113_v41 }
 0x185   :  { %3230 = vmatprep.subr.bf16.mxu1 %v5136_v47 }
 0x188   :  { %3232 = vmatpush1.bf16.msra.mxu1 %v5138_v50 }
 0x189   :  { %3234 = vmatprep.subr.bf16.mxu1 %v5144_v53 }
 0x18c   :  { %3236 = vmatpush1.bf16.msra.mxu1 %v5146_v56 }
 0x18d   :  { %3238 = vmatprep.subr.bf16.mxu1 %v5152_v59 }
 0x190   :  { %3240 = vmatpush1.bf16.msra.mxu1 %v5154_v62 }
 0x191   :  { %3242 = vmatprep.subr.bf16.mxu1 %v5160_v1 }
 0x194   :  { %3244 = vmatpush1.bf16.msra.mxu1 %v5162_v4 }
 0x195   :  { %3246 = vmatprep.subr.bf16.mxu1 %v5168_v7 }
 0x198   :  { %3248 = vmatpush1.bf16.msra.mxu1 %v5170_v10 }
 0x199   :  { %3250 = vmatprep.subr.bf16.mxu1 %v5176_v14 }
 0x19c   :  { %3252 = vmatpush1.bf16.msra.mxu1 %v5178_v19 }
 0x19d   :  { %3254 = vmatprep.subr.bf16.mxu1 %v5184_v24 }
 0x1a0   :  { %3256 = vmatpush1.bf16.msra.mxu1 %v5186_v27 }
 0x1a1   :  { %3258 = vmatprep.subr.bf16.mxu1 %v5192_v32 }
 0x1a4   :  { %3260 = vmatpush1.bf16.msra.mxu1 %v5194_v35 }
 0x1a5   :  { %3262 = vmatprep.subr.bf16.mxu1 %v5200_v40 }
 0x1a8   :  { %3264 = vmatpush1.bf16.msra.mxu1 %v5202_v44 }
 0x1a9   :  { %3266 = vmatprep.subr.bf16.mxu1 %v5207_v49 }
 0x1ac   :  { %3268 = vmatpush1.bf16.msra.mxu1 %v5210_v55 }
 0x1ad   :  { %3270 = vmatprep.subr.bf16.mxu1 %v5212_v57 }
 0x1b0   :  { %3272 = vmatpush1.bf16.msra.mxu1 %v5217_v61 }
 0x1b1   :  { %3338 = vmatprep.subr.bf16.mxu1 %v5060_v11 }
 0x246   :  { %v452_v5 = vpop.f32.mrb[16].mxu1 }
 0x247   :  { %v457_v8 = vadd.f32 %v452_v5, %v5237_v18  ;;  %v454_v13 = vpop.f32.mrb[17].mxu1 }
 0x248   :  { %v458_v38 = vadd.f32 %v454_v13, %v290_v0 }
 0x24a   :  { %4617 = vtanh.f32 %v458_v38  ;;  %v974_v38 = vld [vmem:[#allocation6 + $0xa8] sm:$0xff] }
 0x24b   :  { %4619 = vtanh.f32 %v457_v8 }
 0x254   :  { %v5300_v42 = vpop.eup %4617 }
 0x255   :  { %v5302_v45 = vpop.eup %4619  ;;  %529 = vmatprep.mubr.f32.mxu0 %v5300_v42 }
 0x256   :  { %530 = vmatmul.mubr.f32.vlgmr.msra.gmra.mrb[0].mxu0 %v5302_v45 }
 0x257   :  { %3276 = vmatpush1.bf16.msra.mxu0 %v5062_v15 }
 0x258   :  { %3278 = vmatprep.subr.bf16.mxu0 %v5064_v16 }
 0x25b   :  { %3280 = vmatpush1.bf16.msra.mxu0 %v5073_v22 }
 0x25c   :  { %3282 = vmatprep.subr.bf16.mxu0 %v5076_v23 }
 0x25f   :  { %3284 = vmatpush1.bf16.msra.mxu0 %v5087_v29 }
 0x260   :  { %3286 = vmatprep.subr.bf16.mxu0 %v5090_v30 }
 0x263   :  { %3288 = vmatpush1.bf16.msra.mxu0 %v5100_v36 }
 0x264   :  { %3290 = vmatprep.subr.bf16.mxu0 %v5103_v37 }
 0x267   :  { %3292 = vmatpush1.bf16.msra.mxu0 %v5113_v41 }
 0x268   :  { %3294 = vmatprep.subr.bf16.mxu0 %v5136_v47 }
 0x26b   :  { %3296 = vmatpush1.bf16.msra.mxu0 %v5138_v50 }
 0x26c   :  { %3298 = vmatprep.subr.bf16.mxu0 %v5144_v53 }
 0x26f   :  { %3300 = vmatpush1.bf16.msra.mxu0 %v5146_v56 }
 0x270   :  { %3302 = vmatprep.subr.bf16.mxu0 %v5152_v59 }
 0x273   :  { %3304 = vmatpush1.bf16.msra.mxu0 %v5154_v62 }
 0x274   :  { %3306 = vmatprep.subr.bf16.mxu0 %v5160_v1 }
 0x277   :  { %3308 = vmatpush1.bf16.msra.mxu0 %v5162_v4 }
 0x278   :  { %3310 = vmatprep.subr.bf16.mxu0 %v5168_v7 }
 0x27b   :  { %3312 = vmatpush1.bf16.msra.mxu0 %v5170_v10 }
 0x27c   :  { %3314 = vmatprep.subr.bf16.mxu0 %v5176_v14 }
 0x27f   :  { %3316 = vmatpush1.bf16.msra.mxu0 %v5178_v19 }
 0x280   :  { %3318 = vmatprep.subr.bf16.mxu0 %v5184_v24 }
 0x283   :  { %3320 = vmatpush1.bf16.msra.mxu0 %v5186_v27 }
 0x284   :  { %3322 = vmatprep.subr.bf16.mxu0 %v5192_v32 }
 0x287   :  { %3324 = vmatpush1.bf16.msra.mxu0 %v5194_v35 }
 0x288   :  { %3326 = vmatprep.subr.bf16.mxu0 %v5200_v40 }
 0x28b   :  { %3328 = vmatpush1.bf16.msra.mxu0 %v5202_v44 }
 0x28c   :  { %3330 = vmatprep.subr.bf16.mxu0 %v5207_v49 }
 0x28f   :  { %3332 = vmatpush1.bf16.msra.mxu0 %v5210_v55 }
 0x290   :  { %3334 = vmatprep.subr.bf16.mxu0 %v5212_v57 }
 0x293   :  { %3336 = vmatpush1.bf16.msra.mxu0 %v5217_v61 }
 0x294   :  { %3402 = vmatprep.subr.bf16.mxu0 %v5060_v11 }
 0x329   :  { %v531_v18 = vpop.f32.mrb[0].mxu0 }
 0x32a   :  { %v536_v48 = vadd.f32 %v531_v18, %v5241_v26  ;;  %v533_v52 = vpop.f32.mrb[1].mxu0  ;;  %v976_v18 = vld [vmem:[#allocation6 + $0xb8] sm:$0xff] }
 0x32b   :  { %v537_v58 = vadd.f32 %v533_v52, %v5255_v54  ;;  %v3549_v52 = vpack.c.bf16 %v976_v18, %v974_v38 }
 0x32d   :  { %4621 = vtanh.f32 %v537_v58  ;;  %v973_v58 = vld [vmem:[#allocation6 + $0xa0] sm:$0xff] }
 0x32e   :  { %4623 = vtanh.f32 %v536_v48 }
 0x337   :  { %v5340_v63 = vpop.eup %4621 }
 0x338   :  { %v5342_v0 = vpop.eup %4623  ;;  %608 = vmatprep.mubr.f32.mxu1 %v5340_v63 }
 0x339   :  { %609 = vmatmul.mubr.f32.vlgmr.msra.gmra.mrb[18].mxu1 %v5342_v0 }
 0x33a   :  { %3340 = vmatpush1.bf16.msra.mxu1 %v5062_v15 }
 0x33b   :  { %3342 = vmatprep.subr.bf16.mxu1 %v5064_v16 }
 0x33e   :  { %3344 = vmatpush1.bf16.msra.mxu1 %v5073_v22 }
 0x33f   :  { %3346 = vmatprep.subr.bf16.mxu1 %v5076_v23 }
 0x342   :  { %3348 = vmatpush1.bf16.msra.mxu1 %v5087_v29 }
 0x343   :  { %3350 = vmatprep.subr.bf16.mxu1 %v5090_v30 }
 0x346   :  { %3352 = vmatpush1.bf16.msra.mxu1 %v5100_v36 }
 0x347   :  { %3354 = vmatprep.subr.bf16.mxu1 %v5103_v37 }
 0x34a   :  { %3356 = vmatpush1.bf16.msra.mxu1 %v5113_v41 }
 0x34b   :  { %3358 = vmatprep.subr.bf16.mxu1 %v5136_v47 }
 0x34e   :  { %3360 = vmatpush1.bf16.msra.mxu1 %v5138_v50 }
 0x34f   :  { %3362 = vmatprep.subr.bf16.mxu1 %v5144_v53 }
 0x352   :  { %3364 = vmatpush1.bf16.msra.mxu1 %v5146_v56 }
 0x353   :  { %3366 = vmatprep.subr.bf16.mxu1 %v5152_v59 }
 0x356   :  { %3368 = vmatpush1.bf16.msra.mxu1 %v5154_v62 }
 0x357   :  { %3370 = vmatprep.subr.bf16.mxu1 %v5160_v1 }
 0x35a   :  { %3372 = vmatpush1.bf16.msra.mxu1 %v5162_v4 }
 0x35b   :  { %3374 = vmatprep.subr.bf16.mxu1 %v5168_v7 }
 0x35e   :  { %3376 = vmatpush1.bf16.msra.mxu1 %v5170_v10 }
 0x35f   :  { %3378 = vmatprep.subr.bf16.mxu1 %v5176_v14 }
 0x362   :  { %3380 = vmatpush1.bf16.msra.mxu1 %v5178_v19 }
 0x363   :  { %3382 = vmatprep.subr.bf16.mxu1 %v5184_v24 }
 0x366   :  { %3384 = vmatpush1.bf16.msra.mxu1 %v5186_v27 }
 0x367   :  { %3386 = vmatprep.subr.bf16.mxu1 %v5192_v32 }
 0x36a   :  { %3388 = vmatpush1.bf16.msra.mxu1 %v5194_v35 }
 0x36b   :  { %3390 = vmatprep.subr.bf16.mxu1 %v5200_v40 }
 0x36e   :  { %3392 = vmatpush1.bf16.msra.mxu1 %v5202_v44 }
 0x36f   :  { %3394 = vmatprep.subr.bf16.mxu1 %v5207_v49 }
 0x372   :  { %3396 = vmatpush1.bf16.msra.mxu1 %v5210_v55 }
 0x373   :  { %3398 = vmatprep.subr.bf16.mxu1 %v5212_v57 }
 0x376   :  { %3400 = vmatpush1.bf16.msra.mxu1 %v5217_v61 }
 0x377   :  { %3466 = vmatprep.subr.bf16.mxu1 %v5060_v11 }
 0x40c   :  { %v610_v26 = vpop.f32.mrb[18].mxu1 }
 0x40d   :  { %v615_v54 = vadd.f32 %v610_v26, %v5245_v34  ;;  %v612_v3 = vpop.f32.mrb[19].mxu1  ;;  %v975_v26 = vld [vmem:[#allocation6 + $0xb0] sm:$0xff] }
 0x40e   :  { %v616_v9 = vadd.f32 %v612_v3, %v5251_v46  ;;  %v980_v3 = vld [vmem:[#allocation6 + $0xd8] sm:$0xff] }
 0x410   :  { %4625 = vtanh.f32 %v616_v9  ;;  %v3551_v9 = vpack.c.bf16 %v975_v26, %v973_v58  ;;  %v1004_v58 = vld [vmem:[#allocation6 + $0x198] sm:$0xff] }
 0x411   :  { %4627 = vtanh.f32 %v615_v54  ;;  %v978_v54 = vld [vmem:[#allocation6 + $0xc8] sm:$0xff] }
 0x41a   :  { %v5380_v20 = vpop.eup %4625 }
 0x41b   :  { %v5382_v25 = vpop.eup %4627  ;;  %687 = vmatprep.mubr.f32.mxu0 %v5380_v20 }
 0x41c   :  { %688 = vmatmul.mubr.f32.vlgmr.msra.gmra.mrb[2].mxu0 %v5382_v25 }
 0x41d   :  { %3404 = vmatpush1.bf16.msra.mxu0 %v5062_v15 }
 0x41e   :  { %3406 = vmatprep.subr.bf16.mxu0 %v5064_v16 }
 0x421   :  { %3408 = vmatpush1.bf16.msra.mxu0 %v5073_v22 }
 0x422   :  { %3410 = vmatprep.subr.bf16.mxu0 %v5076_v23 }
 0x425   :  { %3412 = vmatpush1.bf16.msra.mxu0 %v5087_v29 }
 0x426   :  { %3414 = vmatprep.subr.bf16.mxu0 %v5090_v30 }
 0x429   :  { %3416 = vmatpush1.bf16.msra.mxu0 %v5100_v36 }
 0x42a   :  { %3418 = vmatprep.subr.bf16.mxu0 %v5103_v37 }
 0x42d   :  { %3420 = vmatpush1.bf16.msra.mxu0 %v5113_v41 }
 0x42e   :  { %3422 = vmatprep.subr.bf16.mxu0 %v5136_v47 }
 0x431   :  { %3424 = vmatpush1.bf16.msra.mxu0 %v5138_v50 }
 0x432   :  { %3426 = vmatprep.subr.bf16.mxu0 %v5144_v53 }
 0x435   :  { %3428 = vmatpush1.bf16.msra.mxu0 %v5146_v56 }
 0x436   :  { %3430 = vmatprep.subr.bf16.mxu0 %v5152_v59 }
 0x439   :  { %3432 = vmatpush1.bf16.msra.mxu0 %v5154_v62 }
 0x43a   :  { %3434 = vmatprep.subr.bf16.mxu0 %v5160_v1 }
 0x43d   :  { %3436 = vmatpush1.bf16.msra.mxu0 %v5162_v4 }
 0x43e   :  { %3438 = vmatprep.subr.bf16.mxu0 %v5168_v7 }
 0x441   :  { %3440 = vmatpush1.bf16.msra.mxu0 %v5170_v10 }
 0x442   :  { %3442 = vmatprep.subr.bf16.mxu0 %v5176_v14 }
 0x445   :  { %3444 = vmatpush1.bf16.msra.mxu0 %v5178_v19 }
 0x446   :  { %3446 = vmatprep.subr.bf16.mxu0 %v5184_v24 }
 0x449   :  { %3448 = vmatpush1.bf16.msra.mxu0 %v5186_v27 }
 0x44a   :  { %3450 = vmatprep.subr.bf16.mxu0 %v5192_v32 }
 0x44d   :  { %3452 = vmatpush1.bf16.msra.mxu0 %v5194_v35 }
 0x44e   :  { %3454 = vmatprep.subr.bf16.mxu0 %v5200_v40 }
 0x451   :  { %3456 = vmatpush1.bf16.msra.mxu0 %v5202_v44 }
 0x452   :  { %3458 = vmatprep.subr.bf16.mxu0 %v5207_v49 }
 0x455   :  { %3460 = vmatpush1.bf16.msra.mxu0 %v5210_v55 }
 0x456   :  { %3462 = vmatprep.subr.bf16.mxu0 %v5212_v57 }
 0x459   :  { %3464 = vmatpush1.bf16.msra.mxu0 %v5217_v61 }
 0x4ef   :  { %v689_v11 = vpop.f32.mrb[2].mxu0 }
 0x4f0   :  { %v694_v34 = vadd.f32 %v689_v11, %v5249_v43  ;;  %v691_v46 = vpop.f32.mrb[3].mxu0  ;;  %v969_v43 = vld [vmem:[#allocation6 + $0x80] sm:$0xff]  ;;  %v3553_v11 = vpack.c.bf16 %v980_v3, %v978_v54  ;;  %v1003_v3 = vld [vmem:[#allocation6 + $0x190] sm:$0xff] }
 0x4f1   :  { %v695_v5 = vadd.f32 %v691_v46, %v5247_v39  ;;  %v979_v46 = vld [vmem:[#allocation6 + $0xd0] sm:$0xff]  ;;  %v1001_v54 = vld [vmem:[#allocation6 + $0x180] sm:$0xff] }
 0x4f3   :  { %4629 = vtanh.f32 %v695_v5  ;;  %v982_v5 = vld [vmem:[#allocation6 + $0xe8] sm:$0xff] }
 0x4f4   :  { %4631 = vtanh.f32 %v694_v34  ;;  %v977_v34 = vld [vmem:[#allocation6 + $0xc0] sm:$0xff] }
 0x4fd   :  { %v5419_v8 = vpop.eup %4629 }
 0x4fe   :  { %v5421_v13 = vpop.eup %4631  ;;  %766 = vmatprep.mubr.f32.mxu1 %v5419_v8 }
 0x4ff   :  { %767 = vmatmul.mubr.f32.vlgmr.msra.gmra.mrb[20].mxu1 %v5421_v13 }
 0x500   :  { %3468 = vmatpush1.bf16.msra.mxu1 %v5062_v15 }
 0x501   :  { %3470 = vmatprep.subr.bf16.mxu1 %v5064_v16 }
 0x504   :  { %3472 = vmatpush1.bf16.msra.mxu1 %v5073_v22 }
 0x505   :  { %3474 = vmatprep.subr.bf16.mxu1 %v5076_v23 }
 0x508   :  { %3476 = vmatpush1.bf16.msra.mxu1 %v5087_v29 }
 0x509   :  { %3478 = vmatprep.subr.bf16.mxu1 %v5090_v30 }
 0x50c   :  { %3480 = vmatpush1.bf16.msra.mxu1 %v5100_v36  ;;  %v954_v36 = vld [vmem:[#allocation6 + $0x8] sm:$0xff] }
 0x50d   :  { %3482 = vmatprep.subr.bf16.mxu1 %v5103_v37  ;;  %v956_v37 = vld [vmem:[#allocation6 + $0x18] sm:$0xff] }
 0x510   :  { %3484 = vmatpush1.bf16.msra.mxu1 %v5113_v41  ;;  %v953_v41 = vld [vmem:[#allocation6] sm:$0xff] }
 0x511   :  { %3486 = vmatprep.subr.bf16.mxu1 %v5136_v47  ;;  %v3529_v47 = vpack.c.bf16 %v956_v37, %v954_v36  ;;  %v983_v36 = vld [vmem:[#allocation6 + $0xf0] sm:$0xff]  ;;  %v986_v37 = vld [vmem:[#allocation6 + $0x108] sm:$0xff] }
 0x513   :  { %3530 = vmatprep.subr.bf16.mxu0 %v3529_v47 }
 0x514   :  { %3488 = vmatpush1.bf16.msra.mxu1 %v5138_v50  ;;  %v955_v50 = vld [vmem:[#allocation6 + $0x10] sm:$0xff] }
 0x515   :  { %3490 = vmatprep.subr.bf16.mxu1 %v5144_v53  ;;  %v958_v53 = vld [vmem:[#allocation6 + $0x28] sm:$0xff] }
 0x518   :  { %3492 = vmatpush1.bf16.msra.mxu1 %v5146_v56  ;;  %v960_v56 = vld [vmem:[#allocation6 + $0x38] sm:$0xff] }
 0x519   :  { %3494 = vmatprep.subr.bf16.mxu1 %v5152_v59  ;;  %v3531_v59 = vpack.c.bf16 %v955_v50, %v953_v41  ;;  %v988_v41 = vld [vmem:[#allocation6 + $0x118] sm:$0xff] }
 0x51a   :  { %v3561_v50 = vpack.c.bf16 %v988_v41, %v986_v37  ;;  %v1014_v37 = vld [vmem:[#allocation6 + $0x1e8] sm:$0xff]  ;;  %v1016_v41 = vld [vmem:[#allocation6 + $0x1f8] sm:$0xff] }
 0x51c   :  { %3496 = vmatpush1.bf16.msra.mxu1 %v5154_v62  ;;  %v3533_v62 = vpack.c.bf16 %v960_v56, %v958_v53  ;;  %v985_v53 = vld [vmem:[#allocation6 + $0x100] sm:$0xff]  ;;  %v987_v56 = vld [vmem:[#allocation6 + $0x110] sm:$0xff] }
 0x51d   :  { %3498 = vmatprep.subr.bf16.mxu1 %v5160_v1  ;;  %v957_v1 = vld [vmem:[#allocation6 + $0x20] sm:$0xff] }
 0x520   :  { %3500 = vmatpush1.bf16.msra.mxu1 %v5162_v4  ;;  %v959_v4 = vld [vmem:[#allocation6 + $0x30] sm:$0xff] }
 0x521   :  { %3502 = vmatprep.subr.bf16.mxu1 %v5168_v7  ;;  %v962_v7 = vld [vmem:[#allocation6 + $0x48] sm:$0xff] }
 0x524   :  { %3504 = vmatpush1.bf16.msra.mxu1 %v5170_v10  ;;  %v964_v10 = vld [vmem:[#allocation6 + $0x58] sm:$0xff] }
 0x525   :  { %3506 = vmatprep.subr.bf16.mxu1 %v5176_v14  ;;  %v3535_v14 = vpack.c.bf16 %v959_v4, %v957_v1  ;;  %v3563_v1 = vpack.c.bf16 %v987_v56, %v985_v53  ;;  %v1013_v53 = vld [vmem:[#allocation6 + $0x1e0] sm:$0xff]  ;;  %v1015_v56 = vld [vmem:[#allocation6 + $0x1f0] sm:$0xff] }
 0x528   :  { %3508 = vmatpush1.bf16.msra.mxu1 %v5178_v19  ;;  %v3537_v19 = vpack.c.bf16 %v964_v10, %v962_v7  ;;  %v989_v7 = vld [vmem:[#allocation6 + $0x120] sm:$0xff]  ;;  %v991_v10 = vld [vmem:[#allocation6 + $0x130] sm:$0xff] }
 0x529   :  { %3510 = vmatprep.subr.bf16.mxu1 %v5184_v24  ;;  %v961_v24 = vld [vmem:[#allocation6 + $0x40] sm:$0xff] }
 0x52c   :  { %3512 = vmatpush1.bf16.msra.mxu1 %v5186_v27  ;;  %v963_v27 = vld [vmem:[#allocation6 + $0x50] sm:$0xff] }
 0x52d   :  { %3514 = vmatprep.subr.bf16.mxu1 %v5192_v32  ;;  %v966_v32 = vld [vmem:[#allocation6 + $0x68] sm:$0xff] }
 0x530   :  { %3516 = vmatpush1.bf16.msra.mxu1 %v5194_v35  ;;  %v968_v35 = vld [vmem:[#allocation6 + $0x78] sm:$0xff] }
 0x531   :  { %3518 = vmatprep.subr.bf16.mxu1 %v5200_v40  ;;  %v3539_v40 = vpack.c.bf16 %v963_v27, %v961_v24  ;;  %v3567_v24 = vpack.c.bf16 %v991_v10, %v989_v7  ;;  %v1160_v10 = vld [vmem:[#allocation8 + $0x10] sm:$0xff] }
 0x534   :  { %3520 = vmatpush1.bf16.msra.mxu1 %v5202_v44  ;;  %v3541_v44 = vpack.c.bf16 %v968_v35, %v966_v32  ;;  %v993_v32 = vld [vmem:[#allocation6 + $0x140] sm:$0xff]  ;;  %v995_v35 = vld [vmem:[#allocation6 + $0x150] sm:$0xff] }
 0x535   :  { %3522 = vmatprep.subr.bf16.mxu1 %v5207_v49  ;;  %v965_v49 = vld [vmem:[#allocation6 + $0x60] sm:$0xff] }
 0x538   :  { %3524 = vmatpush1.bf16.msra.mxu1 %v5210_v55  ;;  %v967_v55 = vld [vmem:[#allocation6 + $0x70] sm:$0xff] }
 0x539   :  { %3526 = vmatprep.subr.bf16.mxu1 %v5212_v57  ;;  %v970_v57 = vld [vmem:[#allocation6 + $0x88] sm:$0xff] }
 0x53c   :  { %3528 = vmatpush1.bf16.msra.mxu1 %v5217_v61  ;;  %v972_v61 = vld [vmem:[#allocation6 + $0x98] sm:$0xff] }
 0x53d   :  { %v3545_v39 = vpack.c.bf16 %v972_v61, %v970_v57  ;;  %v997_v57 = vld [vmem:[#allocation6 + $0x160] sm:$0xff]  ;;  %v999_v61 = vld [vmem:[#allocation6 + $0x170] sm:$0xff] }
 0x5d2   :  { %v768_v15 = vpop.f32.mrb[20].mxu1 }
 0x5d3   :  { %v773_v16 = vadd.f32 %v768_v15, %v5253_v51  ;;  %v770_v22 = vpop.f32.mrb[21].mxu1  ;;  %v971_v51 = vld [vmem:[#allocation6 + $0x90] sm:$0xff]  ;;  %v984_v15 = vld [vmem:[#allocation6 + $0xf8] sm:$0xff] }
 0x5d4   :  { %v774_v23 = vadd.f32 %v770_v22, %v5243_v31  ;;  %v3543_v31 = vpack.c.bf16 %v967_v55, %v965_v49  ;;  %v3547_v48 = vpack.c.bf16 %v971_v51, %v969_v43  ;;  %v3557_v22 = vpack.c.bf16 %v984_v15, %v982_v5  ;;  %v1010_v15 = vld [vmem:[#allocation6 + $0x1c8] sm:$0xff] }
 0x5d5   :  { %v3571_v49 = vpack.c.bf16 %v995_v35, %v993_v32  ;;  %v1162_v32 = vld [vmem:[#allocation8 + $0x20] sm:$0xff]  ;;  %v1164_v35 = vld [vmem:[#allocation8 + $0x30] sm:$0xff] }
 0x5d6   :  { %4633 = vtanh.f32 %v774_v23  ;;  %v981_v23 = vld [vmem:[#allocation6 + $0xe0] sm:$0xff] }
 0x5d7   :  { %4635 = vtanh.f32 %v773_v16  ;;  %v3555_v16 = vpack.c.bf16 %v979_v46, %v977_v34  ;;  %v3559_v47 = vpack.c.bf16 %v983_v36, %v981_v23  ;;  %v1005_v34 = vld [vmem:[#allocation6 + $0x1a0] sm:$0xff]  ;;  %v1007_v46 = vld [vmem:[#allocation6 + $0x1b0] sm:$0xff] }
 0x5d8   :  { %v3583_v5 = vpack.c.bf16 %v1007_v46, %v1005_v34  ;;  %v1011_v36 = vld [vmem:[#allocation6 + $0x1d0] sm:$0xff] }
 0x5e0   :  { %v5458_v29 = vpop.eup %4633 }
 0x5e1   :  { %v5460_v30 = vpop.eup %4635  ;;  %845 = vmatprep.mubr.f32.mxu0 %v5458_v29 }
 0x5e2   :  { %846 = vmatmul.mubr.f32.vlgmr.msra.gmra.mrb[4].mxu0 %v5460_v30 }
 0x5e3   :  { %3532 = vmatpush1.bf16.msra.mxu0 %v3531_v59  ;;  %v990_v59 = vld [vmem:[#allocation6 + $0x128] sm:$0xff] }
 0x5e4   :  { %3534 = vmatprep.subr.bf16.mxu0 %v3533_v62  ;;  %v992_v62 = vld [vmem:[#allocation6 + $0x138] sm:$0xff] }
 0x5e5   :  { %v3565_v4 = vpack.c.bf16 %v992_v62, %v990_v59  ;;  %v3591_v59 = vpack.c.bf16 %v1015_v56, %v1013_v53  ;;  %v1159_v62 = vld [vmem:[#allocation8 + $0x8] sm:$0xff] }
 0x5e6   :  { %v1195_v56 = vld [vmem:[#allocation8 + $0x128] sm:$0xff] }
 0x5e7   :  { %3536 = vmatpush1.bf16.msra.mxu0 %v3535_v14  ;;  %v994_v14 = vld [vmem:[#allocation6 + $0x148] sm:$0xff] }
 0x5e8   :  { %3538 = vmatprep.subr.bf16.mxu0 %v3537_v19  ;;  %v996_v19 = vld [vmem:[#allocation6 + $0x158] sm:$0xff] }
 0x5e9   :  { %v3569_v27 = vpack.c.bf16 %v996_v19, %v994_v14  ;;  %v1163_v14 = vld [vmem:[#allocation8 + $0x28] sm:$0xff]  ;;  %v1165_v19 = vld [vmem:[#allocation8 + $0x38] sm:$0xff] }
 0x5eb   :  { %3540 = vmatpush1.bf16.msra.mxu0 %v3539_v40  ;;  %v998_v40 = vld [vmem:[#allocation6 + $0x168] sm:$0xff] }
 0x5ec   :  { %3542 = vmatprep.subr.bf16.mxu0 %v3541_v44  ;;  %v1000_v44 = vld [vmem:[#allocation6 + $0x178] sm:$0xff] }
 0x5ed   :  { %v3573_v55 = vpack.c.bf16 %v1000_v44, %v998_v40  ;;  %v1167_v40 = vld [vmem:[#allocation8 + $0x48] sm:$0xff]  ;;  %v1169_v44 = vld [vmem:[#allocation8 + $0x58] sm:$0xff] }
 0x5ef   :  { %3544 = vmatpush1.bf16.msra.mxu0 %v3543_v31  ;;  %v3575_v31 = vpack.c.bf16 %v999_v61, %v997_v57  ;;  %v1166_v57 = vld [vmem:[#allocation8 + $0x40] sm:$0xff]  ;;  %v1168_v61 = vld [vmem:[#allocation8 + $0x50] sm:$0xff] }
 0x5f0   :  { %3546 = vmatprep.subr.bf16.mxu0 %v3545_v39 }
 0x5f3   :  { %3548 = vmatpush1.bf16.msra.mxu0 %v3547_v48 }
 0x5f4   :  { %3550 = vmatprep.subr.bf16.mxu0 %v3549_v52  ;;  %v1002_v52 = vld [vmem:[#allocation6 + $0x188] sm:$0xff] }
 0x5f5   :  { %v3577_v26 = vpack.c.bf16 %v1004_v58, %v1002_v52  ;;  %v1172_v52 = vld [vmem:[#allocation8 + $0x70] sm:$0xff]  ;;  %v1175_v58 = vld [vmem:[#allocation8 + $0x88] sm:$0xff] }
 0x5f7   :  { %3552 = vmatpush1.bf16.msra.mxu0 %v3551_v9  ;;  %v3579_v9 = vpack.c.bf16 %v1003_v3, %v1001_v54 }
 0x5f8   :  { %3554 = vmatprep.subr.bf16.mxu0 %v3553_v11 }
 0x5fb   :  { %3556 = vmatpush1.bf16.msra.mxu0 %v3555_v16  ;;  %v1012_v16 = vld [vmem:[#allocation6 + $0x1d8] sm:$0xff] }
 0x5fc   :  { %3558 = vmatprep.subr.bf16.mxu0 %v3557_v22  ;;  %v1009_v22 = vld [vmem:[#allocation6 + $0x1c0] sm:$0xff]  ;;  %v3585_v23 = vpack.c.bf16 %v1012_v16, %v1010_v15 }
 0x5fd   :  { %v1186_v16 = vld [vmem:[#allocation8 + $0xe0] sm:$0xff] }
 0x5ff   :  { %3560 = vmatpush1.bf16.msra.mxu0 %v3559_v47  ;;  %v3587_v47 = vpack.c.bf16 %v1011_v36, %v1009_v22  ;;  %v1188_v22 = vld [vmem:[#allocation8 + $0xf0] sm:$0xff]  ;;  %v1191_v36 = vld [vmem:[#allocation8 + $0x108] sm:$0xff] }
 0x600   :  { %3562 = vmatprep.subr.bf16.mxu0 %v3561_v50  ;;  %v3589_v50 = vpack.c.bf16 %v1016_v41, %v1014_v37  ;;  %v1193_v37 = vld [vmem:[#allocation8 + $0x118] sm:$0xff] }
 0x601   :  { %v5552_v41 = vpack.c.bf16 %v1193_v37, %v1191_v36  ;;  %v1220_v36 = vld [vmem:[#allocation8 + $0x1f0] sm:$0xff] }
 0x603   :  { %3564 = vmatpush1.bf16.msra.mxu0 %v3563_v1  ;;  %v1161_v1 = vld [vmem:[#allocation8 + $0x18] sm:$0xff] }
 0x604   :  { %3566 = vmatprep.subr.bf16.mxu0 %v3565_v4  ;;  %v1158_v4 = vld [vmem:[#allocation8] sm:$0xff]  ;;  %v5472_v7 = vpack.c.bf16 %v1161_v1, %v1159_v62 }
 0x605   :  { %v1194_v1 = vld [vmem:[#allocation8 + $0x120] sm:$0xff] }
 0x606   :  { %3594 = vmatprep.subr.bf16.mxu1 %v5472_v7 }
 0x607   :  { %3568 = vmatpush1.bf16.msra.mxu0 %v3567_v24  ;;  %v5474_v24 = vpack.c.bf16 %v1160_v10, %v1158_v4  ;;  %v1196_v4 = vld [vmem:[#allocation8 + $0x130] sm:$0xff] }
 0x608   :  { %3570 = vmatprep.subr.bf16.mxu0 %v3569_v27  ;;  %v5476_v27 = vpack.c.bf16 %v1165_v19, %v1163_v14  ;;  %v5562_v10 = vpack.c.bf16 %v1196_v4, %v1194_v1  ;;  %v1199_v14 = vld [vmem:[#allocation8 + $0x148] sm:$0xff]  ;;  %v1201_v19 = vld [vmem:[#allocation8 + $0x158] sm:$0xff] }
 0x60b   :  { %3572 = vmatpush1.bf16.msra.mxu0 %v3571_v49  ;;  %v5481_v49 = vpack.c.bf16 %v1164_v35, %v1162_v32  ;;  %v5568_v32 = vpack.c.bf16 %v1201_v19, %v1199_v14  ;;  %v1198_v35 = vld [vmem:[#allocation8 + $0x140] sm:$0xff] }
 0x60c   :  { %3574 = vmatprep.subr.bf16.mxu0 %v3573_v55  ;;  %v5484_v55 = vpack.c.bf16 %v1169_v44, %v1167_v40  ;;  %v1200_v40 = vld [vmem:[#allocation8 + $0x150] sm:$0xff] }
 0x60d   :  { %v5570_v44 = vpack.c.bf16 %v1200_v40, %v1198_v35 }
 0x60f   :  { %3576 = vmatpush1.bf16.msra.mxu0 %v3575_v31  ;;  %v1171_v31 = vld [vmem:[#allocation8 + $0x68] sm:$0xff] }
 0x610   :  { %3578 = vmatprep.subr.bf16.mxu0 %v3577_v26  ;;  %v1177_v26 = vld [vmem:[#allocation8 + $0x98] sm:$0xff] }
 0x611   :  { %v5496_v3 = vpack.c.bf16 %v1177_v26, %v1175_v58  ;;  %v1207_v58 = vld [vmem:[#allocation8 + $0x188] sm:$0xff]  ;;  %v1209_v26 = vld [vmem:[#allocation8 + $0x198] sm:$0xff] }
 0x613   :  { %3580 = vmatpush1.bf16.msra.mxu0 %v3579_v9  ;;  %v1174_v9 = vld [vmem:[#allocation8 + $0x80] sm:$0xff] }
 0x6b5   :  { %v847_v39 = vpop.f32.mrb[4].mxu0 }
 0x6b6   :  { %v852_v43 = vadd.f32 %v847_v39, %v5257_v60  ;;  %v849_v51 = vpop.f32.mrb[5].mxu0  ;;  %v1006_v60 = vld [vmem:[#allocation6 + $0x1a8] sm:$0xff]  ;;  %v1173_v39 = vld [vmem:[#allocation8 + $0x78] sm:$0xff] }
 0x6b7   :  { %v853_v38 = vadd.f32 %v849_v51, %v5239_v21  ;;  %v1008_v21 = vld [vmem:[#allocation6 + $0x1b8] sm:$0xff]  ;;  %v5490_v51 = vpack.c.bf16 %v1173_v39, %v1171_v31  ;;  %v1202_v39 = vld [vmem:[#allocation8 + $0x160] sm:$0xff] }
 0x6b8   :  { %v3581_v11 = vpack.c.bf16 %v1008_v21, %v1006_v60  ;;  %v1176_v60 = vld [vmem:[#allocation8 + $0x90] sm:$0xff] }
 0x6b9   :  { %4637 = vtanh.f32 %v853_v38  ;;  %v1170_v38 = vld [vmem:[#allocation8 + $0x60] sm:$0xff]  ;;  %v5499_v21 = vpack.c.bf16 %v1176_v60, %v1174_v9  ;;  %v5584_v9 = vpack.c.bf16 %v1209_v26, %v1207_v58 }
 0x6ba   :  { %4639 = vtanh.f32 %v852_v43  ;;  %3582 = vmatprep.subr.bf16.mxu0 %v3581_v11  ;;  %v5487_v43 = vpack.c.bf16 %v1168_v61, %v1166_v57  ;;  %v5493_v54 = vpack.c.bf16 %v1172_v52, %v1170_v38  ;;  %v1203_v57 = vld [vmem:[#allocation8 + $0x168] sm:$0xff]  ;;  %v1205_v61 = vld [vmem:[#allocation8 + $0x178] sm:$0xff]  ;;  %v1204_v38 = vld [vmem:[#allocation8 + $0x170] sm:$0xff] }
 0x6bb   :  { %3584 = vmatpush1.bf16.msra.mxu0 %v3583_v5  ;;  %v5576_v31 = vpack.c.bf16 %v1205_v61, %v1203_v57  ;;  %v5578_v52 = vpack.c.bf16 %v1204_v38, %v1202_v39  ;;  %v1206_v60 = vld [vmem:[#allocation8 + $0x180] sm:$0xff] }
 0x6bc   :  { %3586 = vmatprep.subr.bf16.mxu0 %v3585_v23  ;;  %v5546_v23 = vpack.c.bf16 %v1188_v22, %v1186_v16  ;;  %v1218_v22 = vld [vmem:[#allocation8 + $0x1e0] sm:$0xff] }
 0x6bd   :  { %v5609_v37 = vpack.c.bf16 %v1220_v36, %v1218_v22 }
 0x6bf   :  { %3588 = vmatpush1.bf16.msra.mxu0 %v3587_v47  ;;  %v1190_v47 = vld [vmem:[#allocation8 + $0x100] sm:$0xff] }
 0x6c0   :  { %3590 = vmatprep.subr.bf16.mxu0 %v3589_v50  ;;  %v1192_v50 = vld [vmem:[#allocation8 + $0x110] sm:$0xff] }
 0x6c1   :  { %v5554_v53 = vpack.c.bf16 %v1192_v50, %v1190_v47  ;;  %v1017_v47 = vld [vmem:[%s6336_s6] sm:$0x3] }
 0x6c2   :  { %v1026_v50 = vrot.slane %v1017_v47, %v5226_v2  ;;  %v1022_v4 = vrot.slane %v1017_v47, %v5232_v6 }
 0x6c3   :  { %v5466_v18 = vpop.eup %4637  ;;  %3592 = vmatpush1.bf16.msra.mxu0 %v3591_v59  ;;  %v1197_v59 = vld [vmem:[#allocation8 + $0x138] sm:$0xff] }
 0x6c4   :  { %v5468_v48 = vpop.eup %4639  ;;  %924 = vmatprep.mubr.f32.mxu1 %v5466_v18  ;;  %3658 = vmatprep.subr.bf16.mxu0 %v5472_v7  ;;  %v5560_v62 = vpack.c.bf16 %v1197_v59, %v1195_v56 }
 0x6c5   :  { %925 = vmatmul.mubr.f32.vlgmr.msra.gmra.mrb[22].mxu1 %v5468_v48 }
 0x6c6   :  { %3596 = vmatpush1.bf16.msra.mxu1 %v5474_v24 }
 0x6c7   :  { %3598 = vmatprep.subr.bf16.mxu1 %v5476_v27 }
 0x6ca   :  { %3600 = vmatpush1.bf16.msra.mxu1 %v5481_v49 }
 0x6cb   :  { %3602 = vmatprep.subr.bf16.mxu1 %v5484_v55 }
 0x6ce   :  { %3604 = vmatpush1.bf16.msra.mxu1 %v5487_v43 }
 0x6cf   :  { %3606 = vmatprep.subr.bf16.mxu1 %v5490_v51 }
 0x6d2   :  { %3608 = vmatpush1.bf16.msra.mxu1 %v5493_v54 }
 0x6d3   :  { %3610 = vmatprep.subr.bf16.mxu1 %v5496_v3 }
 0x6d6   :  { %3612 = vmatpush1.bf16.msra.mxu1 %v5499_v21 }
 0x798   :  { %v926_v11 = vpop.f32.mrb[22].mxu1 }
 0x799   :  { %v931_v34 = vadd.f32 %v926_v11, %v5259_v17  ;;  %v928_v46 = vpop.f32.mrb[23].mxu1  ;;  %v1179_v17 = vld [vmem:[#allocation8 + $0xa8] sm:$0xff]  ;;  %v1208_v11 = vld [vmem:[#allocation8 + $0x190] sm:$0xff] }
 0x79a   :  { %v932_v5 = vadd.f32 %v928_v46, %v5234_v12  ;;  %v1211_v46 = vld [vmem:[#allocation8 + $0x1a8] sm:$0xff] }
 0x79c   :  { %4641 = vtanh.f32 %v932_v5  ;;  %v1213_v5 = vld [vmem:[#allocation8 + $0x1b8] sm:$0xff] }
 0x79d   :  { %4643 = vtanh.f32 %v931_v34  ;;  %v5586_v34 = vpack.c.bf16 %v1208_v11, %v1206_v60 }
 0x7a6   :  { %v4642_v15 = vpop.eup %4641 }
 0x7a7   :  { %1093 = vmatprep.mubr.f32.mxu0 %v4642_v15  ;;  %v4644_v12 = vpop.eup %4643  ;;  %v5592_v15 = vpack.c.bf16 %v1213_v5, %v1211_v46 }
 0x7a8   :  { %1094 = vmatmul.mubr.f32.vlgmr.msra.gmra.mrb[6].mxu0 %v5263_v33  ;;  %v1181_v33 = vld [vmem:[#allocation8 + $0xb8] sm:$0xff] }
 0x7a9   :  { %1099 = vmatprep.mubr.f32.mxu0 %v5466_v18  ;;  %3660 = vmatpush1.bf16.msra.mxu0 %v5474_v24  ;;  %v1189_v18 = vld [vmem:[#allocation8 + $0xf8] sm:$0xff] }
 0x7aa   :  { %3662 = vmatprep.subr.bf16.mxu0 %v5476_v27 }
 0x7ac   :  { %1100 = vmatmul.mubr.f32.gmra.mrb[8].mxu0 %v5302_v45  ;;  %v5528_v45 = vpack.c.bf16 %v1181_v33, %v1179_v17  ;;  %v1212_v17 = vld [vmem:[#allocation8 + $0x1b0] sm:$0xff] }
 0x7ad   :  { %1105 = vmatprep.mubr.f32.mxu0 %v5458_v29  ;;  %3664 = vmatpush1.bf16.msra.mxu0 %v5481_v49 }
 0x7ae   :  { %3666 = vmatprep.subr.bf16.mxu0 %v5484_v55  ;;  %3614 = vmatprep.subr.bf16.mxu1 %v5528_v45 }
 0x7b0   :  { %1106 = vmatmul.mubr.f32.gmra.mrb[10].mxu0 %v5342_v0  ;;  %v1178_v0 = vld [vmem:[#allocation8 + $0xa0] sm:$0xff] }
 0x7b1   :  { %1111 = vmatprep.mubr.f32.mxu0 %v5419_v8  ;;  %3668 = vmatpush1.bf16.msra.mxu0 %v5487_v43  ;;  %v1182_v8 = vld [vmem:[#allocation8 + $0xc0] sm:$0xff] }
 0x7b2   :  { %3670 = vmatprep.subr.bf16.mxu0 %v5490_v51 }
 0x7b4   :  { %1112 = vmatmul.mubr.f32.gmra.mrb[12].mxu0 %v5382_v25 }
 0x7b5   :  { %1117 = vmatprep.mubr.f32.mxu0 %v5380_v20  ;;  %3672 = vmatpush1.bf16.msra.mxu0 %v5493_v54  ;;  %v1180_v20 = vld [vmem:[#allocation8 + $0xb0] sm:$0xff] }
 0x7b6   :  { %3674 = vmatprep.subr.bf16.mxu0 %v5496_v3  ;;  %v5530_v25 = vpack.c.bf16 %v1180_v20, %v1178_v0  ;;  %v1215_v0 = vld [vmem:[#allocation8 + $0x1c8] sm:$0xff]  ;;  %v1217_v20 = vld [vmem:[#allocation8 + $0x1d8] sm:$0xff] }
 0x7b8   :  { %1118 = vmatmul.mubr.f32.gmra.mrb[14].mxu0 %v5421_v13  ;;  %3616 = vmatpush1.bf16.msra.mxu1 %v5530_v25  ;;  %v1184_v13 = vld [vmem:[#allocation8 + $0xd0] sm:$0xff] }
 0x7b9   :  { %1123 = vmatprep.mubr.f32.mxu0 %v5340_v63  ;;  %3676 = vmatpush1.bf16.msra.mxu0 %v5499_v21  ;;  %v1185_v63 = vld [vmem:[#allocation8 + $0xd8] sm:$0xff]  ;;  %v5538_v29 = vpack.c.bf16 %v1184_v13, %v1182_v8  ;;  %v1216_v8 = vld [vmem:[#allocation8 + $0x1d0] sm:$0xff]  ;;  %v1219_v13 = vld [vmem:[#allocation8 + $0x1e8] sm:$0xff] }
 0x7ba   :  { %3678 = vmatprep.subr.bf16.mxu0 %v5528_v45 }
 0x7bc   :  { %1124 = vmatmul.mubr.f32.gmra.mrb[16].mxu0 %v5460_v30  ;;  %v1187_v30 = vld [vmem:[#allocation8 + $0xe8] sm:$0xff] }
 0x7bd   :  { %1129 = vmatprep.mubr.f32.mxu0 %v5300_v42  ;;  %v1183_v42 = vld [vmem:[#allocation8 + $0xc8] sm:$0xff]  ;;  %3680 = vmatpush1.bf16.msra.mxu0 %v5530_v25 }
 0x7c0   :  { %1130 = vmatmul.mubr.f32.gmra.mrb[18].mxu0 %v5468_v48  ;;  %v5544_v48 = vpack.c.bf16 %v1189_v18, %v1187_v30  ;;  %v1221_v30 = vld [vmem:[#allocation8 + $0x1f8] sm:$0xff] }
 0x7c1   :  { %1135 = vmatprep.mubr.f32.mxu0 %v5261_v28  ;;  %v5536_v28 = vpack.c.bf16 %v1185_v63, %v1183_v42  ;;  %v1214_v42 = vld [vmem:[#allocation8 + $0x1c0] sm:$0xff]  ;;  %v5599_v63 = vpack.c.bf16 %v1217_v20, %v1215_v0  ;;  %v5604_v16 = vpack.c.bf16 %v1221_v30, %v1219_v13 }
 0x7c2   :  { %v5602_v18 = vpack.c.bf16 %v1216_v8, %v1214_v42 }
 0x7c3   :  { %3618 = vmatprep.subr.bf16.mxu1 %v5536_v28  ;;  %3682 = vmatprep.subr.bf16.mxu0 %v5536_v28 }
 0x7c4   :  { %1136 = vmatmul.mubr.f32.gmra.mrb[20].mxu0 %v4644_v12  ;;  %3620 = vmatpush1.bf16.msra.mxu1 %v5538_v29  ;;  %v1210_v12 = vld [vmem:[#allocation8 + $0x1a0] sm:$0xff] }
 0x7c5   :  { %3684 = vmatpush1.bf16.msra.mxu0 %v5538_v29  ;;  %3622 = vmatprep.subr.bf16.mxu1 %v5544_v48  ;;  %v5594_v33 = vpack.c.bf16 %v1212_v17, %v1210_v12 }
 0x7c6   :  { %3686 = vmatprep.subr.bf16.mxu0 %v5544_v48 }
 0x7c8   :  { %3624 = vmatpush1.bf16.msra.mxu1 %v5546_v23 }
 0x7c9   :  { %3688 = vmatpush1.bf16.msra.mxu0 %v5546_v23  ;;  %3626 = vmatprep.subr.bf16.mxu1 %v5552_v41 }
 0x7ca   :  { %3690 = vmatprep.subr.bf16.mxu0 %v5552_v41 }
 0x7cc   :  { %3628 = vmatpush1.bf16.msra.mxu1 %v5554_v53 }
 0x7cd   :  { %3692 = vmatpush1.bf16.msra.mxu0 %v5554_v53  ;;  %3630 = vmatprep.subr.bf16.mxu1 %v5560_v62 }
 0x7ce   :  { %3694 = vmatprep.subr.bf16.mxu0 %v5560_v62 }
 0x7d0   :  { %3632 = vmatpush1.bf16.msra.mxu1 %v5562_v10 }
 0x7d1   :  { %3696 = vmatpush1.bf16.msra.mxu0 %v5562_v10  ;;  %3634 = vmatprep.subr.bf16.mxu1 %v5568_v32 }
 0x7d2   :  { %3698 = vmatprep.subr.bf16.mxu0 %v5568_v32 }
 0x7d4   :  { %3636 = vmatpush1.bf16.msra.mxu1 %v5570_v44 }
 0x7d5   :  { %3700 = vmatpush1.bf16.msra.mxu0 %v5570_v44  ;;  %3638 = vmatprep.subr.bf16.mxu1 %v5576_v31 }
 0x7d6   :  { %3702 = vmatprep.subr.bf16.mxu0 %v5576_v31 }
 0x7d8   :  { %3640 = vmatpush1.bf16.msra.mxu1 %v5578_v52 }
 0x7d9   :  { %3704 = vmatpush1.bf16.msra.mxu0 %v5578_v52  ;;  %3642 = vmatprep.subr.bf16.mxu1 %v5584_v9 }
 0x7da   :  { %3706 = vmatprep.subr.bf16.mxu0 %v5584_v9 }
 0x7dc   :  { %3644 = vmatpush1.bf16.msra.mxu1 %v5586_v34 }
 0x7dd   :  { %3708 = vmatpush1.bf16.msra.mxu0 %v5586_v34  ;;  %3646 = vmatprep.subr.bf16.mxu1 %v5592_v15 }
 0x7de   :  { %3710 = vmatprep.subr.bf16.mxu0 %v5592_v15 }
 0x7e0   :  { %3648 = vmatpush1.bf16.msra.mxu1 %v5594_v33 }
 0x7e1   :  { %3712 = vmatpush1.bf16.msra.mxu0 %v5594_v33  ;;  %3650 = vmatprep.subr.bf16.mxu1 %v5599_v63 }
 0x7e2   :  { %3714 = vmatprep.subr.bf16.mxu0 %v5599_v63 }
 0x7e4   :  { %3652 = vmatpush1.bf16.msra.mxu1 %v5602_v18 }
 0x7e5   :  { %3716 = vmatpush1.bf16.msra.mxu0 %v5602_v18  ;;  %3654 = vmatprep.subr.bf16.mxu1 %v5604_v16 }
 0x7e6   :  { %3718 = vmatprep.subr.bf16.mxu0 %v5604_v16 }
 0x7e8   :  { %3656 = vmatpush1.bf16.msra.mxu1 %v5609_v37 }
 0x7e9   :  { %3720 = vmatpush1.bf16.msra.mxu0 %v5609_v37  ;;  %3722 = vmatprep.subr.bf16.mxu1 %v5472_v7 }
 0x7ea   :  { %3786 = vmatprep.subr.bf16.mxu0 %v5472_v7 }
 0x87b   :  { %v1095_v56 = vpop.f32.mrb[6].mxu0 }
 0x87c   :  { %v1097_v59 = vpop.f32.mrb[7].mxu0 }
 0x87d   :  { %v5622_v1 = vadd.f32 %v1097_v59, %v1026_v50  ;;  %v1096_v59 = vadd.f32 %v1095_v56, %v1022_v4 }
 0x87f   :  { %v1101_v14 = vpop.f32.mrb[8].mxu0 }
 0x880   :  { %v5625_v19 = vadd.f32 %v1101_v14, %v1022_v4  ;;  %v1103_v35 = vpop.f32.mrb[9].mxu0 }
 0x881   :  { %v5627_v40 = vadd.f32 %v1103_v35, %v1026_v50 }
 0x883   :  { %v1107_v57 = vpop.f32.mrb[10].mxu0 }
 0x884   :  { %v5629_v61 = vadd.f32 %v1107_v57, %v1022_v4  ;;  %v1109_v39 = vpop.f32.mrb[11].mxu0 }
 0x885   :  { %v5631_v38 = vadd.f32 %v1109_v39, %v1026_v50 }
 0x887   :  { %v1113_v58 = vpop.f32.mrb[12].mxu0 }
 0x888   :  { %v5633_v26 = vadd.f32 %v1113_v58, %v1022_v4  ;;  %v1115_v60 = vpop.f32.mrb[13].mxu0 }
 0x889   :  { %v5635_v11 = vadd.f32 %v1115_v60, %v1026_v50 }
 0x88b   :  { %v1119_v46 = vpop.f32.mrb[14].mxu0 }
 0x88c   :  { %v5637_v5 = vadd.f32 %v1119_v46, %v1022_v4  ;;  %v1121_v12 = vpop.f32.mrb[15].mxu0 }
 0x88d   :  { %v5639_v17 = vadd.f32 %v1121_v12, %v1026_v50 }
 0x88f   :  { %v1125_v0 = vpop.f32.mrb[16].mxu0 }
 0x890   :  { %v5641_v20 = vadd.f32 %v1125_v0, %v1022_v4  ;;  %v1127_v42 = vpop.f32.mrb[17].mxu0 }
 0x891   :  { %v5643_v8 = vadd.f32 %v1127_v42, %v1026_v50 }
 0x893   :  { %v1131_v13 = vpop.f32.mrb[18].mxu0 }
 0x894   :  { %v5645_v30 = vadd.f32 %v1131_v13, %v1022_v4  ;;  %v1133_v22 = vpop.f32.mrb[19].mxu0 }
 0x895   :  { %v1134_v36 = vadd.f32 %v1133_v22, %v1026_v50 }
 0x897   :  { %v1137_v47 = vpop.f32.mrb[20].mxu0 }
 0x898   :  { %v5647_v14 = vadd.f32 %v1137_v47, %v1022_v4  ;;  %v1139_v35 = vpop.f32.mrb[21].mxu0 }
 0x899   :  { %v1140_v57 = vadd.f32 %v1139_v35, %v1026_v50 }
 0x89b   :  { %4645 = vtanh.f32 %v1140_v57 }
 0x89c   :  { %4647 = vtanh.f32 %v1096_v59 }
 0x8a5   :  { %v5649_v39 = vpop.eup %4645 }
 0x8a6   :  { %v5651_v58 = vpop.eup %4647  ;;  %1294 = vmatprep.mubr.f32.mxu1 %v5649_v39 }
 0x8a7   :  { %1295 = vmatmul.mubr.f32.vlgmr.msra.gmra.mrb[24].mxu1 %v5651_v58 }
 0x8a8   :  { %3724 = vmatpush1.bf16.msra.mxu1 %v5474_v24 }
 0x8a9   :  { %3726 = vmatprep.subr.bf16.mxu1 %v5476_v27 }
 0x8ac   :  { %3728 = vmatpush1.bf16.msra.mxu1 %v5481_v49 }
 0x8ad   :  { %3730 = vmatprep.subr.bf16.mxu1 %v5484_v55 }
 0x8b0   :  { %3732 = vmatpush1.bf16.msra.mxu1 %v5487_v43 }
 0x8b1   :  { %3734 = vmatprep.subr.bf16.mxu1 %v5490_v51 }
 0x8b4   :  { %3736 = vmatpush1.bf16.msra.mxu1 %v5493_v54 }
 0x8b5   :  { %3738 = vmatprep.subr.bf16.mxu1 %v5496_v3 }
 0x8b8   :  { %3740 = vmatpush1.bf16.msra.mxu1 %v5499_v21 }
 0x8b9   :  { %3742 = vmatprep.subr.bf16.mxu1 %v5528_v45 }
 0x8bc   :  { %3744 = vmatpush1.bf16.msra.mxu1 %v5530_v25 }
 0x8bd   :  { %3746 = vmatprep.subr.bf16.mxu1 %v5536_v28 }
 0x8c0   :  { %3748 = vmatpush1.bf16.msra.mxu1 %v5538_v29 }
 0x8c1   :  { %3750 = vmatprep.subr.bf16.mxu1 %v5544_v48 }
 0x8c4   :  { %3752 = vmatpush1.bf16.msra.mxu1 %v5546_v23 }
 0x8c5   :  { %3754 = vmatprep.subr.bf16.mxu1 %v5552_v41 }
 0x8c8   :  { %3756 = vmatpush1.bf16.msra.mxu1 %v5554_v53 }
 0x8c9   :  { %3758 = vmatprep.subr.bf16.mxu1 %v5560_v62 }
 0x8cc   :  { %3760 = vmatpush1.bf16.msra.mxu1 %v5562_v10 }
 0x8cd   :  { %3762 = vmatprep.subr.bf16.mxu1 %v5568_v32 }
 0x8d0   :  { %3764 = vmatpush1.bf16.msra.mxu1 %v5570_v44 }
 0x8d1   :  { %3766 = vmatprep.subr.bf16.mxu1 %v5576_v31 }
 0x8d4   :  { %3768 = vmatpush1.bf16.msra.mxu1 %v5578_v52 }
 0x8d5   :  { %3770 = vmatprep.subr.bf16.mxu1 %v5584_v9 }
 0x8d8   :  { %3772 = vmatpush1.bf16.msra.mxu1 %v5586_v34 }
 0x8d9   :  { %3774 = vmatprep.subr.bf16.mxu1 %v5592_v15 }
 0x8dc   :  { %3776 = vmatpush1.bf16.msra.mxu1 %v5594_v33 }
 0x8dd   :  { %3778 = vmatprep.subr.bf16.mxu1 %v5599_v63 }
 0x8e0   :  { %3780 = vmatpush1.bf16.msra.mxu1 %v5602_v18 }
 0x8e1   :  { %3782 = vmatprep.subr.bf16.mxu1 %v5604_v16 }
 0x8e4   :  { %3784 = vmatpush1.bf16.msra.mxu1 %v5609_v37 }
 0x8e5   :  { %3850 = vmatprep.subr.bf16.mxu1 %v5472_v7 }
 0x97a   :  { %v1296_v50 = vpop.f32.mrb[24].mxu1 }
 0x97b   :  { %v1301_v56 = vadd.f32 %v1296_v50, %v5625_v19  ;;  %v1298_v4 = vpop.f32.mrb[25].mxu1 }
 0x97c   :  { %v1302_v60 = vadd.f32 %v1298_v4, %v1134_v36 }
 0x97e   :  { %4649 = vtanh.f32 %v1302_v60  ;;  %v1818_v60 = vld [vmem:[#allocation9 + $0xa8] sm:$0xff] }
 0x97f   :  { %4651 = vtanh.f32 %v1301_v56 }
 0x988   :  { %v5688_v46 = vpop.eup %4649 }
 0x989   :  { %v5690_v12 = vpop.eup %4651  ;;  %1373 = vmatprep.mubr.f32.mxu0 %v5688_v46 }
 0x98a   :  { %1374 = vmatmul.mubr.f32.vlgmr.msra.gmra.mrb[22].mxu0 %v5690_v12 }
 0x98b   :  { %3788 = vmatpush1.bf16.msra.mxu0 %v5474_v24 }
 0x98c   :  { %3790 = vmatprep.subr.bf16.mxu0 %v5476_v27 }
 0x98f   :  { %3792 = vmatpush1.bf16.msra.mxu0 %v5481_v49 }
 0x990   :  { %3794 = vmatprep.subr.bf16.mxu0 %v5484_v55 }
 0x993   :  { %3796 = vmatpush1.bf16.msra.mxu0 %v5487_v43 }
 0x994   :  { %3798 = vmatprep.subr.bf16.mxu0 %v5490_v51 }
 0x997   :  { %3800 = vmatpush1.bf16.msra.mxu0 %v5493_v54 }
 0x998   :  { %3802 = vmatprep.subr.bf16.mxu0 %v5496_v3 }
 0x99b   :  { %3804 = vmatpush1.bf16.msra.mxu0 %v5499_v21 }
 0x99c   :  { %3806 = vmatprep.subr.bf16.mxu0 %v5528_v45 }
 0x99f   :  { %3808 = vmatpush1.bf16.msra.mxu0 %v5530_v25 }
 0x9a0   :  { %3810 = vmatprep.subr.bf16.mxu0 %v5536_v28 }
 0x9a3   :  { %3812 = vmatpush1.bf16.msra.mxu0 %v5538_v29 }
 0x9a4   :  { %3814 = vmatprep.subr.bf16.mxu0 %v5544_v48 }
 0x9a7   :  { %3816 = vmatpush1.bf16.msra.mxu0 %v5546_v23 }
 0x9a8   :  { %3818 = vmatprep.subr.bf16.mxu0 %v5552_v41 }
 0x9ab   :  { %3820 = vmatpush1.bf16.msra.mxu0 %v5554_v53 }
 0x9ac   :  { %3822 = vmatprep.subr.bf16.mxu0 %v5560_v62 }
 0x9af   :  { %3824 = vmatpush1.bf16.msra.mxu0 %v5562_v10 }
 0x9b0   :  { %3826 = vmatprep.subr.bf16.mxu0 %v5568_v32 }
 0x9b3   :  { %3828 = vmatpush1.bf16.msra.mxu0 %v5570_v44 }
 0x9b4   :  { %3830 = vmatprep.subr.bf16.mxu0 %v5576_v31 }
 0x9b7   :  { %3832 = vmatpush1.bf16.msra.mxu0 %v5578_v52 }
 0x9b8   :  { %3834 = vmatprep.subr.bf16.mxu0 %v5584_v9 }
 0x9bb   :  { %3836 = vmatpush1.bf16.msra.mxu0 %v5586_v34 }
 0x9bc   :  { %3838 = vmatprep.subr.bf16.mxu0 %v5592_v15 }
 0x9bf   :  { %3840 = vmatpush1.bf16.msra.mxu0 %v5594_v33 }
 0x9c0   :  { %3842 = vmatprep.subr.bf16.mxu0 %v5599_v63 }
 0x9c3   :  { %3844 = vmatpush1.bf16.msra.mxu0 %v5602_v18 }
 0x9c4   :  { %3846 = vmatprep.subr.bf16.mxu0 %v5604_v16 }
 0x9c7   :  { %3848 = vmatpush1.bf16.msra.mxu0 %v5609_v37 }
 0x9c8   :  { %3914 = vmatprep.subr.bf16.mxu0 %v5472_v7 }
 0xa5d   :  { %v1375_v19 = vpop.f32.mrb[22].mxu0 }
 0xa5e   :  { %v1380_v0 = vadd.f32 %v1375_v19, %v5629_v61  ;;  %v1377_v42 = vpop.f32.mrb[23].mxu0  ;;  %v1820_v19 = vld [vmem:[#allocation9 + $0xb8] sm:$0xff] }
 0xa5f   :  { %v1381_v13 = vadd.f32 %v1377_v42, %v5643_v8  ;;  %v4061_v42 = vpack.c.bf16 %v1820_v19, %v1818_v60 }
 0xa61   :  { %4653 = vtanh.f32 %v1381_v13  ;;  %v1817_v13 = vld [vmem:[#allocation9 + $0xa0] sm:$0xff] }
 0xa62   :  { %4655 = vtanh.f32 %v1380_v0 }
 0xa6b   :  { %v5728_v22 = vpop.eup %4653 }
 0xa6c   :  { %v5730_v36 = vpop.eup %4655  ;;  %1452 = vmatprep.mubr.f32.mxu1 %v5728_v22 }
 0xa6d   :  { %1453 = vmatmul.mubr.f32.vlgmr.msra.gmra.mrb[26].mxu1 %v5730_v36 }
 0xa6e   :  { %3852 = vmatpush1.bf16.msra.mxu1 %v5474_v24 }
 0xa6f   :  { %3854 = vmatprep.subr.bf16.mxu1 %v5476_v27 }
 0xa72   :  { %3856 = vmatpush1.bf16.msra.mxu1 %v5481_v49 }
 0xa73   :  { %3858 = vmatprep.subr.bf16.mxu1 %v5484_v55 }
 0xa76   :  { %3860 = vmatpush1.bf16.msra.mxu1 %v5487_v43 }
 0xa77   :  { %3862 = vmatprep.subr.bf16.mxu1 %v5490_v51 }
 0xa7a   :  { %3864 = vmatpush1.bf16.msra.mxu1 %v5493_v54 }
 0xa7b   :  { %3866 = vmatprep.subr.bf16.mxu1 %v5496_v3 }
 0xa7e   :  { %3868 = vmatpush1.bf16.msra.mxu1 %v5499_v21 }
 0xa7f   :  { %3870 = vmatprep.subr.bf16.mxu1 %v5528_v45 }
 0xa82   :  { %3872 = vmatpush1.bf16.msra.mxu1 %v5530_v25 }
 0xa83   :  { %3874 = vmatprep.subr.bf16.mxu1 %v5536_v28 }
 0xa86   :  { %3876 = vmatpush1.bf16.msra.mxu1 %v5538_v29 }
 0xa87   :  { %3878 = vmatprep.subr.bf16.mxu1 %v5544_v48 }
 0xa8a   :  { %3880 = vmatpush1.bf16.msra.mxu1 %v5546_v23 }
 0xa8b   :  { %3882 = vmatprep.subr.bf16.mxu1 %v5552_v41 }
 0xa8e   :  { %3884 = vmatpush1.bf16.msra.mxu1 %v5554_v53 }
 0xa8f   :  { %3886 = vmatprep.subr.bf16.mxu1 %v5560_v62 }
 0xa92   :  { %3888 = vmatpush1.bf16.msra.mxu1 %v5562_v10 }
 0xa93   :  { %3890 = vmatprep.subr.bf16.mxu1 %v5568_v32 }
 0xa96   :  { %3892 = vmatpush1.bf16.msra.mxu1 %v5570_v44 }
 0xa97   :  { %3894 = vmatprep.subr.bf16.mxu1 %v5576_v31 }
 0xa9a   :  { %3896 = vmatpush1.bf16.msra.mxu1 %v5578_v52 }
 0xa9b   :  { %3898 = vmatprep.subr.bf16.mxu1 %v5584_v9 }
 0xa9e   :  { %3900 = vmatpush1.bf16.msra.mxu1 %v5586_v34 }
 0xa9f   :  { %3902 = vmatprep.subr.bf16.mxu1 %v5592_v15 }
 0xaa2   :  { %3904 = vmatpush1.bf16.msra.mxu1 %v5594_v33 }
 0xaa3   :  { %3906 = vmatprep.subr.bf16.mxu1 %v5599_v63 }
 0xaa6   :  { %3908 = vmatpush1.bf16.msra.mxu1 %v5602_v18 }
 0xaa7   :  { %3910 = vmatprep.subr.bf16.mxu1 %v5604_v16 }
 0xaaa   :  { %3912 = vmatpush1.bf16.msra.mxu1 %v5609_v37 }
 0xaab   :  { %3978 = vmatprep.subr.bf16.mxu1 %v5472_v7 }
 0xb40   :  { %v1454_v61 = vpop.f32.mrb[26].mxu1 }
 0xb41   :  { %v1459_v8 = vadd.f32 %v1454_v61, %v5633_v26  ;;  %v1456_v47 = vpop.f32.mrb[27].mxu1  ;;  %v1819_v61 = vld [vmem:[#allocation9 + $0xb0] sm:$0xff] }
 0xb42   :  { %v1460_v59 = vadd.f32 %v1456_v47, %v5639_v17  ;;  %v1824_v47 = vld [vmem:[#allocation9 + $0xd8] sm:$0xff] }
 0xb44   :  { %4657 = vtanh.f32 %v1460_v59  ;;  %v4063_v59 = vpack.c.bf16 %v1819_v61, %v1817_v13  ;;  %v1848_v13 = vld [vmem:[#allocation9 + $0x198] sm:$0xff] }
 0xb45   :  { %4659 = vtanh.f32 %v1459_v8  ;;  %v1822_v8 = vld [vmem:[#allocation9 + $0xc8] sm:$0xff] }
 0xb4e   :  { %v5768_v35 = vpop.eup %4657 }
 0xb4f   :  { %v5770_v57 = vpop.eup %4659  ;;  %1531 = vmatprep.mubr.f32.mxu0 %v5768_v35 }
 0xb50   :  { %1532 = vmatmul.mubr.f32.vlgmr.msra.gmra.mrb[24].mxu0 %v5770_v57 }
 0xb51   :  { %3916 = vmatpush1.bf16.msra.mxu0 %v5474_v24 }
 0xb52   :  { %3918 = vmatprep.subr.bf16.mxu0 %v5476_v27 }
 0xb55   :  { %3920 = vmatpush1.bf16.msra.mxu0 %v5481_v49 }
 0xb56   :  { %3922 = vmatprep.subr.bf16.mxu0 %v5484_v55 }
 0xb59   :  { %3924 = vmatpush1.bf16.msra.mxu0 %v5487_v43 }
 0xb5a   :  { %3926 = vmatprep.subr.bf16.mxu0 %v5490_v51 }
 0xb5d   :  { %3928 = vmatpush1.bf16.msra.mxu0 %v5493_v54 }
 0xb5e   :  { %3930 = vmatprep.subr.bf16.mxu0 %v5496_v3 }
 0xb61   :  { %3932 = vmatpush1.bf16.msra.mxu0 %v5499_v21 }
 0xb62   :  { %3934 = vmatprep.subr.bf16.mxu0 %v5528_v45 }
 0xb65   :  { %3936 = vmatpush1.bf16.msra.mxu0 %v5530_v25 }
 0xb66   :  { %3938 = vmatprep.subr.bf16.mxu0 %v5536_v28 }
 0xb69   :  { %3940 = vmatpush1.bf16.msra.mxu0 %v5538_v29 }
 0xb6a   :  { %3942 = vmatprep.subr.bf16.mxu0 %v5544_v48 }
 0xb6d   :  { %3944 = vmatpush1.bf16.msra.mxu0 %v5546_v23 }
 0xb6e   :  { %3946 = vmatprep.subr.bf16.mxu0 %v5552_v41 }
 0xb71   :  { %3948 = vmatpush1.bf16.msra.mxu0 %v5554_v53 }
 0xb72   :  { %3950 = vmatprep.subr.bf16.mxu0 %v5560_v62 }
 0xb75   :  { %3952 = vmatpush1.bf16.msra.mxu0 %v5562_v10 }
 0xb76   :  { %3954 = vmatprep.subr.bf16.mxu0 %v5568_v32 }
 0xb79   :  { %3956 = vmatpush1.bf16.msra.mxu0 %v5570_v44 }
 0xb7a   :  { %3958 = vmatprep.subr.bf16.mxu0 %v5576_v31 }
 0xb7d   :  { %3960 = vmatpush1.bf16.msra.mxu0 %v5578_v52 }
 0xb7e   :  { %3962 = vmatprep.subr.bf16.mxu0 %v5584_v9 }
 0xb81   :  { %3964 = vmatpush1.bf16.msra.mxu0 %v5586_v34 }
 0xb82   :  { %3966 = vmatprep.subr.bf16.mxu0 %v5592_v15 }
 0xb85   :  { %3968 = vmatpush1.bf16.msra.mxu0 %v5594_v33 }
 0xb86   :  { %3970 = vmatprep.subr.bf16.mxu0 %v5599_v63 }
 0xb89   :  { %3972 = vmatpush1.bf16.msra.mxu0 %v5602_v18 }
 0xb8a   :  { %3974 = vmatprep.subr.bf16.mxu0 %v5604_v16 }
 0xb8d   :  { %3976 = vmatpush1.bf16.msra.mxu0 %v5609_v37 }
 0xc23   :  { %v1533_v7 = vpop.f32.mrb[24].mxu0 }
 0xc24   :  { %v1538_v26 = vadd.f32 %v1533_v7, %v5637_v5  ;;  %v1535_v17 = vpop.f32.mrb[25].mxu0  ;;  %v1813_v5 = vld [vmem:[#allocation9 + $0x80] sm:$0xff]  ;;  %v4065_v7 = vpack.c.bf16 %v1824_v47, %v1822_v8  ;;  %v1847_v47 = vld [vmem:[#allocation9 + $0x190] sm:$0xff] }
 0xc25   :  { %v1539_v50 = vadd.f32 %v1535_v17, %v5635_v11  ;;  %v1823_v17 = vld [vmem:[#allocation9 + $0xd0] sm:$0xff]  ;;  %v1845_v8 = vld [vmem:[#allocation9 + $0x180] sm:$0xff] }
 0xc27   :  { %4661 = vtanh.f32 %v1539_v50  ;;  %v1826_v50 = vld [vmem:[#allocation9 + $0xe8] sm:$0xff] }
 0xc28   :  { %4663 = vtanh.f32 %v1538_v26  ;;  %v1821_v26 = vld [vmem:[#allocation9 + $0xc0] sm:$0xff] }
 0xc31   :  { %v5807_v56 = vpop.eup %4661 }
 0xc32   :  { %v5809_v4 = vpop.eup %4663  ;;  %1610 = vmatprep.mubr.f32.mxu1 %v5807_v56 }
 0xc33   :  { %1611 = vmatmul.mubr.f32.vlgmr.msra.gmra.mrb[28].mxu1 %v5809_v4 }
 0xc34   :  { %3980 = vmatpush1.bf16.msra.mxu1 %v5474_v24 }
 0xc35   :  { %3982 = vmatprep.subr.bf16.mxu1 %v5476_v27 }
 0xc38   :  { %3984 = vmatpush1.bf16.msra.mxu1 %v5481_v49 }
 0xc39   :  { %3986 = vmatprep.subr.bf16.mxu1 %v5484_v55 }
 0xc3c   :  { %3988 = vmatpush1.bf16.msra.mxu1 %v5487_v43 }
 0xc3d   :  { %3990 = vmatprep.subr.bf16.mxu1 %v5490_v51 }
 0xc40   :  { %3992 = vmatpush1.bf16.msra.mxu1 %v5493_v54  ;;  %v1798_v54 = vld [vmem:[#allocation9 + $0x8] sm:$0xff] }
 0xc41   :  { %3994 = vmatprep.subr.bf16.mxu1 %v5496_v3  ;;  %v1800_v3 = vld [vmem:[#allocation9 + $0x18] sm:$0xff] }
 0xc44   :  { %3996 = vmatpush1.bf16.msra.mxu1 %v5499_v21  ;;  %v1797_v21 = vld [vmem:[#allocation9] sm:$0xff] }
 0xc45   :  { %3998 = vmatprep.subr.bf16.mxu1 %v5528_v45  ;;  %v4041_v45 = vpack.c.bf16 %v1800_v3, %v1798_v54  ;;  %v1827_v54 = vld [vmem:[#allocation9 + $0xf0] sm:$0xff]  ;;  %v1830_v3 = vld [vmem:[#allocation9 + $0x108] sm:$0xff] }
 0xc47   :  { %4042 = vmatprep.subr.bf16.mxu0 %v4041_v45 }
 0xc48   :  { %4000 = vmatpush1.bf16.msra.mxu1 %v5530_v25  ;;  %v1799_v25 = vld [vmem:[#allocation9 + $0x10] sm:$0xff] }
 0xc49   :  { %4002 = vmatprep.subr.bf16.mxu1 %v5536_v28  ;;  %v1802_v28 = vld [vmem:[#allocation9 + $0x28] sm:$0xff] }
 0xc4c   :  { %4004 = vmatpush1.bf16.msra.mxu1 %v5538_v29  ;;  %v1804_v29 = vld [vmem:[#allocation9 + $0x38] sm:$0xff] }
 0xc4d   :  { %4006 = vmatprep.subr.bf16.mxu1 %v5544_v48  ;;  %v4043_v48 = vpack.c.bf16 %v1799_v25, %v1797_v21  ;;  %v1832_v21 = vld [vmem:[#allocation9 + $0x118] sm:$0xff] }
 0xc4e   :  { %v4073_v25 = vpack.c.bf16 %v1832_v21, %v1830_v3  ;;  %v1858_v3 = vld [vmem:[#allocation9 + $0x1e8] sm:$0xff]  ;;  %v1860_v21 = vld [vmem:[#allocation9 + $0x1f8] sm:$0xff] }
 0xc50   :  { %4008 = vmatpush1.bf16.msra.mxu1 %v5546_v23  ;;  %v4045_v23 = vpack.c.bf16 %v1804_v29, %v1802_v28  ;;  %v1829_v28 = vld [vmem:[#allocation9 + $0x100] sm:$0xff]  ;;  %v1831_v29 = vld [vmem:[#allocation9 + $0x110] sm:$0xff] }
 0xc51   :  { %4010 = vmatprep.subr.bf16.mxu1 %v5552_v41  ;;  %v1801_v41 = vld [vmem:[#allocation9 + $0x20] sm:$0xff] }
 0xc54   :  { %4012 = vmatpush1.bf16.msra.mxu1 %v5554_v53  ;;  %v1803_v53 = vld [vmem:[#allocation9 + $0x30] sm:$0xff] }
 0xc55   :  { %4014 = vmatprep.subr.bf16.mxu1 %v5560_v62  ;;  %v1806_v62 = vld [vmem:[#allocation9 + $0x48] sm:$0xff] }
 0xc58   :  { %4016 = vmatpush1.bf16.msra.mxu1 %v5562_v10  ;;  %v1808_v10 = vld [vmem:[#allocation9 + $0x58] sm:$0xff] }
 0xc59   :  { %4018 = vmatprep.subr.bf16.mxu1 %v5568_v32  ;;  %v4047_v32 = vpack.c.bf16 %v1803_v53, %v1801_v41  ;;  %v4075_v41 = vpack.c.bf16 %v1831_v29, %v1829_v28  ;;  %v1857_v28 = vld [vmem:[#allocation9 + $0x1e0] sm:$0xff]  ;;  %v1859_v29 = vld [vmem:[#allocation9 + $0x1f0] sm:$0xff] }
 0xc5c   :  { %4020 = vmatpush1.bf16.msra.mxu1 %v5570_v44  ;;  %v4049_v44 = vpack.c.bf16 %v1808_v10, %v1806_v62  ;;  %v1833_v62 = vld [vmem:[#allocation9 + $0x120] sm:$0xff]  ;;  %v1835_v10 = vld [vmem:[#allocation9 + $0x130] sm:$0xff] }
 0xc5d   :  { %4022 = vmatprep.subr.bf16.mxu1 %v5576_v31  ;;  %v1805_v31 = vld [vmem:[#allocation9 + $0x40] sm:$0xff] }
 0xc60   :  { %4024 = vmatpush1.bf16.msra.mxu1 %v5578_v52  ;;  %v1807_v52 = vld [vmem:[#allocation9 + $0x50] sm:$0xff] }
 0xc61   :  { %4026 = vmatprep.subr.bf16.mxu1 %v5584_v9  ;;  %v1810_v9 = vld [vmem:[#allocation9 + $0x68] sm:$0xff] }
 0xc64   :  { %4028 = vmatpush1.bf16.msra.mxu1 %v5586_v34  ;;  %v1812_v34 = vld [vmem:[#allocation9 + $0x78] sm:$0xff] }
 0xc65   :  { %4030 = vmatprep.subr.bf16.mxu1 %v5592_v15  ;;  %v4051_v15 = vpack.c.bf16 %v1807_v52, %v1805_v31  ;;  %v4079_v31 = vpack.c.bf16 %v1835_v10, %v1833_v62  ;;  %v2004_v10 = vld [vmem:[#allocation11 + $0x10] sm:$0xff] }
 0xc68   :  { %4032 = vmatpush1.bf16.msra.mxu1 %v5594_v33  ;;  %v4053_v33 = vpack.c.bf16 %v1812_v34, %v1810_v9  ;;  %v1837_v9 = vld [vmem:[#allocation9 + $0x140] sm:$0xff]  ;;  %v1839_v34 = vld [vmem:[#allocation9 + $0x150] sm:$0xff] }
 0xc69   :  { %4034 = vmatprep.subr.bf16.mxu1 %v5599_v63  ;;  %v1809_v63 = vld [vmem:[#allocation9 + $0x60] sm:$0xff] }
 0xc6c   :  { %4036 = vmatpush1.bf16.msra.mxu1 %v5602_v18  ;;  %v1811_v18 = vld [vmem:[#allocation9 + $0x70] sm:$0xff] }
 0xc6d   :  { %4038 = vmatprep.subr.bf16.mxu1 %v5604_v16  ;;  %v1814_v16 = vld [vmem:[#allocation9 + $0x88] sm:$0xff] }
 0xc70   :  { %4040 = vmatpush1.bf16.msra.mxu1 %v5609_v37  ;;  %v1816_v37 = vld [vmem:[#allocation9 + $0x98] sm:$0xff] }
 0xc71   :  { %v4057_v11 = vpack.c.bf16 %v1816_v37, %v1814_v16  ;;  %v1841_v16 = vld [vmem:[#allocation9 + $0x160] sm:$0xff]  ;;  %v1843_v37 = vld [vmem:[#allocation9 + $0x170] sm:$0xff] }
 0xd06   :  { %v1612_v24 = vpop.f32.mrb[28].mxu1 }
 0xd07   :  { %v1617_v27 = vadd.f32 %v1612_v24, %v5641_v20  ;;  %v1614_v49 = vpop.f32.mrb[29].mxu1  ;;  %v1815_v20 = vld [vmem:[#allocation9 + $0x90] sm:$0xff]  ;;  %v1828_v24 = vld [vmem:[#allocation9 + $0xf8] sm:$0xff] }
 0xd08   :  { %v1618_v55 = vadd.f32 %v1614_v49, %v5631_v38  ;;  %v4055_v38 = vpack.c.bf16 %v1811_v18, %v1809_v63  ;;  %v4059_v0 = vpack.c.bf16 %v1815_v20, %v1813_v5  ;;  %v4069_v49 = vpack.c.bf16 %v1828_v24, %v1826_v50  ;;  %v1854_v24 = vld [vmem:[#allocation9 + $0x1c8] sm:$0xff] }
 0xd09   :  { %v4083_v63 = vpack.c.bf16 %v1839_v34, %v1837_v9  ;;  %v2006_v9 = vld [vmem:[#allocation11 + $0x20] sm:$0xff]  ;;  %v2008_v34 = vld [vmem:[#allocation11 + $0x30] sm:$0xff] }
 0xd0a   :  { %4665 = vtanh.f32 %v1618_v55  ;;  %v1825_v55 = vld [vmem:[#allocation9 + $0xe0] sm:$0xff] }
 0xd0b   :  { %4667 = vtanh.f32 %v1617_v27  ;;  %v4067_v27 = vpack.c.bf16 %v1823_v17, %v1821_v26  ;;  %v4071_v45 = vpack.c.bf16 %v1827_v54, %v1825_v55  ;;  %v1849_v26 = vld [vmem:[#allocation9 + $0x1a0] sm:$0xff]  ;;  %v1851_v17 = vld [vmem:[#allocation9 + $0x1b0] sm:$0xff] }
 0xd0c   :  { %v4095_v50 = vpack.c.bf16 %v1851_v17, %v1849_v26  ;;  %v1855_v54 = vld [vmem:[#allocation9 + $0x1d0] sm:$0xff] }
 0xd14   :  { %v5846_v43 = vpop.eup %4665 }
 0xd15   :  { %v5848_v51 = vpop.eup %4667  ;;  %1689 = vmatprep.mubr.f32.mxu0 %v5846_v43 }
 0xd16   :  { %1690 = vmatmul.mubr.f32.vlgmr.msra.gmra.mrb[26].mxu0 %v5848_v51 }
 0xd17   :  { %4044 = vmatpush1.bf16.msra.mxu0 %v4043_v48  ;;  %v1834_v48 = vld [vmem:[#allocation9 + $0x128] sm:$0xff] }
 0xd18   :  { %4046 = vmatprep.subr.bf16.mxu0 %v4045_v23  ;;  %v1836_v23 = vld [vmem:[#allocation9 + $0x138] sm:$0xff] }
 0xd19   :  { %v4077_v53 = vpack.c.bf16 %v1836_v23, %v1834_v48  ;;  %v4103_v48 = vpack.c.bf16 %v1859_v29, %v1857_v28  ;;  %v2003_v23 = vld [vmem:[#allocation11 + $0x8] sm:$0xff] }
 0xd1a   :  { %v2039_v29 = vld [vmem:[#allocation11 + $0x128] sm:$0xff] }
 0xd1b   :  { %4048 = vmatpush1.bf16.msra.mxu0 %v4047_v32  ;;  %v1838_v32 = vld [vmem:[#allocation9 + $0x148] sm:$0xff] }
 0xd1c   :  { %4050 = vmatprep.subr.bf16.mxu0 %v4049_v44  ;;  %v1840_v44 = vld [vmem:[#allocation9 + $0x158] sm:$0xff] }
 0xd1d   :  { %v4081_v52 = vpack.c.bf16 %v1840_v44, %v1838_v32  ;;  %v2007_v32 = vld [vmem:[#allocation11 + $0x28] sm:$0xff]  ;;  %v2009_v44 = vld [vmem:[#allocation11 + $0x38] sm:$0xff] }
 0xd1f   :  { %4052 = vmatpush1.bf16.msra.mxu0 %v4051_v15  ;;  %v1842_v15 = vld [vmem:[#allocation9 + $0x168] sm:$0xff] }
 0xd20   :  { %4054 = vmatprep.subr.bf16.mxu0 %v4053_v33  ;;  %v1844_v33 = vld [vmem:[#allocation9 + $0x178] sm:$0xff] }
 0xd21   :  { %v4085_v18 = vpack.c.bf16 %v1844_v33, %v1842_v15  ;;  %v2011_v15 = vld [vmem:[#allocation11 + $0x48] sm:$0xff]  ;;  %v2013_v33 = vld [vmem:[#allocation11 + $0x58] sm:$0xff] }
 0xd23   :  { %4056 = vmatpush1.bf16.msra.mxu0 %v4055_v38  ;;  %v4087_v38 = vpack.c.bf16 %v1843_v37, %v1841_v16  ;;  %v2010_v16 = vld [vmem:[#allocation11 + $0x40] sm:$0xff]  ;;  %v2012_v37 = vld [vmem:[#allocation11 + $0x50] sm:$0xff] }
 0xd24   :  { %4058 = vmatprep.subr.bf16.mxu0 %v4057_v11 }
 0xd27   :  { %4060 = vmatpush1.bf16.msra.mxu0 %v4059_v0 }
 0xd28   :  { %4062 = vmatprep.subr.bf16.mxu0 %v4061_v42  ;;  %v1846_v42 = vld [vmem:[#allocation9 + $0x188] sm:$0xff] }
 0xd29   :  { %v4089_v61 = vpack.c.bf16 %v1848_v13, %v1846_v42  ;;  %v2016_v42 = vld [vmem:[#allocation11 + $0x70] sm:$0xff]  ;;  %v2019_v13 = vld [vmem:[#allocation11 + $0x88] sm:$0xff] }
 0xd2b   :  { %4064 = vmatpush1.bf16.msra.mxu0 %v4063_v59  ;;  %v4091_v59 = vpack.c.bf16 %v1847_v47, %v1845_v8 }
 0xd2c   :  { %4066 = vmatprep.subr.bf16.mxu0 %v4065_v7 }
 0xd2f   :  { %4068 = vmatpush1.bf16.msra.mxu0 %v4067_v27  ;;  %v1856_v27 = vld [vmem:[#allocation9 + $0x1d8] sm:$0xff] }
 0xd30   :  { %4070 = vmatprep.subr.bf16.mxu0 %v4069_v49  ;;  %v1853_v49 = vld [vmem:[#allocation9 + $0x1c0] sm:$0xff]  ;;  %v4097_v55 = vpack.c.bf16 %v1856_v27, %v1854_v24 }
 0xd31   :  { %v2030_v27 = vld [vmem:[#allocation11 + $0xe0] sm:$0xff] }
 0xd33   :  { %4072 = vmatpush1.bf16.msra.mxu0 %v4071_v45  ;;  %v4099_v45 = vpack.c.bf16 %v1855_v54, %v1853_v49  ;;  %v2032_v49 = vld [vmem:[#allocation11 + $0xf0] sm:$0xff]  ;;  %v2035_v54 = vld [vmem:[#allocation11 + $0x108] sm:$0xff] }
 0xd34   :  { %4074 = vmatprep.subr.bf16.mxu0 %v4073_v25  ;;  %v4101_v25 = vpack.c.bf16 %v1860_v21, %v1858_v3  ;;  %v2037_v3 = vld [vmem:[#allocation11 + $0x118] sm:$0xff] }
 0xd35   :  { %v5940_v21 = vpack.c.bf16 %v2037_v3, %v2035_v54  ;;  %v2064_v54 = vld [vmem:[#allocation11 + $0x1f0] sm:$0xff] }
 0xd37   :  { %4076 = vmatpush1.bf16.msra.mxu0 %v4075_v41  ;;  %v2005_v41 = vld [vmem:[#allocation11 + $0x18] sm:$0xff] }
 0xd38   :  { %4078 = vmatprep.subr.bf16.mxu0 %v4077_v53  ;;  %v2002_v53 = vld [vmem:[#allocation11] sm:$0xff]  ;;  %v5860_v62 = vpack.c.bf16 %v2005_v41, %v2003_v23 }
 0xd39   :  { %v2038_v41 = vld [vmem:[#allocation11 + $0x120] sm:$0xff] }
 0xd3a   :  { %4106 = vmatprep.subr.bf16.mxu1 %v5860_v62 }
 0xd3b   :  { %4080 = vmatpush1.bf16.msra.mxu0 %v4079_v31  ;;  %v5862_v31 = vpack.c.bf16 %v2004_v10, %v2002_v53  ;;  %v2040_v53 = vld [vmem:[#allocation11 + $0x130] sm:$0xff] }
 0xd3c   :  { %4082 = vmatprep.subr.bf16.mxu0 %v4081_v52  ;;  %v5864_v52 = vpack.c.bf16 %v2009_v44, %v2007_v32  ;;  %v5950_v10 = vpack.c.bf16 %v2040_v53, %v2038_v41  ;;  %v2043_v32 = vld [vmem:[#allocation11 + $0x148] sm:$0xff]  ;;  %v2045_v44 = vld [vmem:[#allocation11 + $0x158] sm:$0xff] }
 0xd3f   :  { %4084 = vmatpush1.bf16.msra.mxu0 %v4083_v63  ;;  %v5869_v63 = vpack.c.bf16 %v2008_v34, %v2006_v9  ;;  %v5956_v9 = vpack.c.bf16 %v2045_v44, %v2043_v32  ;;  %v2042_v34 = vld [vmem:[#allocation11 + $0x140] sm:$0xff] }
 0xd40   :  { %4086 = vmatprep.subr.bf16.mxu0 %v4085_v18  ;;  %v5872_v18 = vpack.c.bf16 %v2013_v33, %v2011_v15  ;;  %v2044_v15 = vld [vmem:[#allocation11 + $0x150] sm:$0xff] }
 0xd41   :  { %v5958_v33 = vpack.c.bf16 %v2044_v15, %v2042_v34 }
 0xd43   :  { %4088 = vmatpush1.bf16.msra.mxu0 %v4087_v38  ;;  %v2015_v38 = vld [vmem:[#allocation11 + $0x68] sm:$0xff] }
 0xd44   :  { %4090 = vmatprep.subr.bf16.mxu0 %v4089_v61  ;;  %v2021_v61 = vld [vmem:[#allocation11 + $0x98] sm:$0xff] }
 0xd45   :  { %v5884_v47 = vpack.c.bf16 %v2021_v61, %v2019_v13  ;;  %v2051_v13 = vld [vmem:[#allocation11 + $0x188] sm:$0xff]  ;;  %v2053_v61 = vld [vmem:[#allocation11 + $0x198] sm:$0xff] }
 0xd47   :  { %4092 = vmatpush1.bf16.msra.mxu0 %v4091_v59  ;;  %v2018_v59 = vld [vmem:[#allocation11 + $0x80] sm:$0xff] }
 0xde9   :  { %v1691_v11 = vpop.f32.mrb[26].mxu0 }
 0xdea   :  { %v1696_v5 = vadd.f32 %v1691_v11, %v5645_v30  ;;  %v1693_v20 = vpop.f32.mrb[27].mxu0  ;;  %v1850_v30 = vld [vmem:[#allocation9 + $0x1a8] sm:$0xff]  ;;  %v2017_v11 = vld [vmem:[#allocation11 + $0x78] sm:$0xff] }
 0xdeb   :  { %v1697_v60 = vadd.f32 %v1693_v20, %v5627_v40  ;;  %v1852_v40 = vld [vmem:[#allocation9 + $0x1b8] sm:$0xff]  ;;  %v5878_v20 = vpack.c.bf16 %v2017_v11, %v2015_v38  ;;  %v2046_v11 = vld [vmem:[#allocation11 + $0x160] sm:$0xff] }
 0xdec   :  { %v4093_v7 = vpack.c.bf16 %v1852_v40, %v1850_v30  ;;  %v2020_v30 = vld [vmem:[#allocation11 + $0x90] sm:$0xff] }
 0xded   :  { %4669 = vtanh.f32 %v1697_v60  ;;  %v2014_v60 = vld [vmem:[#allocation11 + $0x60] sm:$0xff]  ;;  %v5887_v40 = vpack.c.bf16 %v2020_v30, %v2018_v59  ;;  %v5972_v59 = vpack.c.bf16 %v2053_v61, %v2051_v13 }
 0xdee   :  { %4671 = vtanh.f32 %v1696_v5  ;;  %4094 = vmatprep.subr.bf16.mxu0 %v4093_v7  ;;  %v5875_v5 = vpack.c.bf16 %v2012_v37, %v2010_v16  ;;  %v5881_v8 = vpack.c.bf16 %v2016_v42, %v2014_v60  ;;  %v2047_v16 = vld [vmem:[#allocation11 + $0x168] sm:$0xff]  ;;  %v2049_v37 = vld [vmem:[#allocation11 + $0x178] sm:$0xff]  ;;  %v2048_v60 = vld [vmem:[#allocation11 + $0x170] sm:$0xff] }
 0xdef   :  { %4096 = vmatpush1.bf16.msra.mxu0 %v4095_v50  ;;  %v5964_v38 = vpack.c.bf16 %v2049_v37, %v2047_v16  ;;  %v5966_v42 = vpack.c.bf16 %v2048_v60, %v2046_v11  ;;  %v2050_v30 = vld [vmem:[#allocation11 + $0x180] sm:$0xff] }
 0xdf0   :  { %4098 = vmatprep.subr.bf16.mxu0 %v4097_v55  ;;  %v5934_v55 = vpack.c.bf16 %v2032_v49, %v2030_v27  ;;  %v2062_v49 = vld [vmem:[#allocation11 + $0x1e0] sm:$0xff] }
 0xdf1   :  { %v5997_v3 = vpack.c.bf16 %v2064_v54, %v2062_v49 }
 0xdf3   :  { %4100 = vmatpush1.bf16.msra.mxu0 %v4099_v45  ;;  %v2034_v45 = vld [vmem:[#allocation11 + $0x100] sm:$0xff] }
 0xdf4   :  { %4102 = vmatprep.subr.bf16.mxu0 %v4101_v25  ;;  %v2036_v25 = vld [vmem:[#allocation11 + $0x110] sm:$0xff] }
 0xdf5   :  { %v5942_v28 = vpack.c.bf16 %v2036_v25, %v2034_v45  ;;  %v1861_v45 = vld [vmem:[%s6339_s9] sm:$0x3] }
 0xdf6   :  { %v1870_v25 = vrot.slane %v1861_v45, %v5226_v2  ;;  %v1866_v53 = vrot.slane %v1861_v45, %v5232_v6 }
 0xdf7   :  { %v5854_v19 = vpop.eup %4669  ;;  %4104 = vmatpush1.bf16.msra.mxu0 %v4103_v48  ;;  %v2041_v48 = vld [vmem:[#allocation11 + $0x138] sm:$0xff] }
 0xdf8   :  { %v5856_v0 = vpop.eup %4671  ;;  %1768 = vmatprep.mubr.f32.mxu1 %v5854_v19  ;;  %4170 = vmatprep.subr.bf16.mxu0 %v5860_v62  ;;  %v5948_v23 = vpack.c.bf16 %v2041_v48, %v2039_v29 }
 0xdf9   :  { %1769 = vmatmul.mubr.f32.vlgmr.msra.gmra.mrb[30].mxu1 %v5856_v0 }
 0xdfa   :  { %4108 = vmatpush1.bf16.msra.mxu1 %v5862_v31 }
 0xdfb   :  { %4110 = vmatprep.subr.bf16.mxu1 %v5864_v52 }
 0xdfe   :  { %4112 = vmatpush1.bf16.msra.mxu1 %v5869_v63 }
 0xdff   :  { %4114 = vmatprep.subr.bf16.mxu1 %v5872_v18 }
 0xe02   :  { %4116 = vmatpush1.bf16.msra.mxu1 %v5875_v5 }
 0xe03   :  { %4118 = vmatprep.subr.bf16.mxu1 %v5878_v20 }
 0xe06   :  { %4120 = vmatpush1.bf16.msra.mxu1 %v5881_v8 }
 0xe07   :  { %4122 = vmatprep.subr.bf16.mxu1 %v5884_v47 }
 0xe0a   :  { %4124 = vmatpush1.bf16.msra.mxu1 %v5887_v40 }
 0xecc   :  { %v1770_v7 = vpop.f32.mrb[30].mxu1 }
 0xecd   :  { %v1775_v26 = vadd.f32 %v1770_v7, %v5647_v14  ;;  %v1772_v17 = vpop.f32.mrb[31].mxu1  ;;  %v2023_v14 = vld [vmem:[#allocation11 + $0xa8] sm:$0xff]  ;;  %v2052_v7 = vld [vmem:[#allocation11 + $0x190] sm:$0xff] }
 0xece   :  { %v1776_v50 = vadd.f32 %v1772_v17, %v5622_v1  ;;  %v2055_v17 = vld [vmem:[#allocation11 + $0x1a8] sm:$0xff] }
 0xed0   :  { %4673 = vtanh.f32 %v1776_v50  ;;  %v2057_v50 = vld [vmem:[#allocation11 + $0x1b8] sm:$0xff] }
 0xed1   :  { %4675 = vtanh.f32 %v1775_v26  ;;  %v5974_v26 = vpack.c.bf16 %v2052_v7, %v2050_v30 }
 0xeda   :  { %v4674_v24 = vpop.eup %4673 }
 0xedb   :  { %1937 = vmatprep.mubr.f32.mxu0 %v4674_v24  ;;  %v4676_v1 = vpop.eup %4675  ;;  %v5980_v24 = vpack.c.bf16 %v2057_v50, %v2055_v17 }
 0xedc   :  { %1938 = vmatmul.mubr.f32.vlgmr.msra.gmra.mrb[28].mxu0 %v5651_v58  ;;  %v2025_v58 = vld [vmem:[#allocation11 + $0xb8] sm:$0xff] }
 0xedd   :  { %1943 = vmatprep.mubr.f32.mxu0 %v5854_v19  ;;  %4172 = vmatpush1.bf16.msra.mxu0 %v5862_v31  ;;  %v2033_v19 = vld [vmem:[#allocation11 + $0xf8] sm:$0xff] }
 0xede   :  { %4174 = vmatprep.subr.bf16.mxu0 %v5864_v52 }
 0xee0   :  { %1944 = vmatmul.mubr.f32.gmra.mrb[30].mxu0 %v5690_v12  ;;  %v5916_v12 = vpack.c.bf16 %v2025_v58, %v2023_v14  ;;  %v2056_v14 = vld [vmem:[#allocation11 + $0x1b0] sm:$0xff] }
 0xee1   :  { %1949 = vmatprep.mubr.f32.mxu0 %v5846_v43  ;;  %4176 = vmatpush1.bf16.msra.mxu0 %v5869_v63 }
 0xee2   :  { %4178 = vmatprep.subr.bf16.mxu0 %v5872_v18  ;;  %4126 = vmatprep.subr.bf16.mxu1 %v5916_v12 }
 0xee4   :  { %1950 = vmatmul.mubr.f32.gmra.mrb[32].mxu0 %v5730_v36  ;;  %v2022_v36 = vld [vmem:[#allocation11 + $0xa0] sm:$0xff] }
 0xee5   :  { %1955 = vmatprep.mubr.f32.mxu0 %v5807_v56  ;;  %4180 = vmatpush1.bf16.msra.mxu0 %v5875_v5  ;;  %v2026_v56 = vld [vmem:[#allocation11 + $0xc0] sm:$0xff] }
 0xee6   :  { %4182 = vmatprep.subr.bf16.mxu0 %v5878_v20 }
 0xee8   :  { %1956 = vmatmul.mubr.f32.gmra.mrb[34].mxu0 %v5770_v57 }
 0xee9   :  { %1961 = vmatprep.mubr.f32.mxu0 %v5768_v35  ;;  %4184 = vmatpush1.bf16.msra.mxu0 %v5881_v8  ;;  %v2024_v35 = vld [vmem:[#allocation11 + $0xb0] sm:$0xff] }
 0xeea   :  { %4186 = vmatprep.subr.bf16.mxu0 %v5884_v47  ;;  %v5918_v57 = vpack.c.bf16 %v2024_v35, %v2022_v36  ;;  %v2059_v36 = vld [vmem:[#allocation11 + $0x1c8] sm:$0xff]  ;;  %v2061_v35 = vld [vmem:[#allocation11 + $0x1d8] sm:$0xff] }
 0xeec   :  { %1962 = vmatmul.mubr.f32.gmra.mrb[36].mxu0 %v5809_v4  ;;  %4128 = vmatpush1.bf16.msra.mxu1 %v5918_v57  ;;  %v2028_v4 = vld [vmem:[#allocation11 + $0xd0] sm:$0xff] }
 0xeed   :  { %1967 = vmatprep.mubr.f32.mxu0 %v5728_v22  ;;  %4188 = vmatpush1.bf16.msra.mxu0 %v5887_v40  ;;  %v2029_v22 = vld [vmem:[#allocation11 + $0xd8] sm:$0xff]  ;;  %v5926_v43 = vpack.c.bf16 %v2028_v4, %v2026_v56  ;;  %v2060_v56 = vld [vmem:[#allocation11 + $0x1d0] sm:$0xff]  ;;  %v2063_v4 = vld [vmem:[#allocation11 + $0x1e8] sm:$0xff] }
 0xeee   :  { %4190 = vmatprep.subr.bf16.mxu0 %v5916_v12 }
 0xef0   :  { %1968 = vmatmul.mubr.f32.gmra.mrb[38].mxu0 %v5848_v51  ;;  %v2031_v51 = vld [vmem:[#allocation11 + $0xe8] sm:$0xff] }
 0xef1   :  { %1973 = vmatprep.mubr.f32.mxu0 %v5688_v46  ;;  %v2027_v46 = vld [vmem:[#allocation11 + $0xc8] sm:$0xff]  ;;  %4192 = vmatpush1.bf16.msra.mxu0 %v5918_v57 }
 0xef4   :  { %1974 = vmatmul.mubr.f32.gmra.mrb[40].mxu0 %v5856_v0  ;;  %v5932_v0 = vpack.c.bf16 %v2033_v19, %v2031_v51  ;;  %v2065_v51 = vld [vmem:[#allocation11 + $0x1f8] sm:$0xff] }
 0xef5   :  { %1979 = vmatprep.mubr.f32.mxu0 %v5649_v39  ;;  %v5924_v39 = vpack.c.bf16 %v2029_v22, %v2027_v46  ;;  %v2058_v46 = vld [vmem:[#allocation11 + $0x1c0] sm:$0xff]  ;;  %v5987_v22 = vpack.c.bf16 %v2061_v35, %v2059_v36  ;;  %v5992_v27 = vpack.c.bf16 %v2065_v51, %v2063_v4 }
 0xef6   :  { %v5990_v19 = vpack.c.bf16 %v2060_v56, %v2058_v46 }
 0xef7   :  { %4130 = vmatprep.subr.bf16.mxu1 %v5924_v39  ;;  %4194 = vmatprep.subr.bf16.mxu0 %v5924_v39 }
 0xef8   :  { %1980 = vmatmul.mubr.f32.gmra.mrb[42].mxu0 %v4676_v1  ;;  %4132 = vmatpush1.bf16.msra.mxu1 %v5926_v43  ;;  %v2054_v1 = vld [vmem:[#allocation11 + $0x1a0] sm:$0xff] }
 0xef9   :  { %4196 = vmatpush1.bf16.msra.mxu0 %v5926_v43  ;;  %4134 = vmatprep.subr.bf16.mxu1 %v5932_v0  ;;  %v5982_v58 = vpack.c.bf16 %v2056_v14, %v2054_v1 }
 0xefa   :  { %4198 = vmatprep.subr.bf16.mxu0 %v5932_v0 }
 0xefc   :  { %4136 = vmatpush1.bf16.msra.mxu1 %v5934_v55 }
 0xefd   :  { %4200 = vmatpush1.bf16.msra.mxu0 %v5934_v55  ;;  %4138 = vmatprep.subr.bf16.mxu1 %v5940_v21 }
 0xefe   :  { %4202 = vmatprep.subr.bf16.mxu0 %v5940_v21 }
 0xf00   :  { %4140 = vmatpush1.bf16.msra.mxu1 %v5942_v28 }
 0xf01   :  { %4204 = vmatpush1.bf16.msra.mxu0 %v5942_v28  ;;  %4142 = vmatprep.subr.bf16.mxu1 %v5948_v23 }
 0xf02   :  { %4206 = vmatprep.subr.bf16.mxu0 %v5948_v23 }
 0xf04   :  { %4144 = vmatpush1.bf16.msra.mxu1 %v5950_v10 }
 0xf05   :  { %4208 = vmatpush1.bf16.msra.mxu0 %v5950_v10  ;;  %4146 = vmatprep.subr.bf16.mxu1 %v5956_v9 }
 0xf06   :  { %4210 = vmatprep.subr.bf16.mxu0 %v5956_v9 }
 0xf08   :  { %4148 = vmatpush1.bf16.msra.mxu1 %v5958_v33 }
 0xf09   :  { %4212 = vmatpush1.bf16.msra.mxu0 %v5958_v33  ;;  %4150 = vmatprep.subr.bf16.mxu1 %v5964_v38 }
 0xf0a   :  { %4214 = vmatprep.subr.bf16.mxu0 %v5964_v38 }
 0xf0c   :  { %4152 = vmatpush1.bf16.msra.mxu1 %v5966_v42 }
 0xf0d   :  { %4216 = vmatpush1.bf16.msra.mxu0 %v5966_v42  ;;  %4154 = vmatprep.subr.bf16.mxu1 %v5972_v59 }
 0xf0e   :  { %4218 = vmatprep.subr.bf16.mxu0 %v5972_v59 }
 0xf10   :  { %4156 = vmatpush1.bf16.msra.mxu1 %v5974_v26 }
 0xf11   :  { %4220 = vmatpush1.bf16.msra.mxu0 %v5974_v26  ;;  %4158 = vmatprep.subr.bf16.mxu1 %v5980_v24 }
 0xf12   :  { %4222 = vmatprep.subr.bf16.mxu0 %v5980_v24 }
 0xf14   :  { %4160 = vmatpush1.bf16.msra.mxu1 %v5982_v58 }
 0xf15   :  { %4224 = vmatpush1.bf16.msra.mxu0 %v5982_v58  ;;  %4162 = vmatprep.subr.bf16.mxu1 %v5987_v22 }
 0xf16   :  { %4226 = vmatprep.subr.bf16.mxu0 %v5987_v22 }
 0xf18   :  { %4164 = vmatpush1.bf16.msra.mxu1 %v5990_v19 }
 0xf19   :  { %4228 = vmatpush1.bf16.msra.mxu0 %v5990_v19  ;;  %4166 = vmatprep.subr.bf16.mxu1 %v5992_v27 }
 0xf1a   :  { %4230 = vmatprep.subr.bf16.mxu0 %v5992_v27 }
 0xf1c   :  { %4168 = vmatpush1.bf16.msra.mxu1 %v5997_v3 }
 0xf1d   :  { %4232 = vmatpush1.bf16.msra.mxu0 %v5997_v3  ;;  %4234 = vmatprep.subr.bf16.mxu1 %v5860_v62 }
 0xf1e   :  { %4298 = vmatprep.subr.bf16.mxu0 %v5860_v62 }
 0xfaf   :  { %v1939_v29 = vpop.f32.mrb[28].mxu0 }
 0xfb0   :  { %v1941_v48 = vpop.f32.mrb[29].mxu0  ;;  %v1940_v54 = vadd.f32 %v1939_v29, %v1866_v53 }
 0xfb1   :  { %v6010_v41 = vadd.f32 %v1941_v48, %v1870_v25 }
 0xfb3   :  { %v1945_v32 = vpop.f32.mrb[30].mxu0 }
 0xfb4   :  { %v6013_v44 = vadd.f32 %v1945_v32, %v1866_v53  ;;  %v1947_v34 = vpop.f32.mrb[31].mxu0 }
 0xfb5   :  { %v6015_v15 = vadd.f32 %v1947_v34, %v1870_v25 }
 0xfb7   :  { %v1951_v16 = vpop.f32.mrb[32].mxu0 }
 0xfb8   :  { %v6017_v37 = vadd.f32 %v1951_v16, %v1866_v53  ;;  %v1953_v11 = vpop.f32.mrb[33].mxu0 }
 0xfb9   :  { %v6019_v60 = vadd.f32 %v1953_v11, %v1870_v25 }
 0xfbb   :  { %v1957_v13 = vpop.f32.mrb[34].mxu0 }
 0xfbc   :  { %v6021_v2 = vadd.f32 %v1957_v13, %v1866_v53  ;;  %v1959_v61 = vpop.f32.mrb[35].mxu0 }
 0xfbd   :  { %v6023_v30 = vadd.f32 %v1959_v61, %v1870_v25 }
 0xfbf   :  { %v1963_v7 = vpop.f32.mrb[36].mxu0 }
 0xfc0   :  { %v6025_v6 = vadd.f32 %v1963_v7, %v1866_v53  ;;  %v1965_v17 = vpop.f32.mrb[37].mxu0 }
 0xfc1   :  { %v6027_v50 = vadd.f32 %v1965_v17, %v1870_v25 }
 0xfc3   :  { %v1969_v1 = vpop.f32.mrb[38].mxu0 }
 0xfc4   :  { %v6029_v14 = vadd.f32 %v1969_v1, %v1866_v53  ;;  %v1971_v36 = vpop.f32.mrb[39].mxu0 }
 0xfc5   :  { %v6031_v35 = vadd.f32 %v1971_v36, %v1870_v25 }
 0xfc7   :  { %v1975_v46 = vpop.f32.mrb[40].mxu0 }
 0xfc8   :  { %v6033_v56 = vadd.f32 %v1975_v46, %v1866_v53  ;;  %v1977_v4 = vpop.f32.mrb[41].mxu0 }
 0xfc9   :  { %v1978_v51 = vadd.f32 %v1977_v4, %v1870_v25 }
 0xfcb   :  { %v1981_v49 = vpop.f32.mrb[42].mxu0 }
 0xfcc   :  { %v6035_v45 = vadd.f32 %v1981_v49, %v1866_v53  ;;  %v1983_v48 = vpop.f32.mrb[43].mxu0 }
 0xfcd   :  { %v1984_v32 = vadd.f32 %v1983_v48, %v1870_v25 }
 0xfcf   :  { %4677 = vtanh.f32 %v1984_v32 }
 0xfd0   :  { %4679 = vtanh.f32 %v1940_v54 }
 0xfd9   :  { %v6037_v34 = vpop.eup %4677 }
 0xfda   :  { %v6039_v16 = vpop.eup %4679  ;;  %2138 = vmatprep.mubr.f32.mxu1 %v6037_v34 }
 0xfdb   :  { %2139 = vmatmul.mubr.f32.vlgmr.msra.gmra.mrb[32].mxu1 %v6039_v16 }
 0xfdc   :  { %4236 = vmatpush1.bf16.msra.mxu1 %v5862_v31 }
 0xfdd   :  { %4238 = vmatprep.subr.bf16.mxu1 %v5864_v52 }
 0xfe0   :  { %4240 = vmatpush1.bf16.msra.mxu1 %v5869_v63 }
 0xfe1   :  { %4242 = vmatprep.subr.bf16.mxu1 %v5872_v18 }
 0xfe4   :  { %4244 = vmatpush1.bf16.msra.mxu1 %v5875_v5 }
 0xfe5   :  { %4246 = vmatprep.subr.bf16.mxu1 %v5878_v20 }
 0xfe8   :  { %4248 = vmatpush1.bf16.msra.mxu1 %v5881_v8 }
 0xfe9   :  { %4250 = vmatprep.subr.bf16.mxu1 %v5884_v47 }
 0xfec   :  { %4252 = vmatpush1.bf16.msra.mxu1 %v5887_v40 }
 0xfed   :  { %4254 = vmatprep.subr.bf16.mxu1 %v5916_v12 }
 0xff0   :  { %4256 = vmatpush1.bf16.msra.mxu1 %v5918_v57 }
 0xff1   :  { %4258 = vmatprep.subr.bf16.mxu1 %v5924_v39 }
 0xff4   :  { %4260 = vmatpush1.bf16.msra.mxu1 %v5926_v43 }
 0xff5   :  { %4262 = vmatprep.subr.bf16.mxu1 %v5932_v0 }
 0xff8   :  { %4264 = vmatpush1.bf16.msra.mxu1 %v5934_v55 }
 0xff9   :  { %4266 = vmatprep.subr.bf16.mxu1 %v5940_v21 }
 0xffc   :  { %4268 = vmatpush1.bf16.msra.mxu1 %v5942_v28 }
 0xffd   :  { %4270 = vmatprep.subr.bf16.mxu1 %v5948_v23 }
0x1000   :  { %4272 = vmatpush1.bf16.msra.mxu1 %v5950_v10 }
0x1001   :  { %4274 = vmatprep.subr.bf16.mxu1 %v5956_v9 }
0x1004   :  { %4276 = vmatpush1.bf16.msra.mxu1 %v5958_v33 }
0x1005   :  { %4278 = vmatprep.subr.bf16.mxu1 %v5964_v38 }
0x1008   :  { %4280 = vmatpush1.bf16.msra.mxu1 %v5966_v42 }
0x1009   :  { %4282 = vmatprep.subr.bf16.mxu1 %v5972_v59 }
0x100c   :  { %4284 = vmatpush1.bf16.msra.mxu1 %v5974_v26 }
0x100d   :  { %4286 = vmatprep.subr.bf16.mxu1 %v5980_v24 }
0x1010   :  { %4288 = vmatpush1.bf16.msra.mxu1 %v5982_v58 }
0x1011   :  { %4290 = vmatprep.subr.bf16.mxu1 %v5987_v22 }
0x1014   :  { %4292 = vmatpush1.bf16.msra.mxu1 %v5990_v19 }
0x1015   :  { %4294 = vmatprep.subr.bf16.mxu1 %v5992_v27 }
0x1018   :  { %4296 = vmatpush1.bf16.msra.mxu1 %v5997_v3 }
0x1019   :  { %4362 = vmatprep.subr.bf16.mxu1 %v5860_v62 }
0x10ae   :  { %v2140_v25 = vpop.f32.mrb[32].mxu1 }
0x10af   :  { %v2145_v29 = vadd.f32 %v2140_v25, %v6013_v44  ;;  %v2142_v53 = vpop.f32.mrb[33].mxu1 }
0x10b0   :  { %v2146_v11 = vadd.f32 %v2142_v53, %v1978_v51  ;;  %v2665_v53 = vld [vmem:[#allocation12 + $0xc0] sm:$0xff] }
0x10b2   :  { %4681 = vtanh.f32 %v2146_v11  ;;  %v2666_v11 = vld [vmem:[#allocation12 + $0xc8] sm:$0xff] }
0x10b3   :  { %4683 = vtanh.f32 %v2145_v29 }
0x10bc   :  { %v6076_v13 = vpop.eup %4681 }
0x10bd   :  { %v6078_v61 = vpop.eup %4683  ;;  %2217 = vmatprep.mubr.f32.mxu0 %v6076_v13 }
0x10be   :  { %2218 = vmatmul.mubr.f32.vlgmr.msra.gmra.mrb[44].mxu0 %v6078_v61 }
0x10bf   :  { %4300 = vmatpush1.bf16.msra.mxu0 %v5862_v31 }
0x10c0   :  { %4302 = vmatprep.subr.bf16.mxu0 %v5864_v52 }
0x10c3   :  { %4304 = vmatpush1.bf16.msra.mxu0 %v5869_v63 }
0x10c4   :  { %4306 = vmatprep.subr.bf16.mxu0 %v5872_v18 }
0x10c7   :  { %4308 = vmatpush1.bf16.msra.mxu0 %v5875_v5 }
0x10c8   :  { %4310 = vmatprep.subr.bf16.mxu0 %v5878_v20 }
0x10cb   :  { %4312 = vmatpush1.bf16.msra.mxu0 %v5881_v8 }
0x10cc   :  { %4314 = vmatprep.subr.bf16.mxu0 %v5884_v47 }
0x10cf   :  { %4316 = vmatpush1.bf16.msra.mxu0 %v5887_v40 }
0x10d0   :  { %4318 = vmatprep.subr.bf16.mxu0 %v5916_v12 }
0x10d3   :  { %4320 = vmatpush1.bf16.msra.mxu0 %v5918_v57 }
0x10d4   :  { %4322 = vmatprep.subr.bf16.mxu0 %v5924_v39 }
0x10d7   :  { %4324 = vmatpush1.bf16.msra.mxu0 %v5926_v43 }
0x10d8   :  { %4326 = vmatprep.subr.bf16.mxu0 %v5932_v0 }
0x10db   :  { %4328 = vmatpush1.bf16.msra.mxu0 %v5934_v55 }
0x10dc   :  { %4330 = vmatprep.subr.bf16.mxu0 %v5940_v21 }
0x10df   :  { %4332 = vmatpush1.bf16.msra.mxu0 %v5942_v28 }
0x10e0   :  { %4334 = vmatprep.subr.bf16.mxu0 %v5948_v23 }
0x10e3   :  { %4336 = vmatpush1.bf16.msra.mxu0 %v5950_v10 }
0x10e4   :  { %4338 = vmatprep.subr.bf16.mxu0 %v5956_v9 }
0x10e7   :  { %4340 = vmatpush1.bf16.msra.mxu0 %v5958_v33 }
0x10e8   :  { %4342 = vmatprep.subr.bf16.mxu0 %v5964_v38 }
0x10eb   :  { %4344 = vmatpush1.bf16.msra.mxu0 %v5966_v42 }
0x10ec   :  { %4346 = vmatprep.subr.bf16.mxu0 %v5972_v59 }
0x10ef   :  { %4348 = vmatpush1.bf16.msra.mxu0 %v5974_v26 }
0x10f0   :  { %4350 = vmatprep.subr.bf16.mxu0 %v5980_v24 }
0x10f3   :  { %4352 = vmatpush1.bf16.msra.mxu0 %v5982_v58 }
0x10f4   :  { %4354 = vmatprep.subr.bf16.mxu0 %v5987_v22 }
0x10f7   :  { %4356 = vmatpush1.bf16.msra.mxu0 %v5990_v19 }
0x10f8   :  { %4358 = vmatprep.subr.bf16.mxu0 %v5992_v27 }
0x10fb   :  { %4360 = vmatpush1.bf16.msra.mxu0 %v5997_v3 }
0x10fc   :  { %4426 = vmatprep.subr.bf16.mxu0 %v5860_v62 }
0x1191   :  { %v2219_v44 = vpop.f32.mrb[44].mxu0 }
0x1192   :  { %v2224_v7 = vadd.f32 %v2219_v44, %v6017_v37  ;;  %v2221_v17 = vpop.f32.mrb[45].mxu0  ;;  %v4569_v44 = vpack.c.bf16 %v2666_v11, %v2665_v53 }
0x1193   :  { %v2225_v1 = vadd.f32 %v2221_v17, %v6031_v35  ;;  %v2650_v17 = vld [vmem:[#allocation12 + $0x48] sm:$0xff] }
0x1195   :  { %4685 = vtanh.f32 %v2225_v1 }
0x1196   :  { %4687 = vtanh.f32 %v2224_v7  ;;  %v2649_v7 = vld [vmem:[#allocation12 + $0x40] sm:$0xff] }
0x1197   :  { %v4571_v1 = vpack.c.bf16 %v2650_v17, %v2649_v7 }
0x119f   :  { %v6116_v36 = vpop.eup %4685 }
0x11a0   :  { %v6118_v46 = vpop.eup %4687  ;;  %2296 = vmatprep.mubr.f32.mxu1 %v6116_v36 }
0x11a1   :  { %2297 = vmatmul.mubr.f32.vlgmr.msra.gmra.mrb[34].mxu1 %v6118_v46 }
0x11a2   :  { %4364 = vmatpush1.bf16.msra.mxu1 %v5862_v31 }
0x11a3   :  { %4366 = vmatprep.subr.bf16.mxu1 %v5864_v52 }
0x11a6   :  { %4368 = vmatpush1.bf16.msra.mxu1 %v5869_v63 }
0x11a7   :  { %4370 = vmatprep.subr.bf16.mxu1 %v5872_v18 }
0x11aa   :  { %4372 = vmatpush1.bf16.msra.mxu1 %v5875_v5 }
0x11ab   :  { %4374 = vmatprep.subr.bf16.mxu1 %v5878_v20 }
0x11ae   :  { %4376 = vmatpush1.bf16.msra.mxu1 %v5881_v8 }
0x11af   :  { %4378 = vmatprep.subr.bf16.mxu1 %v5884_v47 }
0x11b2   :  { %4380 = vmatpush1.bf16.msra.mxu1 %v5887_v40 }
0x11b3   :  { %4382 = vmatprep.subr.bf16.mxu1 %v5916_v12 }
0x11b6   :  { %4384 = vmatpush1.bf16.msra.mxu1 %v5918_v57 }
0x11b7   :  { %4386 = vmatprep.subr.bf16.mxu1 %v5924_v39 }
0x11ba   :  { %4388 = vmatpush1.bf16.msra.mxu1 %v5926_v43 }
0x11bb   :  { %4390 = vmatprep.subr.bf16.mxu1 %v5932_v0 }
0x11be   :  { %4392 = vmatpush1.bf16.msra.mxu1 %v5934_v55 }
0x11bf   :  { %4394 = vmatprep.subr.bf16.mxu1 %v5940_v21 }
0x11c2   :  { %4396 = vmatpush1.bf16.msra.mxu1 %v5942_v28 }
0x11c3   :  { %4398 = vmatprep.subr.bf16.mxu1 %v5948_v23 }
0x11c6   :  { %4400 = vmatpush1.bf16.msra.mxu1 %v5950_v10 }
0x11c7   :  { %4402 = vmatprep.subr.bf16.mxu1 %v5956_v9 }
0x11ca   :  { %4404 = vmatpush1.bf16.msra.mxu1 %v5958_v33 }
0x11cb   :  { %4406 = vmatprep.subr.bf16.mxu1 %v5964_v38 }
0x11ce   :  { %4408 = vmatpush1.bf16.msra.mxu1 %v5966_v42 }
0x11cf   :  { %4410 = vmatprep.subr.bf16.mxu1 %v5972_v59 }
0x11d2   :  { %4412 = vmatpush1.bf16.msra.mxu1 %v5974_v26 }
0x11d3   :  { %4414 = vmatprep.subr.bf16.mxu1 %v5980_v24 }
0x11d6   :  { %4416 = vmatpush1.bf16.msra.mxu1 %v5982_v58 }
0x11d7   :  { %4418 = vmatprep.subr.bf16.mxu1 %v5987_v22 }
0x11da   :  { %4420 = vmatpush1.bf16.msra.mxu1 %v5990_v19 }
0x11db   :  { %4422 = vmatprep.subr.bf16.mxu1 %v5992_v27 }
0x11de   :  { %4424 = vmatpush1.bf16.msra.mxu1 %v5997_v3 }
0x11df   :  { %4490 = vmatprep.subr.bf16.mxu1 %v5860_v62 }
0x1274   :  { %v2298_v37 = vpop.f32.mrb[34].mxu1 }
0x1275   :  { %v2303_v35 = vadd.f32 %v2298_v37, %v6021_v2  ;;  %v2300_v4 = vpop.f32.mrb[35].mxu1  ;;  %v2668_v37 = vld [vmem:[#allocation12 + $0xd8] sm:$0xff] }
0x1276   :  { %v2304_v51 = vadd.f32 %v2300_v4, %v6027_v50  ;;  %v2652_v4 = vld [vmem:[#allocation12 + $0x58] sm:$0xff] }
0x1278   :  { %4689 = vtanh.f32 %v2304_v51 }
0x1279   :  { %4691 = vtanh.f32 %v2303_v35 }
0x1282   :  { %v6156_v49 = vpop.eup %4689 }
0x1283   :  { %v6158_v54 = vpop.eup %4691  ;;  %2375 = vmatprep.mubr.f32.mxu0 %v6156_v49 }
0x1284   :  { %2376 = vmatmul.mubr.f32.vlgmr.msra.gmra.mrb[46].mxu0 %v6158_v54 }
0x1285   :  { %4428 = vmatpush1.bf16.msra.mxu0 %v5862_v31 }
0x1286   :  { %4430 = vmatprep.subr.bf16.mxu0 %v5864_v52 }
0x1289   :  { %4432 = vmatpush1.bf16.msra.mxu0 %v5869_v63 }
0x128a   :  { %4434 = vmatprep.subr.bf16.mxu0 %v5872_v18 }
0x128d   :  { %4436 = vmatpush1.bf16.msra.mxu0 %v5875_v5 }
0x128e   :  { %4438 = vmatprep.subr.bf16.mxu0 %v5878_v20 }
0x1291   :  { %4440 = vmatpush1.bf16.msra.mxu0 %v5881_v8 }
0x1292   :  { %4442 = vmatprep.subr.bf16.mxu0 %v5884_v47 }
0x1295   :  { %4444 = vmatpush1.bf16.msra.mxu0 %v5887_v40 }
0x1296   :  { %4446 = vmatprep.subr.bf16.mxu0 %v5916_v12 }
0x1299   :  { %4448 = vmatpush1.bf16.msra.mxu0 %v5918_v57 }
0x129a   :  { %4450 = vmatprep.subr.bf16.mxu0 %v5924_v39 }
0x129d   :  { %4452 = vmatpush1.bf16.msra.mxu0 %v5926_v43 }
0x129e   :  { %4454 = vmatprep.subr.bf16.mxu0 %v5932_v0 }
0x12a1   :  { %4456 = vmatpush1.bf16.msra.mxu0 %v5934_v55 }
0x12a2   :  { %4458 = vmatprep.subr.bf16.mxu0 %v5940_v21 }
0x12a5   :  { %4460 = vmatpush1.bf16.msra.mxu0 %v5942_v28 }
0x12a6   :  { %4462 = vmatprep.subr.bf16.mxu0 %v5948_v23 }
0x12a9   :  { %4464 = vmatpush1.bf16.msra.mxu0 %v5950_v10 }
0x12aa   :  { %4466 = vmatprep.subr.bf16.mxu0 %v5956_v9 }
0x12ad   :  { %4468 = vmatpush1.bf16.msra.mxu0 %v5958_v33 }
0x12ae   :  { %4470 = vmatprep.subr.bf16.mxu0 %v5964_v38 }
0x12b1   :  { %4472 = vmatpush1.bf16.msra.mxu0 %v5966_v42 }
0x12b2   :  { %4474 = vmatprep.subr.bf16.mxu0 %v5972_v59 }
0x12b5   :  { %4476 = vmatpush1.bf16.msra.mxu0 %v5974_v26 }
0x12b6   :  { %4478 = vmatprep.subr.bf16.mxu0 %v5980_v24 }
0x12b9   :  { %4480 = vmatpush1.bf16.msra.mxu0 %v5982_v58 }
0x12ba   :  { %4482 = vmatprep.subr.bf16.mxu0 %v5987_v22 }
0x12bd   :  { %4484 = vmatpush1.bf16.msra.mxu0 %v5990_v19 }
0x12be   :  { %4486 = vmatprep.subr.bf16.mxu0 %v5992_v27 }
0x12c1   :  { %4488 = vmatpush1.bf16.msra.mxu0 %v5997_v3 }
0x1357   :  { %v2377_v62 = vpop.f32.mrb[46].mxu0 }
0x1358   :  { %v2382_v2 = vadd.f32 %v2377_v62, %v6025_v6  ;;  %v2379_v50 = vpop.f32.mrb[47].mxu0  ;;  %v2669_v62 = vld [vmem:[#allocation12 + $0xe0] sm:$0xff] }
0x1359   :  { %v2383_v48 = vadd.f32 %v2379_v50, %v6023_v30  ;;  %v2653_v50 = vld [vmem:[#allocation12 + $0x60] sm:$0xff] }
0x135b   :  { %4693 = vtanh.f32 %v2383_v48 }
0x135c   :  { %4695 = vtanh.f32 %v2382_v2  ;;  %v2670_v2 = vld [vmem:[#allocation12 + $0xe8] sm:$0xff] }
0x135d   :  { %v4577_v48 = vpack.c.bf16 %v2670_v2, %v2669_v62 }
0x1365   :  { %v6195_v32 = vpop.eup %4693 }
0x1366   :  { %v6197_v25 = vpop.eup %4695  ;;  %2454 = vmatprep.mubr.f32.mxu1 %v6195_v32 }
0x1367   :  { %2455 = vmatmul.mubr.f32.vlgmr.msra.gmra.mrb[36].mxu1 %v6197_v25 }
0x1368   :  { %4492 = vmatpush1.bf16.msra.mxu1 %v5862_v31 }
0x1369   :  { %4494 = vmatprep.subr.bf16.mxu1 %v5864_v52 }
0x136c   :  { %4496 = vmatpush1.bf16.msra.mxu1 %v5869_v63 }
0x136d   :  { %4498 = vmatprep.subr.bf16.mxu1 %v5872_v18 }
0x1370   :  { %4500 = vmatpush1.bf16.msra.mxu1 %v5875_v5 }
0x1371   :  { %4502 = vmatprep.subr.bf16.mxu1 %v5878_v20 }
0x1374   :  { %4504 = vmatpush1.bf16.msra.mxu1 %v5881_v8  ;;  %v2657_v8 = vld [vmem:[#allocation12 + $0x80] sm:$0xff] }
0x1375   :  { %4506 = vmatprep.subr.bf16.mxu1 %v5884_v47  ;;  %v2658_v47 = vld [vmem:[#allocation12 + $0x88] sm:$0xff] }
0x1378   :  { %4508 = vmatpush1.bf16.msra.mxu1 %v5887_v40  ;;  %v2641_v40 = vld [vmem:[#allocation12] sm:$0xff] }
0x1379   :  { %4510 = vmatprep.subr.bf16.mxu1 %v5916_v12  ;;  %v4553_v12 = vpack.c.bf16 %v2658_v47, %v2657_v8  ;;  %v2655_v47 = vld [vmem:[#allocation12 + $0x70] sm:$0xff] }
0x137b   :  { %4554 = vmatprep.subr.bf16.mxu0 %v4553_v12 }
0x137c   :  { %4512 = vmatpush1.bf16.msra.mxu1 %v5918_v57  ;;  %v2642_v57 = vld [vmem:[#allocation12 + $0x8] sm:$0xff] }
0x137d   :  { %4514 = vmatprep.subr.bf16.mxu1 %v5924_v39  ;;  %v2659_v39 = vld [vmem:[#allocation12 + $0x90] sm:$0xff] }
0x1380   :  { %4516 = vmatpush1.bf16.msra.mxu1 %v5926_v43  ;;  %v2660_v43 = vld [vmem:[#allocation12 + $0x98] sm:$0xff] }
0x1381   :  { %4518 = vmatprep.subr.bf16.mxu1 %v5932_v0  ;;  %v4555_v0 = vpack.c.bf16 %v2642_v57, %v2641_v40  ;;  %v2656_v40 = vld [vmem:[#allocation12 + $0x78] sm:$0xff]  ;;  %v2793_v57 = vld [vmem:[%s6342_s12] sm:$0xff] }
0x1382   :  { %v4583_v12 = vpack.c.bf16 %v2656_v40, %v2655_v47 }
0x1384   :  { %4520 = vmatpush1.bf16.msra.mxu1 %v5934_v55  ;;  %v4557_v55 = vpack.c.bf16 %v2660_v43, %v2659_v39  ;;  %v2794_v39 = vld [vmem:[%s6342_s12 + $0x8] sm:$0xff] }
0x1385   :  { %4522 = vmatprep.subr.bf16.mxu1 %v5940_v21  ;;  %v2643_v21 = vld [vmem:[#allocation12 + $0x10] sm:$0xff]  ;;  %v4585_v43 = vpack.c.bf16 %v2794_v39, %v2793_v57 }
0x1388   :  { %4524 = vmatpush1.bf16.msra.mxu1 %v5942_v28  ;;  %v2644_v28 = vld [vmem:[#allocation12 + $0x18] sm:$0xff] }
0x1389   :  { %4526 = vmatprep.subr.bf16.mxu1 %v5948_v23  ;;  %v2661_v23 = vld [vmem:[#allocation12 + $0xa0] sm:$0xff] }
0x138c   :  { %4528 = vmatpush1.bf16.msra.mxu1 %v5950_v10  ;;  %v2662_v10 = vld [vmem:[#allocation12 + $0xa8] sm:$0xff] }
0x138d   :  { %4530 = vmatprep.subr.bf16.mxu1 %v5956_v9  ;;  %v4559_v9 = vpack.c.bf16 %v2644_v28, %v2643_v21 }
0x1390   :  { %4532 = vmatpush1.bf16.msra.mxu1 %v5958_v33  ;;  %v4561_v33 = vpack.c.bf16 %v2662_v10, %v2661_v23  ;;  %v2795_v23 = vld [vmem:[%s6342_s12 + $0x10] sm:$0xff]  ;;  %v2796_v10 = vld [vmem:[%s6342_s12 + $0x18] sm:$0xff] }
0x1391   :  { %4534 = vmatprep.subr.bf16.mxu1 %v5964_v38  ;;  %v2645_v38 = vld [vmem:[#allocation12 + $0x20] sm:$0xff] }
0x1394   :  { %4536 = vmatpush1.bf16.msra.mxu1 %v5966_v42  ;;  %v2646_v42 = vld [vmem:[#allocation12 + $0x28] sm:$0xff] }
0x1395   :  { %4538 = vmatprep.subr.bf16.mxu1 %v5972_v59  ;;  %v2663_v59 = vld [vmem:[#allocation12 + $0xb0] sm:$0xff] }
0x1398   :  { %4540 = vmatpush1.bf16.msra.mxu1 %v5974_v26  ;;  %v2664_v26 = vld [vmem:[#allocation12 + $0xb8] sm:$0xff] }
0x1399   :  { %4542 = vmatprep.subr.bf16.mxu1 %v5980_v24  ;;  %v4563_v24 = vpack.c.bf16 %v2646_v42, %v2645_v38 }
0x139c   :  { %4544 = vmatpush1.bf16.msra.mxu1 %v5982_v58  ;;  %v4565_v58 = vpack.c.bf16 %v2664_v26, %v2663_v59 }
0x139d   :  { %4546 = vmatprep.subr.bf16.mxu1 %v5987_v22  ;;  %v2647_v22 = vld [vmem:[#allocation12 + $0x30] sm:$0xff] }
0x13a0   :  { %4548 = vmatpush1.bf16.msra.mxu1 %v5990_v19  ;;  %v2648_v19 = vld [vmem:[#allocation12 + $0x38] sm:$0xff] }
0x13a1   :  { %4550 = vmatprep.subr.bf16.mxu1 %v5992_v27  ;;  %v4567_v27 = vpack.c.bf16 %v2648_v19, %v2647_v22 }
0x13a4   :  { %4552 = vmatpush1.bf16.msra.mxu1 %v5997_v3 }
0x143a   :  { %v2456_v31 = vpop.f32.mrb[36].mxu1 }
0x143b   :  { %v2461_v52 = vadd.f32 %v2456_v31, %v6029_v14  ;;  %v2458_v63 = vpop.f32.mrb[37].mxu1  ;;  %v2654_v31 = vld [vmem:[#allocation12 + $0x68] sm:$0xff] }
0x143c   :  { %v2462_v18 = vadd.f32 %v2458_v63, %v6019_v60  ;;  %v2672_v63 = vld [vmem:[#allocation12 + $0xf8] sm:$0xff] }
0x143e   :  { %4697 = vtanh.f32 %v2462_v18  ;;  %v4579_v18 = vpack.c.bf16 %v2654_v31, %v2653_v50 }
0x143f   :  { %4699 = vtanh.f32 %v2461_v52  ;;  %v2671_v52 = vld [vmem:[#allocation12 + $0xf0] sm:$0xff] }
0x1440   :  { %v4581_v8 = vpack.c.bf16 %v2672_v63, %v2671_v52 }
0x1448   :  { %v6234_v5 = vpop.eup %4697 }
0x1449   :  { %v6236_v20 = vpop.eup %4699  ;;  %2533 = vmatprep.mubr.f32.mxu0 %v6234_v5 }
0x144a   :  { %2534 = vmatmul.mubr.f32.vlgmr.msra.gmra.mrb[48].mxu0 %v6236_v20 }
0x144b   :  { %4556 = vmatpush3.bf16.msra.mxu0 %v4555_v0 }
0x144c   :  { %4558 = vmatprep.subr.bf16.mxu0 %v4557_v55 }
0x144f   :  { %4560 = vmatpush3.bf16.msra.mxu0 %v4559_v9 }
0x1450   :  { %4562 = vmatprep.subr.bf16.mxu0 %v4561_v33  ;;  %v4589_v33 = vpack.c.bf16 %v2796_v10, %v2795_v23 }
0x1453   :  { %4564 = vmatpush3.bf16.msra.mxu0 %v4563_v24 }
0x1454   :  { %4566 = vmatprep.subr.bf16.mxu0 %v4565_v58 }
0x1457   :  { %4568 = vmatpush3.bf16.msra.mxu0 %v4567_v27 }
0x1458   :  { %4570 = vmatprep.subr.bf16.mxu0 %v4569_v44 }
0x145b   :  { %4572 = vmatpush3.bf16.msra.mxu0 %v4571_v1 }
0x151d   :  { %v2535_v3 = vpop.f32.mrb[48].mxu0 }
0x151e   :  { %v2540_v60 = vadd.f32 %v2535_v3, %v6033_v56  ;;  %v2537_v30 = vpop.f32.mrb[49].mxu0  ;;  %v2667_v56 = vld [vmem:[#allocation12 + $0xd0] sm:$0xff] }
0x151f   :  { %v2541_v6 = vadd.f32 %v2537_v30, %v6015_v15  ;;  %v4573_v35 = vpack.c.bf16 %v2668_v37, %v2667_v56  ;;  %v2651_v15 = vld [vmem:[#allocation12 + $0x50] sm:$0xff] }
0x1520   :  { %v4575_v51 = vpack.c.bf16 %v2652_v4, %v2651_v15 }
0x1521   :  { %4701 = vtanh.f32 %v2541_v6  ;;  %4574 = vmatprep.subr.bf16.mxu0 %v4573_v35 }
0x1522   :  { %4703 = vtanh.f32 %v2540_v60  ;;  %4576 = vmatpush3.bf16.msra.mxu0 %v4575_v51 }
0x1523   :  { %4578 = vmatprep.subr.bf16.mxu0 %v4577_v48 }
0x1526   :  { %4580 = vmatpush3.bf16.msra.mxu0 %v4579_v18  ;;  %v2966_v18 = vld [vmem:[%s6343_s13] ss:$0 sm:$0xff] }
0x1527   :  { %4582 = vmatprep.subr.bf16.mxu0 %v4581_v8 }
0x152a   :  { %4584 = vmatpush3.bf16.msra.mxu0 %v4583_v12 }
0x152b   :  { %v4702_v14 = vpop.eup %4701  ;;  %4586 = vmatprep.subr.bf16.mxu0 %v4585_v43 }
0x152c   :  { %v6242_v29 = vpop.eup %4703  ;;  %2612 = vmatprep.mubr.f32.mxu1 %v4702_v14 }
0x152d   :  { %2613 = vmatmul.mubr.f32.vlgmr.msra.gmra.mrb[38].mxu1 %v6242_v29 }
0x1600   :  { %v2614_v0 = vpop.f32.mrb[38].mxu1 }
0x1601   :  { %v2619_v55 = vadd.f32 %v2614_v0, %v6035_v45  ;;  %v2616_v21 = vpop.f32.mrb[39].mxu1  ;;  %v2797_v45 = vld [vmem:[%s6342_s12 + $0x20] sm:$0xff] }
0x1602   :  { %v2620_v28 = vadd.f32 %v2616_v21, %v6010_v41 }
0x1604   :  { %4705 = vtanh.f32 %v2620_v28 }
0x1605   :  { %4707 = vtanh.f32 %v2619_v55 }
0x160e   :  { %v4706_v9 = vpop.eup %4705 }
0x160f   :  { %2744 = vmatprep.mubr.f32.mxu0 %v4706_v9  ;;  %v4708_v41 = vpop.eup %4707 }
0x1610   :  { %2745 = vmatmul.mubr.f32.vlgmr.msra.gmra.mrb[50].mxu0 %v6039_v16  ;;  %v2798_v16 = vld [vmem:[%s6342_s12 + $0x28] sm:$0xff] }
0x1611   :  { %2749 = vmatprep.mubr.f32.mxu0 %v4702_v14  ;;  %4588 = vmatpush3.bf16.msra.mxu0 %v4585_v43 }
0x1612   :  { %4590 = vmatprep.subr.bf16.mxu0 %v4589_v33 }
0x1614   :  { %2750 = vmatmul.mubr.f32.gmra.mrb[52].mxu0 %v6078_v61  ;;  %v4593_v61 = vpack.c.bf16 %v2798_v16, %v2797_v45 }
0x1615   :  { %2754 = vmatprep.mubr.f32.mxu0 %v6234_v5  ;;  %4592 = vmatpush3.bf16.msra.mxu0 %v4589_v33 }
0x1616   :  { %4594 = vmatprep.subr.bf16.mxu0 %v4593_v61 }
0x1618   :  { %2755 = vmatmul.mubr.f32.gmra.mrb[54].mxu0 %v6118_v46 }
0x1619   :  { %2759 = vmatprep.mubr.f32.mxu0 %v6195_v32  ;;  %4596 = vmatpush3.bf16.msra.mxu0 %v4593_v61 }
0x161c   :  { %2760 = vmatmul.mubr.f32.gmra.mrb[56].mxu0 %v6158_v54 }
0x161d   :  { %2764 = vmatprep.mubr.f32.mxu0 %v6156_v49  ;;  %v2965_v49 = vld [vmem:[%s6341_s11] ss:$0 sm:$0xff] }
0x1620   :  { %2765 = vmatmul.mubr.f32.gmra.mrb[58].mxu0 %v6197_v25 }
0x1621   :  { %2769 = vmatprep.mubr.f32.mxu0 %v6116_v36 }
0x1624   :  { %2770 = vmatmul.mubr.f32.gmra.mrb[60].mxu0 %v6236_v20 }
0x1625   :  { %2774 = vmatprep.mubr.f32.mxu0 %v6076_v13  ;;  %v2799_v13 = vld [vmem:[%s6342_s12 + $0x30] sm:$0xff] }
0x1628   :  { %2775 = vmatmul.mubr.f32.gmra.mrb[62].mxu0 %v6242_v29 }
0x1629   :  { %2779 = vmatprep.mubr.f32.mxu0 %v6037_v34  ;;  %v2800_v34 = vld [vmem:[%s6342_s12 + $0x38] sm:$0xff] }
0x162a   :  { %v4597_v36 = vpack.c.bf16 %v2800_v34, %v2799_v13 }
0x162c   :  { %2780 = vmatmul.mubr.f32.gmra.mrb[64].mxu0 %v4708_v41  ;;  %4598 = vmatprep.subr.bf16.mxu0 %v4597_v36 }
0x162d   :  { %4600 = vmatpush3.bf16.msra.mxu0 %v4597_v36 }
0x16e3   :  { %v3007_v46 = vpop.f32.mrb[50].mxu0 }
0x16e4   :  { %v3008_v54 = vpop.f32.mrb[51].mxu0 }
0x16e5   :  { %v3009_v32 = vadd.f32 %v3008_v54, %v3007_v46 }
0x16e7   :  { %v2747_v25 = vadd.f32 %v3009_v32, %v2965_v49  ;;  %v3010_v5 = vpop.f32.mrb[52].mxu0 }
0x16e8   :  { %v3011_v20 = vpop.f32.mrb[53].mxu0 }
0x16e9   :  { %v2785_v38 = vmax.f32 %v2747_v25, 0.0  ;;  %v3012_v42 = vadd.f32 %v3011_v20, %v3010_v5 }
0x16eb   :  { %v2752_v59 = vadd.f32 %v3012_v42, %v2965_v49  ;;  %v3013_v26 = vpop.f32.mrb[54].mxu0  ;;  %3063 = vmatprep.mubr.msk.f32.mxu0 %vm2808_vm4, %v2785_v38 }
0x16ec   :  { %v3014_v24 = vpop.f32.mrb[55].mxu0 }
0x16ed   :  { %v2786_v58 = vmax.f32 %v2752_v59, 0.0  ;;  %v3015_v22 = vadd.f32 %v3014_v24, %v3013_v26 }
0x16ef   :  { %v2757_v19 = vadd.f32 %v3015_v22, %v2965_v49  ;;  %v3016_v27 = vpop.f32.mrb[56].mxu0  ;;  %3064 = vmatmul.mubr.msk.f32.vlgmr.msra.gmra.mrb[66].mxu0 %vm2808_vm4, %v2786_v58 }
0x16f0   :  { %v3017_v3 = vpop.f32.mrb[57].mxu0 }
0x16f1   :  { %v2787_v60 = vmax.f32 %v2757_v19, 0.0  ;;  %v3018_v30 = vadd.f32 %v3017_v3, %v3016_v27 }
0x16f3   :  { %v2762_v6 = vadd.f32 %v3018_v30, %v2965_v49  ;;  %v3019_v14 = vpop.f32.mrb[58].mxu0  ;;  %3066 = vmatprep.mubr.msk.f32.mxu0 %vm2808_vm4, %v2787_v60 }
0x16f4   :  { %v3020_v29 = vpop.f32.mrb[59].mxu0 }
0x16f5   :  { %v2788_v53 = vmax.f32 %v2762_v6, 0.0  ;;  %v3021_v11 = vadd.f32 %v3020_v29, %v3019_v14 }
0x16f7   :  { %v2767_v44 = vadd.f32 %v3021_v11, %v2965_v49  ;;  %v3022_v7 = vpop.f32.mrb[60].mxu0  ;;  %3067 = vmatmul.mubr.msk.f32.gmra.mrb[68].mxu0 %vm2808_vm4, %v2788_v53 }
0x16f8   :  { %v3023_v17 = vpop.f32.mrb[61].mxu0 }
0x16f9   :  { %v2789_v1 = vmax.f32 %v2767_v44, 0.0  ;;  %v3024_v56 = vadd.f32 %v3023_v17, %v3022_v7 }
0x16fb   :  { %v2772_v37 = vadd.f32 %v3024_v56, %v2965_v49  ;;  %v3025_v35 = vpop.f32.mrb[62].mxu0  ;;  %3069 = vmatprep.mubr.msk.f32.mxu0 %vm2808_vm4, %v2789_v1 }
0x16fc   :  { %v3026_v15 = vpop.f32.mrb[63].mxu0 }
0x16fd   :  { %v2790_v4 = vmax.f32 %v2772_v37, 0.0  ;;  %v3027_v51 = vadd.f32 %v3026_v15, %v3025_v35 }
0x16ff   :  { %v2777_v62 = vadd.f32 %v3027_v51, %v2965_v49  ;;  %v3028_v2 = vpop.f32.mrb[64].mxu0  ;;  %3070 = vmatmul.mubr.msk.f32.gmra.mrb[70].mxu0 %vm2808_vm4, %v2790_v4 }
0x1700   :  { %v3029_v50 = vpop.f32.mrb[65].mxu0 }
0x1701   :  { %v2791_v48 = vmax.f32 %v2777_v62, 0.0  ;;  %v3030_v31 = vadd.f32 %v3029_v50, %v3028_v2 }
0x1703   :  { %v2782_v52 = vadd.f32 %v3030_v31, %v2965_v49  ;;  %3072 = vmatprep.mubr.msk.f32.mxu0 %vm2808_vm4, %v2791_v48 }
0x1705   :  { %v2792_v63 = vmax.f32 %v2782_v52, 0.0 }
0x1707   :  { %3073 = vmatmul.mubr.msk.f32.gmra.mrb[72].mxu0 %vm2808_vm4, %v2792_v63 }
0x17c2   :  { %v3065_v8 = vpop.f32.mrb[66].mxu0 }
0x17c3   :  { %v2905_v47 = vadd.f32 %v3065_v8, %v2966_v18  ;;  %v2899_v40 = vpop.f32.mrb[67].mxu0 }
0x17c4   :  { %v2900_v12 = vadd.f32 %v2966_v18, %v2899_v40 }
0x17c5   :  { %2940 = vst.msk [vmem:[%s6344_s14 + $0x8] sm:$0xff] %vm2938_vm5, %v2905_v47 }
0x17c6   :  { %2939 = vst.msk [vmem:[%s6344_s14] sm:$0xff] %vm2938_vm5, %v2900_v12 }
0x17ca   :  { %v3068_v57 = vpop.f32.mrb[68].mxu0 }
0x17cb   :  { %v2915_v39 = vadd.f32 %v3068_v57, %v2966_v18  ;;  %v2909_v43 = vpop.f32.mrb[69].mxu0 }
0x17cc   :  { %v2910_v0 = vadd.f32 %v2966_v18, %v2909_v43 }
0x17cd   :  { %2942 = vst.msk [vmem:[%s6344_s14 + $0x18] sm:$0xff] %vm2938_vm5, %v2915_v39 }
0x17ce   :  { %2941 = vst.msk [vmem:[%s6344_s14 + $0x10] sm:$0xff] %vm2938_vm5, %v2910_v0 }
0x17d2   :  { %v3071_v55 = vpop.f32.mrb[70].mxu0 }
0x17d3   :  { %v2925_v21 = vadd.f32 %v3071_v55, %v2966_v18  ;;  %v2919_v28 = vpop.f32.mrb[71].mxu0 }
0x17d4   :  { %v2920_v23 = vadd.f32 %v2966_v18, %v2919_v28 }
0x17d5   :  { %2944 = vst.msk [vmem:[%s6344_s14 + $0x28] sm:$0xff] %vm2938_vm5, %v2925_v21 }
0x17d6   :  { %2943 = vst.msk [vmem:[%s6344_s14 + $0x20] sm:$0xff] %vm2938_vm5, %v2920_v23 }
0x17da   :  { %v3074_v10 = vpop.f32.mrb[72].mxu0 }
0x17db   :  { %v2935_v9 = vadd.f32 %v3074_v10, %v2966_v18  ;;  %v2929_v33 = vpop.f32.mrb[73].mxu0 }
0x17dc   :  { %v2930_v41 = vadd.f32 %v2966_v18, %v2929_v33 }
0x17dd   :  { %2946 = vst.msk [vmem:[%s6344_s14 + $0x38] sm:$0xff] %vm2938_vm5, %v2935_v9 }
0x17de   :  { %2945 = vst.msk [vmem:[%s6344_s14 + $0x30] sm:$0xff] %vm2938_vm5, %v2930_v41 }
0x17df   :  { %2951 = vsyncpa [#allocation5], 1 }
0x17e0   :  { %2952 = vsyncpa [#allocation7], 1 }
0x17e1   :  { %2953 = vsyncpa [#allocation10], 1 }
0x17e2   :  { %2954 = vsyncpa [#allocation13], 1 }

</bundles_post_ra>
